<compile_context>
chip_gen: v5e
topology: v5e:2x2
jax: 0.10.0
libtpu: 0.0.40
codegen_flags: <defaults>
</compile_context>

<pallas_src>
import jax
import jax.numpy as jnp
from jax.experimental import pallas as pl
from jax.experimental.pallas import tpu as pltpu

EPS = 1e-5
KSIZE = 4
_LANE = 128                       # lane width / MXU-friendly padding multiple
_TM = 512                         # M-tile (rows) — ~85% of HBM roofline
_VMEM_LIMIT = 48 * 1024 * 1024    # fits v7x's 64 MiB VMEM with headroom


def _round_up(x, m):
    return (x + m - 1) // m * m


# --------------------------------------------------------------------------
# Pallas kernels
# --------------------------------------------------------------------------
def _gconv_stats_kernel(p_ref, w_ref, y_ref, sum_ref, ssq_ref):
    """Grouped matmul (bf16 in, f32 acc) + per-channel sum / sumsq accumulation.

    Grid = (groups, m_tiles); sum/ssq outputs are resident accumulators across
    the whole grid (both axes 'arbitrary')."""
    @pl.when((pl.program_id(0) == 0) & (pl.program_id(1) == 0))
    def _():
        sum_ref[...] = jnp.zeros_like(sum_ref)
        ssq_ref[...] = jnp.zeros_like(ssq_ref)

    y = jnp.dot(p_ref[0], w_ref[0], preferred_element_type=jnp.float32)
    y_ref[0] = y
    sum_ref[...] += jnp.sum(y, axis=0, keepdims=True)
    ssq_ref[...] += jnp.sum(y * y, axis=0, keepdims=True)


def _bn_relu_kernel(y_ref, scale_ref, shift_ref, o_ref):
    """BatchNorm apply (pre-folded scale/shift) + ReLU. Lean f32 epilogue."""
    o_ref[...] = jnp.maximum(y_ref[...] * scale_ref[...] + shift_ref[...], 0.0)


def _gconv_tanh_kernel(p_ref, w_ref, o_ref):
    """Grouped matmul (bf16 in, f32 acc) + tanh (EUP)."""
    y = jnp.dot(p_ref[0], w_ref[0], preferred_element_type=jnp.float32)
    o_ref[0] = jnp.tanh(y)


# --------------------------------------------------------------------------
# pallas_call wrappers
# --------------------------------------------------------------------------
def _grouped_conv_stats(patches, wmats):
    """patches (G, M, K) f32, wmats (G, K, C) f32 ->
       y (G, Mp, Cp) f32, sum (1, Cp), sumsq (1, Cp)."""
    g, m, k = patches.shape
    c = wmats.shape[2]
    kp = _round_up(k, _LANE)
    cp = _round_up(c, _LANE)
    tm = min(_TM, _round_up(m, 8))
    mp = _round_up(m, tm)
    nt = mp // tm

    p = jnp.pad(patches, ((0, 0), (0, mp - m), (0, kp - k))).astype(jnp.bfloat16)
    w = jnp.pad(wmats, ((0, 0), (0, kp - k), (0, cp - c))).astype(jnp.bfloat16)

    y, s, ss = pl.pallas_call(
        _gconv_stats_kernel,
        out_shape=(jax.ShapeDtypeStruct((g, mp, cp), jnp.float32),
                   jax.ShapeDtypeStruct((1, cp), jnp.float32),
                   jax.ShapeDtypeStruct((1, cp), jnp.float32)),
        grid=(g, nt),
        in_specs=[pl.BlockSpec((1, tm, kp), lambda gi, i: (gi, i, 0)),
                  pl.BlockSpec((1, kp, cp), lambda gi, i: (gi, 0, 0))],
        out_specs=(pl.BlockSpec((1, tm, cp), lambda gi, i: (gi, i, 0)),
                   pl.BlockSpec((1, cp), lambda gi, i: (0, 0)),
                   pl.BlockSpec((1, cp), lambda gi, i: (0, 0))),
        compiler_params=pltpu.CompilerParams(
            dimension_semantics=("arbitrary", "arbitrary"),
            vmem_limit_bytes=_VMEM_LIMIT),
        cost_estimate=pl.CostEstimate(
            flops=2 * g * mp * kp * cp,
            transcendentals=0,
            bytes_accessed=p.size * 2 + w.size * 2 + g * mp * cp * 4 + 8 * cp),
    )(p, w)
    return y, s, ss, m, c


def _bn_relu_apply(y, scale, shift):
    """y (G, Mp, Cp) f32; scale/shift (1, Cp) f32 -> max(y*scale+shift, 0)."""
    g, mp, cp = y.shape
    tm = min(_TM, mp)
    nt = mp // tm
    return pl.pallas_call(
        _bn_relu_kernel,
        out_shape=jax.ShapeDtypeStruct((g, mp, cp), jnp.float32),
        grid=(g, nt),
        in_specs=[pl.BlockSpec((1, tm, cp), lambda gi, i: (gi, i, 0)),
                  pl.BlockSpec((1, cp), lambda gi, i: (0, 0)),
                  pl.BlockSpec((1, cp), lambda gi, i: (0, 0))],
        out_specs=pl.BlockSpec((1, tm, cp), lambda gi, i: (gi, i, 0)),
        compiler_params=pltpu.CompilerParams(
            dimension_semantics=("parallel", "parallel"),
            vmem_limit_bytes=_VMEM_LIMIT),
    )(y, scale.reshape(1, cp), shift.reshape(1, cp))


def _grouped_conv_tanh(patches, wmats):
    """Grouped matmul + tanh; returns (G, M, C) sliced back to real sizes."""
    g, m, k = patches.shape
    c = wmats.shape[2]
    kp = _round_up(k, _LANE)
    cp = _round_up(c, _LANE)   # lane-dense output even for nc=3
    tm = min(_TM, _round_up(m, 8))
    mp = _round_up(m, tm)
    nt = mp // tm

    p = jnp.pad(patches, ((0, 0), (0, mp - m), (0, kp - k))).astype(jnp.bfloat16)
    w = jnp.pad(wmats, ((0, 0), (0, kp - k), (0, cp - c))).astype(jnp.bfloat16)

    out = pl.pallas_call(
        _gconv_tanh_kernel,
        out_shape=jax.ShapeDtypeStruct((g, mp, cp), jnp.float32),
        grid=(g, nt),
        in_specs=[pl.BlockSpec((1, tm, kp), lambda gi, i: (gi, i, 0)),
                  pl.BlockSpec((1, kp, cp), lambda gi, i: (gi, 0, 0))],
        out_specs=pl.BlockSpec((1, tm, cp), lambda gi, i: (gi, i, 0)),
        compiler_params=pltpu.CompilerParams(
            dimension_semantics=("parallel", "parallel"),
            vmem_limit_bytes=_VMEM_LIMIT),
        cost_estimate=pl.CostEstimate(
            flops=2 * g * mp * kp * cp,
            transcendentals=g * mp * cp,
            bytes_accessed=p.size * 2 + w.size * 2 + g * mp * cp * 4),
    )(p, w)
    return out[:, :m, :c]


# --------------------------------------------------------------------------
# Plain-JAX glue: patch extraction / weight reshaping / BN finalization
# --------------------------------------------------------------------------
def _im2col_convT(x_nhwc, k, s, p):
    """Generic ConvTranspose2d-as-flipped-conv im2col (used only for the tiny
    stride-1 first layer, where the 1x1 input makes the blow-up negligible)."""
    N, H, W, Cin = x_nhwc.shape
    Hu = s * (H - 1) + 1
    up = jnp.zeros((N, Hu, Hu, Cin), x_nhwc.dtype).at[:, ::s, ::s, :].set(x_nhwc)
    pad = k - 1 - p
    up = jnp.pad(up, ((0, 0), (pad, pad), (pad, pad), (0, 0)))
    Ho = (H - 1) * s - 2 * p + k
    cols = jnp.stack(
        [up[:, ky:ky + Ho, kx:kx + Ho, :] for ky in range(k) for kx in range(k)],
        axis=3)  # (N, Ho, Wo, k*k, Cin)
    return cols.reshape(N * Ho * Ho, k * k * Cin), Ho


def _wmat(w, k):
    """PyTorch ConvTranspose2d weight (Cin, Cout, kH, kW) -> (k*k*Cin, Cout)
    matrix for the equivalent flipped forward convolution."""
    wf = w[:, :, ::-1, ::-1]
    return jnp.transpose(wf, (2, 3, 0, 1)).reshape(k * k * w.shape[0], w.shape[1])


def _phase_patches_and_weights(x_nhwc, w):
    """ConvTranspose2d(k=4, s=2, p=1) as 4 sub-pixel phase matmuls.

    Output phase (pr, pc) at pixel (2m+pr, 2l+pc) reads the 2x2 input window
    x[m+pr-1+a, l+pc-1+b] (a,b in {0,1}, zero-padded) with kernel taps
    ky = [3,1] (pr=0) / [2,0] (pr=1) and likewise for kx.
    Returns patches (4, N*H*W, 4*Cin) and per-phase weights (4, 4*Cin, Cout)."""
    N, H, W, Cin = x_nhwc.shape
    Cout = w.shape[1]
    xp = jnp.pad(x_nhwc, ((0, 0), (1, 1), (1, 1), (0, 0)))
    pat_list, wm_list = [], []
    for pr in (0, 1):
        for pc in (0, 1):
            cols = jnp.stack(
                [xp[:, pr + a:pr + a + H, pc + b:pc + b + W, :]
                 for a in (0, 1) for b in (0, 1)], axis=3)        # (N,H,W,4,Cin)
            pat_list.append(cols.reshape(N * H * W, 4 * Cin))
            ky = jnp.array((3, 1) if pr == 0 else (2, 0))
            kx = jnp.array((3, 1) if pc == 0 else (2, 0))
            wsub = jnp.take(jnp.take(w, ky, axis=2), kx, axis=3)  # (Cin,Cout,2,2)
            wm_list.append(
                jnp.transpose(wsub, (2, 3, 0, 1)).reshape(4 * Cin, Cout))
    return jnp.stack(pat_list, axis=0), jnp.stack(wm_list, axis=0)


def _interleave_phases(y_phases, N, H, W, C):
    """(4, N*H*W, C) phase outputs -> (N, 2H, 2W, C) with
    out[n, 2h+pr, 2w+pc, :] = y[(pr, pc)][n, h, w, :]."""
    yr = y_phases.reshape(2, 2, N, H, W, C)
    return jnp.transpose(yr, (2, 3, 0, 4, 1, 5)).reshape(N, 2 * H, 2 * W, C)


def _bn_scale_shift(s, ss, count, gamma, beta, cp):
    """Finalize BatchNorm2d training-mode (biased) batch stats into a
    per-channel affine: y_hat = y*scale + shift. Padded channels -> 0."""
    mean = s / count
    var = jnp.maximum(ss / count - mean * mean, 0.0)
    inv = jax.lax.rsqrt(var + EPS)
    g = jnp.pad(gamma, (0, cp - gamma.shape[0])).reshape(1, cp)
    b = jnp.pad(beta, (0, cp - beta.shape[0])).reshape(1, cp)
    scale = g * inv
    shift = b - mean * scale
    return scale, shift


# --------------------------------------------------------------------------
# Per-layer wrappers
# --------------------------------------------------------------------------
def _convt1_bn_relu(x_nhwc, w, gamma, beta):
    """Layer 1: ConvTranspose2d(nz, C, 4, 1, 0) on 1x1 input + BN + ReLU."""
    N = x_nhwc.shape[0]
    patches, ho = _im2col_convT(x_nhwc, KSIZE, 1, 0)
    wmat = _wmat(w, KSIZE)
    y, s, ss, m, c = _grouped_conv_stats(patches[None], wmat[None])
    scale, shift = _bn_scale_shift(s, ss, m, gamma, beta, y.shape[2])
    yact = _bn_relu_apply(y, scale, shift)
    return yact[0, :m, :c].reshape(N, ho, ho, c)


def _convt2x_bn_relu(x_nhwc, w, gamma, beta):
    """ConvTranspose2d(Cin, Cout, 4, 2, 1) + BN + ReLU via phase decomposition."""
    N, H, W, _ = x_nhwc.shape
    patches, wmats = _phase_patches_and_weights(x_nhwc, w)
    y, s, ss, m, c = _grouped_conv_stats(patches, wmats)
    scale, shift = _bn_scale_shift(s, ss, 4 * m, gamma, beta, y.shape[2])
    yact = _bn_relu_apply(y, scale, shift)[:, :m, :c]
    return _interleave_phases(yact, N, H, W, c)


def _convt2x_tanh(x_nhwc, w):
    """Final ConvTranspose2d(Cin, nc, 4, 2, 1) + Tanh via phase decomposition."""
    N, H, W, _ = x_nhwc.shape
    patches, wmats = _phase_patches_and_weights(x_nhwc, w)
    y = _grouped_conv_tanh(patches, wmats)
    return _interleave_phases(y, N, H, W, w.shape[1])


# --------------------------------------------------------------------------
# Full Generator forward (matches the nn.Sequential in the PyTorch module)
# --------------------------------------------------------------------------
def generator_forward(latent_nchw, params):
    h = jnp.transpose(latent_nchw, (0, 2, 3, 1))                        # NCHW->NHWC
    h = _convt1_bn_relu(h, params["w1"], params["g1"], params["b1"])    # 4x4
    h = _convt2x_bn_relu(h, params["w2"], params["g2"], params["b2"])   # 8x8
    h = _convt2x_bn_relu(h, params["w3"], params["g3"], params["b3"])   # 16x16
    h = _convt2x_bn_relu(h, params["w4"], params["g4"], params["b4"])   # 32x32
    h = _convt2x_tanh(h, params["w5"])                                  # 64x64
    return jnp.transpose(h, (0, 3, 1, 2))                               # NHWC->NCHW


def init_params(key, nz, ngf, nc):
    ks = jax.random.split(key, 5)

    def w(k, cin, cout):  # ConvTranspose2d weight layout: (Cin, Cout, kH, kW)
        return 0.02 * jax.random.normal(k, (cin, cout, KSIZE, KSIZE), jnp.float32)

    chans = [ngf * 8, ngf * 4, ngf * 2, ngf]
    params = {
        "w1": w(ks[0], nz, ngf * 8),
        "w2": w(ks[1], ngf * 8, ngf * 4),
        "w3": w(ks[2], ngf * 4, ngf * 2),
        "w4": w(ks[3], ngf * 2, ngf),
        "w5": w(ks[4], ngf, nc),
    }
    # nn.BatchNorm2d default init: weight=1, bias=0
    for i, c in enumerate(chans, start=1):
        params[f"g{i}"] = jnp.ones((c,), jnp.float32)
        params[f"b{i}"] = jnp.zeros((c,), jnp.float32)
    return params


if __name__ == "__main__":
    N, NZ, NGF, NC = 2, 8, 8, 3  # small shapes consistent with the module
    key = jax.random.PRNGKey(0)
    kz, kp = jax.random.split(key)
    latent = jax.random.normal(kz, (N, NZ, 1, 1), jnp.float32)
    params = init_params(kp, NZ, NGF, NC)

    fwd = jax.jit(generator_forward)
    out = jax.block_until_ready(fwd(latent, params))

    assert out.shape == (N, NC, 64, 64), out.shape
    assert bool(jnp.all(jnp.isfinite(out)))
    assert bool(jnp.max(jnp.abs(out)) <= 1.0 + 1e-6)  # tanh range
    print("KERNEL_OK")
</pallas_src>

<mosaic_0001>
module attributes {stable_mosaic.version = 11 : i64} {
  func.func @_gconv_stats_kernel(%arg0: i32, %arg1: i32, %arg2: memref<1x32x128xbf16, #tpu.memory_space<vmem>>, %arg3: memref<1x128x128xbf16, #tpu.memory_space<vmem>>, %arg4: memref<1x32x128xf32, #tpu.memory_space<vmem>>, %arg5: memref<1x128xf32, #tpu.memory_space<vmem>>, %arg6: memref<1x128xf32, #tpu.memory_space<vmem>>) attributes {dimension_semantics = [#tpu.dimension_semantics<arbitrary>, #tpu.dimension_semantics<arbitrary>], iteration_bounds = array<i64: 1, 1>, scalar_prefetch = 0 : i64, scratch_operands = 0 : i64, tpu.core_type = #tpu.core_type<tc>, window_params = [{transform_indices = @transform_0, window_bounds = array<i64: 1, 32, 128>}, {transform_indices = @transform_1, window_bounds = array<i64: 1, 128, 128>}, {transform_indices = @transform_2, window_bounds = array<i64: 1, 32, 128>}, {pipeline_mode = #tpu.pipeline_mode<synchronous>, transform_indices = @transform_3, window_bounds = array<i64: 1, 128>}, {pipeline_mode = #tpu.pipeline_mode<synchronous>, transform_indices = @transform_4, window_bounds = array<i64: 1, 128>}]} {
    %c0_i32 = arith.constant 0 : i32
    %0 = arith.cmpi eq, %arg0, %c0_i32 : i32
    %c0_i32_0 = arith.constant 0 : i32
    %1 = arith.cmpi eq, %arg1, %c0_i32_0 : i32
    %2 = arith.andi %0, %1 : i1
    %3 = arith.extui %2 : i1 to i32
    %c0_i32_1 = arith.constant 0 : i32
    %4 = arith.cmpi ne, %3, %c0_i32_1 : i32
    scf.if %4 {
      %cst_20 = arith.constant 0.000000e+00 : f32
      %24 = vector.broadcast %cst_20 : f32 to vector<1x128xf32>
      %c0_21 = arith.constant 0 : index
      %c0_22 = arith.constant 0 : index
      %25 = vector.load %arg5[%c0_21, %c0_22] : memref<1x128xf32, #tpu.memory_space<vmem>>, vector<1x128xf32>
      tpu.vector_store %arg5[%c0_21, %c0_22], %24 {strides = array<i32>} : memref<1x128xf32, #tpu.memory_space<vmem>>, vector<1x128xf32>,
      %cst_23 = arith.constant 0.000000e+00 : f32
      %26 = vector.broadcast %cst_23 : f32 to vector<1x128xf32>
      %c0_24 = arith.constant 0 : index
      %c0_25 = arith.constant 0 : index
      %27 = vector.load %arg6[%c0_24, %c0_25] : memref<1x128xf32, #tpu.memory_space<vmem>>, vector<1x128xf32>
      tpu.vector_store %arg6[%c0_24, %c0_25], %26 {strides = array<i32>} : memref<1x128xf32, #tpu.memory_space<vmem>>, vector<1x128xf32>,
    } else {
    }
    %c0 = arith.constant 0 : index
    %c0_2 = arith.constant 0 : index
    %c0_3 = arith.constant 0 : index
    %5 = vector.load %arg2[%c0, %c0_2, %c0_3] : memref<1x32x128xbf16, #tpu.memory_space<vmem>>, vector<1x32x128xbf16>
    %6 = vector.shape_cast %5 : vector<1x32x128xbf16> to vector<32x128xbf16>
    %c0_4 = arith.constant 0 : index
    %c0_5 = arith.constant 0 : index
    %c0_6 = arith.constant 0 : index
    %7 = vector.load %arg3[%c0_4, %c0_5, %c0_6] : memref<1x128x128xbf16, #tpu.memory_space<vmem>>, vector<1x128x128xbf16>
    %8 = vector.shape_cast %7 : vector<1x128x128xbf16> to vector<128x128xbf16>
    %cst = arith.constant dense<0.000000e+00> : vector<32x128xf32>
    %9 = tpu.matmul %6, %8, %cst {dimension_numbers = #tpu.dot_dimension_numbers<[1], [0], [0], [1], [0, 0, 1, 1], [], []>} : vector<32x128xbf16>, vector<128x128xbf16>, vector<32x128xf32> -> vector<32x128xf32>
    %c0_7 = arith.constant 0 : index
    %c0_8 = arith.constant 0 : index
    %c0_9 = arith.constant 0 : index
    %10 = vector.load %arg4[%c0_7, %c0_8, %c0_9] : memref<1x32x128xf32, #tpu.memory_space<vmem>>, vector<1x32x128xf32>
    %11 = vector.shape_cast %10 : vector<1x32x128xf32> to vector<32x128xf32>
    %12 = vector.shape_cast %9 : vector<32x128xf32> to vector<1x32x128xf32>
    tpu.vector_store %arg4[%c0_7, %c0_8, %c0_9], %12 {strides = array<i32>} : memref<1x32x128xf32, #tpu.memory_space<vmem>>, vector<1x32x128xf32>,
    %c0_10 = arith.constant 0 : index
    %c0_11 = arith.constant 0 : index
    %13 = vector.load %arg5[%c0_10, %c0_11] : memref<1x128xf32, #tpu.memory_space<vmem>>, vector<1x128xf32>
    %cst_12 = arith.constant dense<0.000000e+00> : vector<128xf32>
    %14 = vector.multi_reduction <add>, %9, %cst_12 [0] : vector<32x128xf32> to vector<128xf32>
    %15 = vector.shape_cast %14 : vector<128xf32> to vector<1x128xf32>
    %16 = arith.addf %13, %15 : vector<1x128xf32>
    %c0_13 = arith.constant 0 : index
    %c0_14 = arith.constant 0 : index
    %17 = vector.load %arg5[%c0_13, %c0_14] : memref<1x128xf32, #tpu.memory_space<vmem>>, vector<1x128xf32>
    tpu.vector_store %arg5[%c0_13, %c0_14], %16 {strides = array<i32>} : memref<1x128xf32, #tpu.memory_space<vmem>>, vector<1x128xf32>,
    %c0_15 = arith.constant 0 : index
    %c0_16 = arith.constant 0 : index
    %18 = vector.load %arg6[%c0_15, %c0_16] : memref<1x128xf32, #tpu.memory_space<vmem>>, vector<1x128xf32>
    %19 = arith.mulf %9, %9 : vector<32x128xf32>
    %cst_17 = arith.constant dense<0.000000e+00> : vector<128xf32>
    %20 = vector.multi_reduction <add>, %19, %cst_17 [0] : vector<32x128xf32> to vector<128xf32>
    %21 = vector.shape_cast %20 : vector<128xf32> to vector<1x128xf32>
    %22 = arith.addf %18, %21 : vector<1x128xf32>
    %c0_18 = arith.constant 0 : index
    %c0_19 = arith.constant 0 : index
    %23 = vector.load %arg6[%c0_18, %c0_19] : memref<1x128xf32, #tpu.memory_space<vmem>>, vector<1x128xf32>
    tpu.vector_store %arg6[%c0_18, %c0_19], %22 {strides = array<i32>} : memref<1x128xf32, #tpu.memory_space<vmem>>, vector<1x128xf32>,
    return
  }
  func.func @transform_0(%arg0: i32, %arg1: i32) -> (i32, i32, i32) {
    %c0_i32 = arith.constant 0 : i32
    %c0_i32_0 = arith.constant 0 : i32
    return %arg0, %arg1, %c0_i32 : i32, i32, i32
  }
  func.func @transform_1(%arg0: i32, %arg1: i32) -> (i32, i32, i32) {
    %c0_i32 = arith.constant 0 : i32
    %c0_i32_0 = arith.constant 0 : i32
    %c0_i32_1 = arith.constant 0 : i32
    return %arg0, %c0_i32, %c0_i32_0 : i32, i32, i32
  }
  func.func @transform_2(%arg0: i32, %arg1: i32) -> (i32, i32, i32) {
    %c0_i32 = arith.constant 0 : i32
    %c0_i32_0 = arith.constant 0 : i32
    return %arg0, %arg1, %c0_i32 : i32, i32, i32
  }
  func.func @transform_3(%arg0: i32, %arg1: i32) -> (i32, i32) {
    %c0_i32 = arith.constant 0 : i32
    %c0_i32_0 = arith.constant 0 : i32
    %c0_i32_1 = arith.constant 0 : i32
    return %c0_i32, %c0_i32_0 : i32, i32
  }
  func.func @transform_4(%arg0: i32, %arg1: i32) -> (i32, i32) {
    %c0_i32 = arith.constant 0 : i32
    %c0_i32_0 = arith.constant 0 : i32
    %c0_i32_1 = arith.constant 0 : i32
    return %c0_i32, %c0_i32_0 : i32, i32
  }
}

module attributes {stable_mosaic.version = 11 : i64} {
  func.func @_bn_relu_kernel(%arg0: i32, %arg1: i32, %arg2: memref<1x32x128xf32, #tpu.memory_space<vmem>>, %arg3: memref<1x128xf32, #tpu.memory_space<vmem>>, %arg4: memref<1x128xf32, #tpu.memory_space<vmem>>, %arg5: memref<1x32x128xf32, #tpu.memory_space<vmem>>) attributes {dimension_semantics = [#tpu.dimension_semantics<parallel>, #tpu.dimension_semantics<parallel>], iteration_bounds = array<i64: 1, 1>, scalar_prefetch = 0 : i64, scratch_operands = 0 : i64, tpu.core_type = #tpu.core_type<tc>, window_params = [{transform_indices = @transform_0, window_bounds = array<i64: 1, 32, 128>}, {pipeline_mode = #tpu.pipeline_mode<synchronous>, transform_indices = @transform_1, window_bounds = array<i64: 1, 128>}, {pipeline_mode = #tpu.pipeline_mode<synchronous>, transform_indices = @transform_2, window_bounds = array<i64: 1, 128>}, {transform_indices = @transform_3, window_bounds = array<i64: 1, 32, 128>}]} {
    %c0 = arith.constant 0 : index
    %c0_0 = arith.constant 0 : index
    %c0_1 = arith.constant 0 : index
    %0 = vector.load %arg2[%c0, %c0_0, %c0_1] : memref<1x32x128xf32, #tpu.memory_space<vmem>>, vector<1x32x128xf32>
    %c0_2 = arith.constant 0 : index
    %c0_3 = arith.constant 0 : index
    %1 = vector.load %arg3[%c0_2, %c0_3] : memref<1x128xf32, #tpu.memory_space<vmem>>, vector<1x128xf32>
    %2 = vector.shape_cast %1 : vector<1x128xf32> to vector<1x1x128xf32>
    %3 = vector.broadcast %2 : vector<1x1x128xf32> to vector<1x32x128xf32>
    %4 = arith.mulf %0, %3 : vector<1x32x128xf32>
    %c0_4 = arith.constant 0 : index
    %c0_5 = arith.constant 0 : index
    %5 = vector.load %arg4[%c0_4, %c0_5] : memref<1x128xf32, #tpu.memory_space<vmem>>, vector<1x128xf32>
    %6 = vector.shape_cast %5 : vector<1x128xf32> to vector<1x1x128xf32>
    %7 = vector.broadcast %6 : vector<1x1x128xf32> to vector<1x32x128xf32>
    %8 = arith.addf %4, %7 : vector<1x32x128xf32>
    %cst = arith.constant 0.000000e+00 : f32
    %9 = vector.broadcast %cst : f32 to vector<1x32x128xf32>
    %10 = arith.maximumf %8, %9 : vector<1x32x128xf32>
    %c0_6 = arith.constant 0 : index
    %c0_7 = arith.constant 0 : index
    %c0_8 = arith.constant 0 : index
    %11 = vector.load %arg5[%c0_6, %c0_7, %c0_8] : memref<1x32x128xf32, #tpu.memory_space<vmem>>, vector<1x32x128xf32>
    tpu.vector_store %arg5[%c0_6, %c0_7, %c0_8], %10 {strides = array<i32>} : memref<1x32x128xf32, #tpu.memory_space<vmem>>, vector<1x32x128xf32>,
    return
  }
  func.func @transform_0(%arg0: i32, %arg1: i32) -> (i32, i32, i32) {
    %c0_i32 = arith.constant 0 : i32
    %c0_i32_0 = arith.constant 0 : i32
    return %arg0, %arg1, %c0_i32 : i32, i32, i32
  }
  func.func @transform_1(%arg0: i32, %arg1: i32) -> (i32, i32) {
    %c0_i32 = arith.constant 0 : i32
    %c0_i32_0 = arith.constant 0 : i32
    %c0_i32_1 = arith.constant 0 : i32
    return %c0_i32, %c0_i32_0 : i32, i32
  }
  func.func @transform_2(%arg0: i32, %arg1: i32) -> (i32, i32) {
    %c0_i32 = arith.constant 0 : i32
    %c0_i32_0 = arith.constant 0 : i32
    %c0_i32_1 = arith.constant 0 : i32
    return %c0_i32, %c0_i32_0 : i32, i32
  }
  func.func @transform_3(%arg0: i32, %arg1: i32) -> (i32, i32, i32) {
    %c0_i32 = arith.constant 0 : i32
    %c0_i32_0 = arith.constant 0 : i32
    return %arg0, %arg1, %c0_i32 : i32, i32, i32
  }
}

module attributes {stable_mosaic.version = 11 : i64} {
  func.func @_gconv_stats_kernel(%arg0: i32, %arg1: i32, %arg2: memref<1x32x256xbf16, #tpu.memory_space<vmem>>, %arg3: memref<1x256x128xbf16, #tpu.memory_space<vmem>>, %arg4: memref<1x32x128xf32, #tpu.memory_space<vmem>>, %arg5: memref<1x128xf32, #tpu.memory_space<vmem>>, %arg6: memref<1x128xf32, #tpu.memory_space<vmem>>) attributes {dimension_semantics = [#tpu.dimension_semantics<arbitrary>, #tpu.dimension_semantics<arbitrary>], iteration_bounds = array<i64: 4, 1>, scalar_prefetch = 0 : i64, scratch_operands = 0 : i64, tpu.core_type = #tpu.core_type<tc>, window_params = [{transform_indices = @transform_0, window_bounds = array<i64: 1, 32, 256>}, {transform_indices = @transform_1, window_bounds = array<i64: 1, 256, 128>}, {transform_indices = @transform_2, window_bounds = array<i64: 1, 32, 128>}, {pipeline_mode = #tpu.pipeline_mode<synchronous>, transform_indices = @transform_3, window_bounds = array<i64: 1, 128>}, {pipeline_mode = #tpu.pipeline_mode<synchronous>, transform_indices = @transform_4, window_bounds = array<i64: 1, 128>}]} {
    %c0_i32 = arith.constant 0 : i32
    %0 = arith.cmpi eq, %arg0, %c0_i32 : i32
    %c0_i32_0 = arith.constant 0 : i32
    %1 = arith.cmpi eq, %arg1, %c0_i32_0 : i32
    %2 = arith.andi %0, %1 : i1
    %3 = arith.extui %2 : i1 to i32
    %c0_i32_1 = arith.constant 0 : i32
    %4 = arith.cmpi ne, %3, %c0_i32_1 : i32
    scf.if %4 {
      %cst_20 = arith.constant 0.000000e+00 : f32
      %24 = vector.broadcast %cst_20 : f32 to vector<1x128xf32>
      %c0_21 = arith.constant 0 : index
      %c0_22 = arith.constant 0 : index
      %25 = vector.load %arg5[%c0_21, %c0_22] : memref<1x128xf32, #tpu.memory_space<vmem>>, vector<1x128xf32>
      tpu.vector_store %arg5[%c0_21, %c0_22], %24 {strides = array<i32>} : memref<1x128xf32, #tpu.memory_space<vmem>>, vector<1x128xf32>,
      %cst_23 = arith.constant 0.000000e+00 : f32
      %26 = vector.broadcast %cst_23 : f32 to vector<1x128xf32>
      %c0_24 = arith.constant 0 : index
      %c0_25 = arith.constant 0 : index
      %27 = vector.load %arg6[%c0_24, %c0_25] : memref<1x128xf32, #tpu.memory_space<vmem>>, vector<1x128xf32>
      tpu.vector_store %arg6[%c0_24, %c0_25], %26 {strides = array<i32>} : memref<1x128xf32, #tpu.memory_space<vmem>>, vector<1x128xf32>,
    } else {
    }
    %c0 = arith.constant 0 : index
    %c0_2 = arith.constant 0 : index
    %c0_3 = arith.constant 0 : index
    %5 = vector.load %arg2[%c0, %c0_2, %c0_3] : memref<1x32x256xbf16, #tpu.memory_space<vmem>>, vector<1x32x256xbf16>
    %6 = vector.shape_cast %5 : vector<1x32x256xbf16> to vector<32x256xbf16>
    %c0_4 = arith.constant 0 : index
    %c0_5 = arith.constant 0 : index
    %c0_6 = arith.constant 0 : index
    %7 = vector.load %arg3[%c0_4, %c0_5, %c0_6] : memref<1x256x128xbf16, #tpu.memory_space<vmem>>, vector<1x256x128xbf16>
    %8 = vector.shape_cast %7 : vector<1x256x128xbf16> to vector<256x128xbf16>
    %cst = arith.constant dense<0.000000e+00> : vector<32x128xf32>
    %9 = tpu.matmul %6, %8, %cst {dimension_numbers = #tpu.dot_dimension_numbers<[1], [0], [0], [1], [0, 0, 1, 1], [], []>} : vector<32x256xbf16>, vector<256x128xbf16>, vector<32x128xf32> -> vector<32x128xf32>
    %c0_7 = arith.constant 0 : index
    %c0_8 = arith.constant 0 : index
    %c0_9 = arith.constant 0 : index
    %10 = vector.load %arg4[%c0_7, %c0_8, %c0_9] : memref<1x32x128xf32, #tpu.memory_space<vmem>>, vector<1x32x128xf32>
    %11 = vector.shape_cast %10 : vector<1x32x128xf32> to vector<32x128xf32>
    %12 = vector.shape_cast %9 : vector<32x128xf32> to vector<1x32x128xf32>
    tpu.vector_store %arg4[%c0_7, %c0_8, %c0_9], %12 {strides = array<i32>} : memref<1x32x128xf32, #tpu.memory_space<vmem>>, vector<1x32x128xf32>,
    %c0_10 = arith.constant 0 : index
    %c0_11 = arith.constant 0 : index
    %13 = vector.load %arg5[%c0_10, %c0_11] : memref<1x128xf32, #tpu.memory_space<vmem>>, vector<1x128xf32>
    %cst_12 = arith.constant dense<0.000000e+00> : vector<128xf32>
    %14 = vector.multi_reduction <add>, %9, %cst_12 [0] : vector<32x128xf32> to vector<128xf32>
    %15 = vector.shape_cast %14 : vector<128xf32> to vector<1x128xf32>
    %16 = arith.addf %13, %15 : vector<1x128xf32>
    %c0_13 = arith.constant 0 : index
    %c0_14 = arith.constant 0 : index
    %17 = vector.load %arg5[%c0_13, %c0_14] : memref<1x128xf32, #tpu.memory_space<vmem>>, vector<1x128xf32>
    tpu.vector_store %arg5[%c0_13, %c0_14], %16 {strides = array<i32>} : memref<1x128xf32, #tpu.memory_space<vmem>>, vector<1x128xf32>,
    %c0_15 = arith.constant 0 : index
    %c0_16 = arith.constant 0 : index
    %18 = vector.load %arg6[%c0_15, %c0_16] : memref<1x128xf32, #tpu.memory_space<vmem>>, vector<1x128xf32>
    %19 = arith.mulf %9, %9 : vector<32x128xf32>
    %cst_17 = arith.constant dense<0.000000e+00> : vector<128xf32>
    %20 = vector.multi_reduction <add>, %19, %cst_17 [0] : vector<32x128xf32> to vector<128xf32>
    %21 = vector.shape_cast %20 : vector<128xf32> to vector<1x128xf32>
    %22 = arith.addf %18, %21 : vector<1x128xf32>
    %c0_18 = arith.constant 0 : index
    %c0_19 = arith.constant 0 : index
    %23 = vector.load %arg6[%c0_18, %c0_19] : memref<1x128xf32, #tpu.memory_space<vmem>>, vector<1x128xf32>
    tpu.vector_store %arg6[%c0_18, %c0_19], %22 {strides = array<i32>} : memref<1x128xf32, #tpu.memory_space<vmem>>, vector<1x128xf32>,
    return
  }
  func.func @transform_0(%arg0: i32, %arg1: i32) -> (i32, i32, i32) {
    %c0_i32 = arith.constant 0 : i32
    %c0_i32_0 = arith.constant 0 : i32
    return %arg0, %arg1, %c0_i32 : i32, i32, i32
  }
  func.func @transform_1(%arg0: i32, %arg1: i32) -> (i32, i32, i32) {
    %c0_i32 = arith.constant 0 : i32
    %c0_i32_0 = arith.constant 0 : i32
    %c0_i32_1 = arith.constant 0 : i32
    return %arg0, %c0_i32, %c0_i32_0 : i32, i32, i32
  }
  func.func @transform_2(%arg0: i32, %arg1: i32) -> (i32, i32, i32) {
    %c0_i32 = arith.constant 0 : i32
    %c0_i32_0 = arith.constant 0 : i32
    return %arg0, %arg1, %c0_i32 : i32, i32, i32
  }
  func.func @transform_3(%arg0: i32, %arg1: i32) -> (i32, i32) {
    %c0_i32 = arith.constant 0 : i32
    %c0_i32_0 = arith.constant 0 : i32
    %c0_i32_1 = arith.constant 0 : i32
    return %c0_i32, %c0_i32_0 : i32, i32
  }
  func.func @transform_4(%arg0: i32, %arg1: i32) -> (i32, i32) {
    %c0_i32 = arith.constant 0 : i32
    %c0_i32_0 = arith.constant 0 : i32
    %c0_i32_1 = arith.constant 0 : i32
    return %c0_i32, %c0_i32_0 : i32, i32
  }
}

module attributes {stable_mosaic.version = 11 : i64} {
  func.func @_bn_relu_kernel(%arg0: i32, %arg1: i32, %arg2: memref<1x32x128xf32, #tpu.memory_space<vmem>>, %arg3: memref<1x128xf32, #tpu.memory_space<vmem>>, %arg4: memref<1x128xf32, #tpu.memory_space<vmem>>, %arg5: memref<1x32x128xf32, #tpu.memory_space<vmem>>) attributes {dimension_semantics = [#tpu.dimension_semantics<parallel>, #tpu.dimension_semantics<parallel>], iteration_bounds = array<i64: 4, 1>, scalar_prefetch = 0 : i64, scratch_operands = 0 : i64, tpu.core_type = #tpu.core_type<tc>, window_params = [{transform_indices = @transform_0, window_bounds = array<i64: 1, 32, 128>}, {pipeline_mode = #tpu.pipeline_mode<synchronous>, transform_indices = @transform_1, window_bounds = array<i64: 1, 128>}, {pipeline_mode = #tpu.pipeline_mode<synchronous>, transform_indices = @transform_2, window_bounds = array<i64: 1, 128>}, {transform_indices = @transform_3, window_bounds = array<i64: 1, 32, 128>}]} {
    %c0 = arith.constant 0 : index
    %c0_0 = arith.constant 0 : index
    %c0_1 = arith.constant 0 : index
    %0 = vector.load %arg2[%c0, %c0_0, %c0_1] : memref<1x32x128xf32, #tpu.memory_space<vmem>>, vector<1x32x128xf32>
    %c0_2 = arith.constant 0 : index
    %c0_3 = arith.constant 0 : index
    %1 = vector.load %arg3[%c0_2, %c0_3] : memref<1x128xf32, #tpu.memory_space<vmem>>, vector<1x128xf32>
    %2 = vector.shape_cast %1 : vector<1x128xf32> to vector<1x1x128xf32>
    %3 = vector.broadcast %2 : vector<1x1x128xf32> to vector<1x32x128xf32>
    %4 = arith.mulf %0, %3 : vector<1x32x128xf32>
    %c0_4 = arith.constant 0 : index
    %c0_5 = arith.constant 0 : index
    %5 = vector.load %arg4[%c0_4, %c0_5] : memref<1x128xf32, #tpu.memory_space<vmem>>, vector<1x128xf32>
    %6 = vector.shape_cast %5 : vector<1x128xf32> to vector<1x1x128xf32>
    %7 = vector.broadcast %6 : vector<1x1x128xf32> to vector<1x32x128xf32>
    %8 = arith.addf %4, %7 : vector<1x32x128xf32>
    %cst = arith.constant 0.000000e+00 : f32
    %9 = vector.broadcast %cst : f32 to vector<1x32x128xf32>
    %10 = arith.maximumf %8, %9 : vector<1x32x128xf32>
    %c0_6 = arith.constant 0 : index
    %c0_7 = arith.constant 0 : index
    %c0_8 = arith.constant 0 : index
    %11 = vector.load %arg5[%c0_6, %c0_7, %c0_8] : memref<1x32x128xf32, #tpu.memory_space<vmem>>, vector<1x32x128xf32>
    tpu.vector_store %arg5[%c0_6, %c0_7, %c0_8], %10 {strides = array<i32>} : memref<1x32x128xf32, #tpu.memory_space<vmem>>, vector<1x32x128xf32>,
    return
  }
  func.func @transform_0(%arg0: i32, %arg1: i32) -> (i32, i32, i32) {
    %c0_i32 = arith.constant 0 : i32
    %c0_i32_0 = arith.constant 0 : i32
    return %arg0, %arg1, %c0_i32 : i32, i32, i32
  }
  func.func @transform_1(%arg0: i32, %arg1: i32) -> (i32, i32) {
    %c0_i32 = arith.constant 0 : i32
    %c0_i32_0 = arith.constant 0 : i32
    %c0_i32_1 = arith.constant 0 : i32
    return %c0_i32, %c0_i32_0 : i32, i32
  }
  func.func @transform_2(%arg0: i32, %arg1: i32) -> (i32, i32) {
    %c0_i32 = arith.constant 0 : i32
    %c0_i32_0 = arith.constant 0 : i32
    %c0_i32_1 = arith.constant 0 : i32
    return %c0_i32, %c0_i32_0 : i32, i32
  }
  func.func @transform_3(%arg0: i32, %arg1: i32) -> (i32, i32, i32) {
    %c0_i32 = arith.constant 0 : i32
    %c0_i32_0 = arith.constant 0 : i32
    return %arg0, %arg1, %c0_i32 : i32, i32, i32
  }
}

module attributes {stable_mosaic.version = 11 : i64} {
  func.func @_gconv_stats_kernel(%arg0: i32, %arg1: i32, %arg2: memref<1x128x128xbf16, #tpu.memory_space<vmem>>, %arg3: memref<1x128x128xbf16, #tpu.memory_space<vmem>>, %arg4: memref<1x128x128xf32, #tpu.memory_space<vmem>>, %arg5: memref<1x128xf32, #tpu.memory_space<vmem>>, %arg6: memref<1x128xf32, #tpu.memory_space<vmem>>) attributes {dimension_semantics = [#tpu.dimension_semantics<arbitrary>, #tpu.dimension_semantics<arbitrary>], iteration_bounds = array<i64: 4, 1>, scalar_prefetch = 0 : i64, scratch_operands = 0 : i64, tpu.core_type = #tpu.core_type<tc>, window_params = [{transform_indices = @transform_0, window_bounds = array<i64: 1, 128, 128>}, {transform_indices = @transform_1, window_bounds = array<i64: 1, 128, 128>}, {transform_indices = @transform_2, window_bounds = array<i64: 1, 128, 128>}, {pipeline_mode = #tpu.pipeline_mode<synchronous>, transform_indices = @transform_3, window_bounds = array<i64: 1, 128>}, {pipeline_mode = #tpu.pipeline_mode<synchronous>, transform_indices = @transform_4, window_bounds = array<i64: 1, 128>}]} {
    %c0_i32 = arith.constant 0 : i32
    %0 = arith.cmpi eq, %arg0, %c0_i32 : i32
    %c0_i32_0 = arith.constant 0 : i32
    %1 = arith.cmpi eq, %arg1, %c0_i32_0 : i32
    %2 = arith.andi %0, %1 : i1
    %3 = arith.extui %2 : i1 to i32
    %c0_i32_1 = arith.constant 0 : i32
    %4 = arith.cmpi ne, %3, %c0_i32_1 : i32
    scf.if %4 {
      %cst_20 = arith.constant 0.000000e+00 : f32
      %24 = vector.broadcast %cst_20 : f32 to vector<1x128xf32>
      %c0_21 = arith.constant 0 : index
      %c0_22 = arith.constant 0 : index
      %25 = vector.load %arg5[%c0_21, %c0_22] : memref<1x128xf32, #tpu.memory_space<vmem>>, vector<1x128xf32>
      tpu.vector_store %arg5[%c0_21, %c0_22], %24 {strides = array<i32>} : memref<1x128xf32, #tpu.memory_space<vmem>>, vector<1x128xf32>,
      %cst_23 = arith.constant 0.000000e+00 : f32
      %26 = vector.broadcast %cst_23 : f32 to vector<1x128xf32>
      %c0_24 = arith.constant 0 : index
      %c0_25 = arith.constant 0 : index
      %27 = vector.load %arg6[%c0_24, %c0_25] : memref<1x128xf32, #tpu.memory_space<vmem>>, vector<1x128xf32>
      tpu.vector_store %arg6[%c0_24, %c0_25], %26 {strides = array<i32>} : memref<1x128xf32, #tpu.memory_space<vmem>>, vector<1x128xf32>,
    } else {
    }
    %c0 = arith.constant 0 : index
    %c0_2 = arith.constant 0 : index
    %c0_3 = arith.constant 0 : index
    %5 = vector.load %arg2[%c0, %c0_2, %c0_3] : memref<1x128x128xbf16, #tpu.memory_space<vmem>>, vector<1x128x128xbf16>
    %6 = vector.shape_cast %5 : vector<1x128x128xbf16> to vector<128x128xbf16>
    %c0_4 = arith.constant 0 : index
    %c0_5 = arith.constant 0 : index
    %c0_6 = arith.constant 0 : index
    %7 = vector.load %arg3[%c0_4, %c0_5, %c0_6] : memref<1x128x128xbf16, #tpu.memory_space<vmem>>, vector<1x128x128xbf16>
    %8 = vector.shape_cast %7 : vector<1x128x128xbf16> to vector<128x128xbf16>
    %cst = arith.constant dense<0.000000e+00> : vector<128x128xf32>
    %9 = tpu.matmul %6, %8, %cst {dimension_numbers = #tpu.dot_dimension_numbers<[1], [0], [0], [1], [0, 0, 1, 1], [], []>} : vector<128x128xbf16>, vector<128x128xbf16>, vector<128x128xf32> -> vector<128x128xf32>
    %c0_7 = arith.constant 0 : index
    %c0_8 = arith.constant 0 : index
    %c0_9 = arith.constant 0 : index
    %10 = vector.load %arg4[%c0_7, %c0_8, %c0_9] : memref<1x128x128xf32, #tpu.memory_space<vmem>>, vector<1x128x128xf32>
    %11 = vector.shape_cast %10 : vector<1x128x128xf32> to vector<128x128xf32>
    %12 = vector.shape_cast %9 : vector<128x128xf32> to vector<1x128x128xf32>
    tpu.vector_store %arg4[%c0_7, %c0_8, %c0_9], %12 {strides = array<i32>} : memref<1x128x128xf32, #tpu.memory_space<vmem>>, vector<1x128x128xf32>,
    %c0_10 = arith.constant 0 : index
    %c0_11 = arith.constant 0 : index
    %13 = vector.load %arg5[%c0_10, %c0_11] : memref<1x128xf32, #tpu.memory_space<vmem>>, vector<1x128xf32>
    %cst_12 = arith.constant dense<0.000000e+00> : vector<128xf32>
    %14 = vector.multi_reduction <add>, %9, %cst_12 [0] : vector<128x128xf32> to vector<128xf32>
    %15 = vector.shape_cast %14 : vector<128xf32> to vector<1x128xf32>
    %16 = arith.addf %13, %15 : vector<1x128xf32>
    %c0_13 = arith.constant 0 : index
    %c0_14 = arith.constant 0 : index
    %17 = vector.load %arg5[%c0_13, %c0_14] : memref<1x128xf32, #tpu.memory_space<vmem>>, vector<1x128xf32>
    tpu.vector_store %arg5[%c0_13, %c0_14], %16 {strides = array<i32>} : memref<1x128xf32, #tpu.memory_space<vmem>>, vector<1x128xf32>,
    %c0_15 = arith.constant 0 : index
    %c0_16 = arith.constant 0 : index
    %18 = vector.load %arg6[%c0_15, %c0_16] : memref<1x128xf32, #tpu.memory_space<vmem>>, vector<1x128xf32>
    %19 = arith.mulf %9, %9 : vector<128x128xf32>
    %cst_17 = arith.constant dense<0.000000e+00> : vector<128xf32>
    %20 = vector.multi_reduction <add>, %19, %cst_17 [0] : vector<128x128xf32> to vector<128xf32>
    %21 = vector.shape_cast %20 : vector<128xf32> to vector<1x128xf32>
    %22 = arith.addf %18, %21 : vector<1x128xf32>
    %c0_18 = arith.constant 0 : index
    %c0_19 = arith.constant 0 : index
    %23 = vector.load %arg6[%c0_18, %c0_19] : memref<1x128xf32, #tpu.memory_space<vmem>>, vector<1x128xf32>
    tpu.vector_store %arg6[%c0_18, %c0_19], %22 {strides = array<i32>} : memref<1x128xf32, #tpu.memory_space<vmem>>, vector<1x128xf32>,
    return
  }
  func.func @transform_0(%arg0: i32, %arg1: i32) -> (i32, i32, i32) {
    %c0_i32 = arith.constant 0 : i32
    %c0_i32_0 = arith.constant 0 : i32
    return %arg0, %arg1, %c0_i32 : i32, i32, i32
  }
  func.func @transform_1(%arg0: i32, %arg1: i32) -> (i32, i32, i32) {
    %c0_i32 = arith.constant 0 : i32
    %c0_i32_0 = arith.constant 0 : i32
    %c0_i32_1 = arith.constant 0 : i32
    return %arg0, %c0_i32, %c0_i32_0 : i32, i32, i32
  }
  func.func @transform_2(%arg0: i32, %arg1: i32) -> (i32, i32, i32) {
    %c0_i32 = arith.constant 0 : i32
    %c0_i32_0 = arith.constant 0 : i32
    return %arg0, %arg1, %c0_i32 : i32, i32, i32
  }
  func.func @transform_3(%arg0: i32, %arg1: i32) -> (i32, i32) {
    %c0_i32 = arith.constant 0 : i32
    %c0_i32_0 = arith.constant 0 : i32
    %c0_i32_1 = arith.constant 0 : i32
    return %c0_i32, %c0_i32_0 : i32, i32
  }
  func.func @transform_4(%arg0: i32, %arg1: i32) -> (i32, i32) {
    %c0_i32 = arith.constant 0 : i32
    %c0_i32_0 = arith.constant 0 : i32
    %c0_i32_1 = arith.constant 0 : i32
    return %c0_i32, %c0_i32_0 : i32, i32
  }
}

module attributes {stable_mosaic.version = 11 : i64} {
  func.func @_bn_relu_kernel(%arg0: i32, %arg1: i32, %arg2: memref<1x128x128xf32, #tpu.memory_space<vmem>>, %arg3: memref<1x128xf32, #tpu.memory_space<vmem>>, %arg4: memref<1x128xf32, #tpu.memory_space<vmem>>, %arg5: memref<1x128x128xf32, #tpu.memory_space<vmem>>) attributes {dimension_semantics = [#tpu.dimension_semantics<parallel>, #tpu.dimension_semantics<parallel>], iteration_bounds = array<i64: 4, 1>, scalar_prefetch = 0 : i64, scratch_operands = 0 : i64, tpu.core_type = #tpu.core_type<tc>, window_params = [{transform_indices = @transform_0, window_bounds = array<i64: 1, 128, 128>}, {pipeline_mode = #tpu.pipeline_mode<synchronous>, transform_indices = @transform_1, window_bounds = array<i64: 1, 128>}, {pipeline_mode = #tpu.pipeline_mode<synchronous>, transform_indices = @transform_2, window_bounds = array<i64: 1, 128>}, {transform_indices = @transform_3, window_bounds = array<i64: 1, 128, 128>}]} {
    %c0 = arith.constant 0 : index
    %c0_0 = arith.constant 0 : index
    %c0_1 = arith.constant 0 : index
    %0 = vector.load %arg2[%c0, %c0_0, %c0_1] : memref<1x128x128xf32, #tpu.memory_space<vmem>>, vector<1x128x128xf32>
    %c0_2 = arith.constant 0 : index
    %c0_3 = arith.constant 0 : index
    %1 = vector.load %arg3[%c0_2, %c0_3] : memref<1x128xf32, #tpu.memory_space<vmem>>, vector<1x128xf32>
    %2 = vector.shape_cast %1 : vector<1x128xf32> to vector<1x1x128xf32>
    %3 = vector.broadcast %2 : vector<1x1x128xf32> to vector<1x128x128xf32>
    %4 = arith.mulf %0, %3 : vector<1x128x128xf32>
    %c0_4 = arith.constant 0 : index
    %c0_5 = arith.constant 0 : index
    %5 = vector.load %arg4[%c0_4, %c0_5] : memref<1x128xf32, #tpu.memory_space<vmem>>, vector<1x128xf32>
    %6 = vector.shape_cast %5 : vector<1x128xf32> to vector<1x1x128xf32>
    %7 = vector.broadcast %6 : vector<1x1x128xf32> to vector<1x128x128xf32>
    %8 = arith.addf %4, %7 : vector<1x128x128xf32>
    %cst = arith.constant 0.000000e+00 : f32
    %9 = vector.broadcast %cst : f32 to vector<1x128x128xf32>
    %10 = arith.maximumf %8, %9 : vector<1x128x128xf32>
    %c0_6 = arith.constant 0 : index
    %c0_7 = arith.constant 0 : index
    %c0_8 = arith.constant 0 : index
    %11 = vector.load %arg5[%c0_6, %c0_7, %c0_8] : memref<1x128x128xf32, #tpu.memory_space<vmem>>, vector<1x128x128xf32>
    tpu.vector_store %arg5[%c0_6, %c0_7, %c0_8], %10 {strides = array<i32>} : memref<1x128x128xf32, #tpu.memory_space<vmem>>, vector<1x128x128xf32>,
    return
  }
  func.func @transform_0(%arg0: i32, %arg1: i32) -> (i32, i32, i32) {
    %c0_i32 = arith.constant 0 : i32
    %c0_i32_0 = arith.constant 0 : i32
    return %arg0, %arg1, %c0_i32 : i32, i32, i32
  }
  func.func @transform_1(%arg0: i32, %arg1: i32) -> (i32, i32) {
    %c0_i32 = arith.constant 0 : i32
    %c0_i32_0 = arith.constant 0 : i32
    %c0_i32_1 = arith.constant 0 : i32
    return %c0_i32, %c0_i32_0 : i32, i32
  }
  func.func @transform_2(%arg0: i32, %arg1: i32) -> (i32, i32) {
    %c0_i32 = arith.constant 0 : i32
    %c0_i32_0 = arith.constant 0 : i32
    %c0_i32_1 = arith.constant 0 : i32
    return %c0_i32, %c0_i32_0 : i32, i32
  }
  func.func @transform_3(%arg0: i32, %arg1: i32) -> (i32, i32, i32) {
    %c0_i32 = arith.constant 0 : i32
    %c0_i32_0 = arith.constant 0 : i32
    return %arg0, %arg1, %c0_i32 : i32, i32, i32
  }
}

module attributes {stable_mosaic.version = 11 : i64} {
  func.func @_gconv_stats_kernel(%arg0: i32, %arg1: i32, %arg2: memref<1x512x128xbf16, #tpu.memory_space<vmem>>, %arg3: memref<1x128x128xbf16, #tpu.memory_space<vmem>>, %arg4: memref<1x512x128xf32, #tpu.memory_space<vmem>>, %arg5: memref<1x128xf32, #tpu.memory_space<vmem>>, %arg6: memref<1x128xf32, #tpu.memory_space<vmem>>) attributes {dimension_semantics = [#tpu.dimension_semantics<arbitrary>, #tpu.dimension_semantics<arbitrary>], iteration_bounds = array<i64: 4, 1>, scalar_prefetch = 0 : i64, scratch_operands = 0 : i64, tpu.core_type = #tpu.core_type<tc>, window_params = [{transform_indices = @transform_0, window_bounds = array<i64: 1, 512, 128>}, {transform_indices = @transform_1, window_bounds = array<i64: 1, 128, 128>}, {transform_indices = @transform_2, window_bounds = array<i64: 1, 512, 128>}, {pipeline_mode = #tpu.pipeline_mode<synchronous>, transform_indices = @transform_3, window_bounds = array<i64: 1, 128>}, {pipeline_mode = #tpu.pipeline_mode<synchronous>, transform_indices = @transform_4, window_bounds = array<i64: 1, 128>}]} {
    %c0_i32 = arith.constant 0 : i32
    %0 = arith.cmpi eq, %arg0, %c0_i32 : i32
    %c0_i32_0 = arith.constant 0 : i32
    %1 = arith.cmpi eq, %arg1, %c0_i32_0 : i32
    %2 = arith.andi %0, %1 : i1
    %3 = arith.extui %2 : i1 to i32
    %c0_i32_1 = arith.constant 0 : i32
    %4 = arith.cmpi ne, %3, %c0_i32_1 : i32
    scf.if %4 {
      %cst_20 = arith.constant 0.000000e+00 : f32
      %24 = vector.broadcast %cst_20 : f32 to vector<1x128xf32>
      %c0_21 = arith.constant 0 : index
      %c0_22 = arith.constant 0 : index
      %25 = vector.load %arg5[%c0_21, %c0_22] : memref<1x128xf32, #tpu.memory_space<vmem>>, vector<1x128xf32>
      tpu.vector_store %arg5[%c0_21, %c0_22], %24 {strides = array<i32>} : memref<1x128xf32, #tpu.memory_space<vmem>>, vector<1x128xf32>,
      %cst_23 = arith.constant 0.000000e+00 : f32
      %26 = vector.broadcast %cst_23 : f32 to vector<1x128xf32>
      %c0_24 = arith.constant 0 : index
      %c0_25 = arith.constant 0 : index
      %27 = vector.load %arg6[%c0_24, %c0_25] : memref<1x128xf32, #tpu.memory_space<vmem>>, vector<1x128xf32>
      tpu.vector_store %arg6[%c0_24, %c0_25], %26 {strides = array<i32>} : memref<1x128xf32, #tpu.memory_space<vmem>>, vector<1x128xf32>,
    } else {
    }
    %c0 = arith.constant 0 : index
    %c0_2 = arith.constant 0 : index
    %c0_3 = arith.constant 0 : index
    %5 = vector.load %arg2[%c0, %c0_2, %c0_3] : memref<1x512x128xbf16, #tpu.memory_space<vmem>>, vector<1x512x128xbf16>
    %6 = vector.shape_cast %5 : vector<1x512x128xbf16> to vector<512x128xbf16>
    %c0_4 = arith.constant 0 : index
    %c0_5 = arith.constant 0 : index
    %c0_6 = arith.constant 0 : index
    %7 = vector.load %arg3[%c0_4, %c0_5, %c0_6] : memref<1x128x128xbf16, #tpu.memory_space<vmem>>, vector<1x128x128xbf16>
    %8 = vector.shape_cast %7 : vector<1x128x128xbf16> to vector<128x128xbf16>
    %cst = arith.constant dense<0.000000e+00> : vector<512x128xf32>
    %9 = tpu.matmul %6, %8, %cst {dimension_numbers = #tpu.dot_dimension_numbers<[1], [0], [0], [1], [0, 0, 1, 1], [], []>} : vector<512x128xbf16>, vector<128x128xbf16>, vector<512x128xf32> -> vector<512x128xf32>
    %c0_7 = arith.constant 0 : index
    %c0_8 = arith.constant 0 : index
    %c0_9 = arith.constant 0 : index
    %10 = vector.load %arg4[%c0_7, %c0_8, %c0_9] : memref<1x512x128xf32, #tpu.memory_space<vmem>>, vector<1x512x128xf32>
    %11 = vector.shape_cast %10 : vector<1x512x128xf32> to vector<512x128xf32>
    %12 = vector.shape_cast %9 : vector<512x128xf32> to vector<1x512x128xf32>
    tpu.vector_store %arg4[%c0_7, %c0_8, %c0_9], %12 {strides = array<i32>} : memref<1x512x128xf32, #tpu.memory_space<vmem>>, vector<1x512x128xf32>,
    %c0_10 = arith.constant 0 : index
    %c0_11 = arith.constant 0 : index
    %13 = vector.load %arg5[%c0_10, %c0_11] : memref<1x128xf32, #tpu.memory_space<vmem>>, vector<1x128xf32>
    %cst_12 = arith.constant dense<0.000000e+00> : vector<128xf32>
    %14 = vector.multi_reduction <add>, %9, %cst_12 [0] : vector<512x128xf32> to vector<128xf32>
    %15 = vector.shape_cast %14 : vector<128xf32> to vector<1x128xf32>
    %16 = arith.addf %13, %15 : vector<1x128xf32>
    %c0_13 = arith.constant 0 : index
    %c0_14 = arith.constant 0 : index
    %17 = vector.load %arg5[%c0_13, %c0_14] : memref<1x128xf32, #tpu.memory_space<vmem>>, vector<1x128xf32>
    tpu.vector_store %arg5[%c0_13, %c0_14], %16 {strides = array<i32>} : memref<1x128xf32, #tpu.memory_space<vmem>>, vector<1x128xf32>,
    %c0_15 = arith.constant 0 : index
    %c0_16 = arith.constant 0 : index
    %18 = vector.load %arg6[%c0_15, %c0_16] : memref<1x128xf32, #tpu.memory_space<vmem>>, vector<1x128xf32>
    %19 = arith.mulf %9, %9 : vector<512x128xf32>
    %cst_17 = arith.constant dense<0.000000e+00> : vector<128xf32>
    %20 = vector.multi_reduction <add>, %19, %cst_17 [0] : vector<512x128xf32> to vector<128xf32>
    %21 = vector.shape_cast %20 : vector<128xf32> to vector<1x128xf32>
    %22 = arith.addf %18, %21 : vector<1x128xf32>
    %c0_18 = arith.constant 0 : index
    %c0_19 = arith.constant 0 : index
    %23 = vector.load %arg6[%c0_18, %c0_19] : memref<1x128xf32, #tpu.memory_space<vmem>>, vector<1x128xf32>
    tpu.vector_store %arg6[%c0_18, %c0_19], %22 {strides = array<i32>} : memref<1x128xf32, #tpu.memory_space<vmem>>, vector<1x128xf32>,
    return
  }
  func.func @transform_0(%arg0: i32, %arg1: i32) -> (i32, i32, i32) {
    %c0_i32 = arith.constant 0 : i32
    %c0_i32_0 = arith.constant 0 : i32
    return %arg0, %arg1, %c0_i32 : i32, i32, i32
  }
  func.func @transform_1(%arg0: i32, %arg1: i32) -> (i32, i32, i32) {
    %c0_i32 = arith.constant 0 : i32
    %c0_i32_0 = arith.constant 0 : i32
    %c0_i32_1 = arith.constant 0 : i32
    return %arg0, %c0_i32, %c0_i32_0 : i32, i32, i32
  }
  func.func @transform_2(%arg0: i32, %arg1: i32) -> (i32, i32, i32) {
    %c0_i32 = arith.constant 0 : i32
    %c0_i32_0 = arith.constant 0 : i32
    return %arg0, %arg1, %c0_i32 : i32, i32, i32
  }
  func.func @transform_3(%arg0: i32, %arg1: i32) -> (i32, i32) {
    %c0_i32 = arith.constant 0 : i32
    %c0_i32_0 = arith.constant 0 : i32
    %c0_i32_1 = arith.constant 0 : i32
    return %c0_i32, %c0_i32_0 : i32, i32
  }
  func.func @transform_4(%arg0: i32, %arg1: i32) -> (i32, i32) {
    %c0_i32 = arith.constant 0 : i32
    %c0_i32_0 = arith.constant 0 : i32
    %c0_i32_1 = arith.constant 0 : i32
    return %c0_i32, %c0_i32_0 : i32, i32
  }
}

module attributes {stable_mosaic.version = 11 : i64} {
  func.func @_bn_relu_kernel(%arg0: i32, %arg1: i32, %arg2: memref<1x512x128xf32, #tpu.memory_space<vmem>>, %arg3: memref<1x128xf32, #tpu.memory_space<vmem>>, %arg4: memref<1x128xf32, #tpu.memory_space<vmem>>, %arg5: memref<1x512x128xf32, #tpu.memory_space<vmem>>) attributes {dimension_semantics = [#tpu.dimension_semantics<parallel>, #tpu.dimension_semantics<parallel>], iteration_bounds = array<i64: 4, 1>, scalar_prefetch = 0 : i64, scratch_operands = 0 : i64, tpu.core_type = #tpu.core_type<tc>, window_params = [{transform_indices = @transform_0, window_bounds = array<i64: 1, 512, 128>}, {pipeline_mode = #tpu.pipeline_mode<synchronous>, transform_indices = @transform_1, window_bounds = array<i64: 1, 128>}, {pipeline_mode = #tpu.pipeline_mode<synchronous>, transform_indices = @transform_2, window_bounds = array<i64: 1, 128>}, {transform_indices = @transform_3, window_bounds = array<i64: 1, 512, 128>}]} {
    %c0 = arith.constant 0 : index
    %c0_0 = arith.constant 0 : index
    %c0_1 = arith.constant 0 : index
    %0 = vector.load %arg2[%c0, %c0_0, %c0_1] : memref<1x512x128xf32, #tpu.memory_space<vmem>>, vector<1x512x128xf32>
    %c0_2 = arith.constant 0 : index
    %c0_3 = arith.constant 0 : index
    %1 = vector.load %arg3[%c0_2, %c0_3] : memref<1x128xf32, #tpu.memory_space<vmem>>, vector<1x128xf32>
    %2 = vector.shape_cast %1 : vector<1x128xf32> to vector<1x1x128xf32>
    %3 = vector.broadcast %2 : vector<1x1x128xf32> to vector<1x512x128xf32>
    %4 = arith.mulf %0, %3 : vector<1x512x128xf32>
    %c0_4 = arith.constant 0 : index
    %c0_5 = arith.constant 0 : index
    %5 = vector.load %arg4[%c0_4, %c0_5] : memref<1x128xf32, #tpu.memory_space<vmem>>, vector<1x128xf32>
    %6 = vector.shape_cast %5 : vector<1x128xf32> to vector<1x1x128xf32>
    %7 = vector.broadcast %6 : vector<1x1x128xf32> to vector<1x512x128xf32>
    %8 = arith.addf %4, %7 : vector<1x512x128xf32>
    %cst = arith.constant 0.000000e+00 : f32
    %9 = vector.broadcast %cst : f32 to vector<1x512x128xf32>
    %10 = arith.maximumf %8, %9 : vector<1x512x128xf32>
    %c0_6 = arith.constant 0 : index
    %c0_7 = arith.constant 0 : index
    %c0_8 = arith.constant 0 : index
    %11 = vector.load %arg5[%c0_6, %c0_7, %c0_8] : memref<1x512x128xf32, #tpu.memory_space<vmem>>, vector<1x512x128xf32>
    tpu.vector_store %arg5[%c0_6, %c0_7, %c0_8], %10 {strides = array<i32>} : memref<1x512x128xf32, #tpu.memory_space<vmem>>, vector<1x512x128xf32>,
    return
  }
  func.func @transform_0(%arg0: i32, %arg1: i32) -> (i32, i32, i32) {
    %c0_i32 = arith.constant 0 : i32
    %c0_i32_0 = arith.constant 0 : i32
    return %arg0, %arg1, %c0_i32 : i32, i32, i32
  }
  func.func @transform_1(%arg0: i32, %arg1: i32) -> (i32, i32) {
    %c0_i32 = arith.constant 0 : i32
    %c0_i32_0 = arith.constant 0 : i32
    %c0_i32_1 = arith.constant 0 : i32
    return %c0_i32, %c0_i32_0 : i32, i32
  }
  func.func @transform_2(%arg0: i32, %arg1: i32) -> (i32, i32) {
    %c0_i32 = arith.constant 0 : i32
    %c0_i32_0 = arith.constant 0 : i32
    %c0_i32_1 = arith.constant 0 : i32
    return %c0_i32, %c0_i32_0 : i32, i32
  }
  func.func @transform_3(%arg0: i32, %arg1: i32) -> (i32, i32, i32) {
    %c0_i32 = arith.constant 0 : i32
    %c0_i32_0 = arith.constant 0 : i32
    return %arg0, %arg1, %c0_i32 : i32, i32, i32
  }
}

module attributes {stable_mosaic.version = 11 : i64} {
  func.func @_gconv_tanh_kernel(%arg0: i32, %arg1: i32, %arg2: memref<1x512x128xbf16, #tpu.memory_space<vmem>>, %arg3: memref<1x128x128xbf16, #tpu.memory_space<vmem>>, %arg4: memref<1x512x128xf32, #tpu.memory_space<vmem>>) attributes {dimension_semantics = [#tpu.dimension_semantics<parallel>, #tpu.dimension_semantics<parallel>], iteration_bounds = array<i64: 4, 4>, scalar_prefetch = 0 : i64, scratch_operands = 0 : i64, tpu.core_type = #tpu.core_type<tc>, window_params = [{transform_indices = @transform_0, window_bounds = array<i64: 1, 512, 128>}, {transform_indices = @transform_1, window_bounds = array<i64: 1, 128, 128>}, {transform_indices = @transform_2, window_bounds = array<i64: 1, 512, 128>}]} {
    %c0 = arith.constant 0 : index
    %c0_0 = arith.constant 0 : index
    %c0_1 = arith.constant 0 : index
    %0 = vector.load %arg2[%c0, %c0_0, %c0_1] : memref<1x512x128xbf16, #tpu.memory_space<vmem>>, vector<1x512x128xbf16>
    %1 = vector.shape_cast %0 : vector<1x512x128xbf16> to vector<512x128xbf16>
    %c0_2 = arith.constant 0 : index
    %c0_3 = arith.constant 0 : index
    %c0_4 = arith.constant 0 : index
    %2 = vector.load %arg3[%c0_2, %c0_3, %c0_4] : memref<1x128x128xbf16, #tpu.memory_space<vmem>>, vector<1x128x128xbf16>
    %3 = vector.shape_cast %2 : vector<1x128x128xbf16> to vector<128x128xbf16>
    %cst = arith.constant dense<0.000000e+00> : vector<512x128xf32>
    %4 = tpu.matmul %1, %3, %cst {dimension_numbers = #tpu.dot_dimension_numbers<[1], [0], [0], [1], [0, 0, 1, 1], [], []>} : vector<512x128xbf16>, vector<128x128xbf16>, vector<512x128xf32> -> vector<512x128xf32>
    %5 = math.tanh %4 : vector<512x128xf32>
    %c0_5 = arith.constant 0 : index
    %c0_6 = arith.constant 0 : index
    %c0_7 = arith.constant 0 : index
    %6 = vector.load %arg4[%c0_5, %c0_6, %c0_7] : memref<1x512x128xf32, #tpu.memory_space<vmem>>, vector<1x512x128xf32>
    %7 = vector.shape_cast %6 : vector<1x512x128xf32> to vector<512x128xf32>
    %8 = vector.shape_cast %5 : vector<512x128xf32> to vector<1x512x128xf32>
    tpu.vector_store %arg4[%c0_5, %c0_6, %c0_7], %8 {strides = array<i32>} : memref<1x512x128xf32, #tpu.memory_space<vmem>>, vector<1x512x128xf32>,
    return
  }
  func.func @transform_0(%arg0: i32, %arg1: i32) -> (i32, i32, i32) {
    %c0_i32 = arith.constant 0 : i32
    %c0_i32_0 = arith.constant 0 : i32
    return %arg0, %arg1, %c0_i32 : i32, i32, i32
  }
  func.func @transform_1(%arg0: i32, %arg1: i32) -> (i32, i32, i32) {
    %c0_i32 = arith.constant 0 : i32
    %c0_i32_0 = arith.constant 0 : i32
    %c0_i32_1 = arith.constant 0 : i32
    return %arg0, %c0_i32, %c0_i32_0 : i32, i32, i32
  }
  func.func @transform_2(%arg0: i32, %arg1: i32) -> (i32, i32, i32) {
    %c0_i32 = arith.constant 0 : i32
    %c0_i32_0 = arith.constant 0 : i32
    return %arg0, %arg1, %c0_i32 : i32, i32, i32
  }
}

</mosaic_0001>

<bundles_post_ra>
// kernel: generator_forward.10
= control target key start
LH: loop header
LB: loop body
LE: loop exit
PB: predicated region body
PF: predicated region fallthrough
CT: control target
= control target key end

     0   :  { %s98_s0 = inlined_call_operand.vmem [shape: f32[1,32,128], index: 0, kind: input, shape index: {}]   ;;  %s99_s1 = inlined_call_operand.vmem [shape: f32[1,128], index: 1, kind: input, shape index: {}]   ;;  %s100_s2 = inlined_call_operand.vmem [shape: f32[1,128], index: 2, kind: input, shape index: {}]   ;;  %s101_s3 = inlined_call_operand.vmem [shape: f32[1,32,128], index: 3, kind: output, shape index: {}]  }
   0x1   :  { %v14_v0 = vld [vmem:[%s98_s0] sm:$0xff]  ;;  %v15_v3 = vld [vmem:[%s98_s0 + $0x8] sm:$0xff]  ;;  %v16_v6 = vld [vmem:[%s98_s0 + $0x10] sm:$0xff] }
   0x2   :  { %v46_v1 = vld [vmem:[%s99_s1] ss:$0 sm:$0xff]  ;;  %v17_v7 = vld [vmem:[%s98_s0 + $0x18] sm:$0xff] }
   0x3   :  { %v47_v2 = vld [vmem:[%s100_s2] ss:$0 sm:$0xff]  ;;  %v22_v4 = vmul.f32 %v46_v1, %v14_v0  ;;  %v23_v5 = vmul.f32 %v46_v1, %v15_v3  ;;  %v24_v8 = vmul.f32 %v46_v1, %v16_v6  ;;  %v25_v9 = vmul.f32 %v46_v1, %v17_v7 }
   0x5   :  { %v30_v10 = vadd.f32 %v47_v2, %v22_v4  ;;  %v31_v11 = vadd.f32 %v47_v2, %v23_v5  ;;  %v32_v12 = vadd.f32 %v47_v2, %v24_v8  ;;  %v33_v13 = vadd.f32 %v47_v2, %v25_v9 }
   0x7   :  { %v34_v14 = vmax.f32 %v30_v10, 0.0  ;;  %v35_v15 = vmax.f32 %v31_v11, 0.0  ;;  %v36_v16 = vmax.f32 %v32_v12, 0.0  ;;  %v37_v17 = vmax.f32 %v33_v13, 0.0 }
   0x9   :  { %38 = vst [vmem:[%s101_s3] sm:$0xff] %v34_v14 }
   0xa   :  { %39 = vst [vmem:[%s101_s3 + $0x8] sm:$0xff] %v35_v15 }
   0xb   :  { %40 = vst [vmem:[%s101_s3 + $0x10] sm:$0xff] %v36_v16 }
   0xc   :  { %41 = vst [vmem:[%s101_s3 + $0x18] sm:$0xff] %v37_v17 }

// kernel: generator_forward.9
= control target key start
LH: loop header
LB: loop body
LE: loop exit
PB: predicated region body
PF: predicated region fallthrough
CT: control target
= control target key end

     0   :  { %v224_v10 = vmov 0.0   ;;  %s310_s1 = inlined_call_operand.vmem [shape: bf16[1,128,128], index: 1, kind: input, shape index: {}]   ;;  %s311_s0 = inlined_call_operand.vmem [shape: bf16[1,32,128], index: 0, kind: input, shape index: {}]   ;;  %s312_s3 = inlined_call_operand.vmem [shape: f32[1,128], index: 3, kind: output, shape index: {1}]   ;;  %s313_s4 = inlined_call_operand.vmem [shape: f32[1,128], index: 4, kind: output, shape index: {2}]   ;;  %s314_s2 = inlined_call_operand.vmem [shape: f32[1,32,128], index: 2, kind: output, shape index: {0}]  }
   0x1   :  { %v214_v0 = vld [vmem:[%s310_s1 + $0x38] sm:$0xff]  ;;  %v213_v1 = vld [vmem:[%s310_s1 + $0x30] sm:$0xff]  ;;  %v212_v2 = vld [vmem:[%s310_s1 + $0x28] sm:$0xff]  ;;  %20 = vst [vmem:[%s312_s3] sm:$0x1] %v224_v10 }
   0x2   :  { %102 = vmatpush.bf16.msra.mxu0 %v214_v0  ;;  %215 = vmatpush.bf16.msra.mxu1 %v214_v0  ;;  %v211_v3 = vld [vmem:[%s310_s1 + $0x20] sm:$0xff]  ;;  %v210_v4 = vld [vmem:[%s310_s1 + $0x18] sm:$0xff]  ;;  %v209_v5 = vld [vmem:[%s310_s1 + $0x10] sm:$0xff]  ;;  %21 = vst [vmem:[%s313_s4] sm:$0x1] %v224_v10 }
   0x3   :  { %v208_v6 = vld [vmem:[%s310_s1 + $0x8] sm:$0xff]  ;;  %v207_v7 = vld [vmem:[%s310_s1] sm:$0xff] }
   0x4   :  { %v205_v8 = vld [vmem:[%s311_s0] sm:$0xff]  ;;  %v206_v9 = vld [vmem:[%s311_s0 + $0x8] sm:$0xff] }
   0x6   :  { %103 = vmatpush.bf16.msra.mxu0 %v213_v1  ;;  %216 = vmatpush.bf16.msra.mxu1 %v213_v1 }
   0x8   :  { %v125_v34 = vld [vmem:[%s312_s3] sm:$0x1] }
   0x9   :  { %v137_v37 = vld [vmem:[%s313_s4] sm:$0x1] }
   0xa   :  { %104 = vmatpush.bf16.msra.mxu0 %v212_v2  ;;  %217 = vmatpush.bf16.msra.mxu1 %v212_v2 }
   0xe   :  { %105 = vmatpush.bf16.msra.mxu0 %v211_v3  ;;  %218 = vmatpush.bf16.msra.mxu1 %v211_v3 }
  0x12   :  { %106 = vmatpush.bf16.msra.mxu0 %v210_v4  ;;  %219 = vmatpush.bf16.msra.mxu1 %v210_v4 }
  0x16   :  { %107 = vmatpush.bf16.msra.mxu0 %v209_v5  ;;  %220 = vmatpush.bf16.msra.mxu1 %v209_v5 }
  0x1a   :  { %108 = vmatpush.bf16.msra.mxu0 %v208_v6  ;;  %221 = vmatpush.bf16.msra.mxu1 %v208_v6 }
  0x1e   :  { %109 = vmatpush.bf16.msra.mxu0 %v207_v7  ;;  %222 = vmatpush.bf16.msra.mxu1 %v207_v7 }
  0x21   :  { %110 = vmatmul.bf16.vlgmr.msra.gmra.mxu0 %v205_v8  ;;  %115 = vmatmul.bf16.vlgmr.msra.gmra.mxu1 %v206_v9 }
  0x9e   :  { %v111_v11 = vpop.f32.mrf.mxu0  ;;  %v116_v12 = vpop.f32.mrf.mxu1 }
  0x9f   :  { %121 = vst [vmem:[%s314_s2] sm:$0xff] %v111_v11  ;;  %v138_v15 = vmul.f32 %v111_v11, %v111_v11  ;;  %v140_v18 = vmul.f32 %v116_v12, %v116_v12 }
  0xa0   :  { %123 = vst [vmem:[%s314_s2 + $0x10] sm:$0xff] %v116_v12 }
  0xa6   :  { %v113_v13 = vpop.f32.mrf.mxu0  ;;  %v118_v14 = vpop.f32.mrf.mxu1 }
  0xa7   :  { %122 = vst [vmem:[%s314_s2 + $0x8] sm:$0xff] %v113_v13  ;;  %v126_v16 = vadd.f32 %v113_v13, %v111_v11  ;;  %v139_v17 = vmul.f32 %v113_v13, %v113_v13  ;;  %v141_v22 = vmul.f32 %v118_v14, %v118_v14 }
  0xa8   :  { %124 = vst [vmem:[%s314_s2 + $0x18] sm:$0xff] %v118_v14 }
  0xa9   :  { %v142_v19 = vadd.f32 %v139_v17, %v138_v15  ;;  %v127_v20 = vadd.f32 %v126_v16, %v116_v12 }
  0xab   :  { %v128_v21 = vadd.f32 %v127_v20, %v118_v14  ;;  %v143_v23 = vadd.f32 %v142_v19, %v140_v18 }
  0xad   :  { %v129_v24 = vrot.slane %v128_v21, 4  ;;  %v144_v25 = vadd.f32 %v143_v23, %v141_v22 }
  0xaf   :  { %v130_v26 = vadd.f32 %v129_v24, %v128_v21  ;;  %v145_v27 = vrot.slane %v144_v25, 4 }
  0xb1   :  { %v131_v28 = vrot.slane %v130_v26, 2  ;;  %v146_v29 = vadd.f32 %v145_v27, %v144_v25 }
  0xb3   :  { %v132_v30 = vadd.f32 %v131_v28, %v130_v26  ;;  %v147_v31 = vrot.slane %v146_v29, 2 }
  0xb5   :  { %v133_v32 = vrot.slane %v132_v30, 1  ;;  %v148_v33 = vadd.f32 %v147_v31, %v146_v29 }
  0xb7   :  { %v134_v35 = vadd.f32 %v133_v32, %v132_v30  ;;  %v149_v36 = vrot.slane %v148_v33, 1 }
  0xb9   :  { %v135_v38 = vadd.f32 %v134_v35, %v125_v34  ;;  %v150_v39 = vadd.f32 %v149_v36, %v148_v33 }
  0xbb   :  { %136 = vst [vmem:[%s312_s3] sm:$0x1] %v135_v38  ;;  %v151_v40 = vadd.f32 %v150_v39, %v137_v37 }
  0xbd   :  { %152 = vst [vmem:[%s313_s4] sm:$0x1] %v151_v40 }

// kernel: generator_forward.12
= control target key start
LH: loop header
LB: loop body
LE: loop exit
PB: predicated region body
PF: predicated region fallthrough
CT: control target
= control target key end

     0   :  { %s408_s12 = smov 0   ;;  %s410_s13 = smov 0   ;;  %s447_s0 = inlined_call_operand.vmem [shape: f32[4,32,128], index: 0, kind: input, shape index: {}]   ;;  %s448_s1 = inlined_call_operand.vmem [shape: f32[1,128], index: 1, kind: input, shape index: {}]   ;;  %s449_s2 = inlined_call_operand.vmem [shape: f32[1,128], index: 2, kind: input, shape index: {}]   ;;  %s450_s3 = inlined_call_operand.vmem [shape: f32[4,32,128], index: 3, kind: output, shape index: {}]  }
   0x1   :  { %s412_s14 = smov 0  }
   0x2 LB: > { %s25_s15 = sadd.s32 1, %s382_s13  ;;  %p329_p0 = scmp.ge.s32.totalorder %s386_s14, 1  ;;  %s386_s14 = sphi %s412_s14, %s13_s14   ;;  %s382_s13 = sphi %s410_s13, %s452_s13   ;;  %s378_s12 = sphi %s408_s12, %s451_s12  }
   0x3   : > { %p27_p1 = scmp.ge.s32.totalorder %s25_s15, 4  ;;  %p158_p2 = scmp.lt.s32.totalorder %s386_s14, 5 }
   0x5   : > { %s454_s15 = smov (%p27_p1, %s25_s15), 0  ;;  %p159_p3 = pnand %p329_p0, %p158_p2 }
   0x6   : > { %p191_p4 = scmp.lt.s32.totalorder (!%p159_p3), %s378_s12, 3 }
   0x7   : > { %162 = sbr.rel (%p159_p3) target bundleno = 26 (0x1a), region = 32 }
   0xc   : > { %s456_s12 = smov (!%p191_p4, %s378_s12), 3  ;;  %v362_v0 = vld [vmem:[%s448_s1] ss:$0 sm:$0xff] }
   0xd   : > { %s336_s18 = sshll.u32 %s456_s12, 5  ;;  %v363_v1 = vld [vmem:[%s449_s2] ss:$0 sm:$0xff] }
   0xe   : > { %s198_s21 = scalar_lea.vmem %s447_s0, %s336_s18  ;;  %s208_s26 = scalar_lea.vmem %s450_s3, %s336_s18 }
   0xf   : > { %v210_v2 = vld [vmem:[%s198_s21] sm:$0xff]  ;;  %v211_v3 = vld [vmem:[%s198_s21 + $0x8] sm:$0xff]  ;;  %v212_v4 = vld [vmem:[%s198_s21 + $0x10] sm:$0xff] }
  0x10   : > { %v218_v5 = vmul.f32 %v362_v0, %v210_v2  ;;  %v219_v6 = vmul.f32 %v362_v0, %v211_v3  ;;  %v220_v7 = vmul.f32 %v362_v0, %v212_v4  ;;  %v213_v8 = vld [vmem:[%s198_s21 + $0x18] sm:$0xff] }
  0x11   : > { %v221_v9 = vmul.f32 %v362_v0, %v213_v8 }
  0x12   : > { %v226_v10 = vadd.f32 %v363_v1, %v218_v5  ;;  %v227_v11 = vadd.f32 %v363_v1, %v219_v6  ;;  %v228_v12 = vadd.f32 %v363_v1, %v220_v7 }
  0x13   : > { %v229_v13 = vadd.f32 %v363_v1, %v221_v9 }
  0x14   : > { %v230_v14 = vmax.f32 %v226_v10, 0.0  ;;  %v231_v15 = vmax.f32 %v227_v11, 0.0  ;;  %v232_v16 = vmax.f32 %v228_v12, 0.0 }
  0x15   : > { %v233_v17 = vmax.f32 %v229_v13, 0.0 }
  0x16   : > { %234 = vst [vmem:[%s208_s26] sm:$0xff] %v230_v14 }
  0x17   : > { %235 = vst [vmem:[%s208_s26 + $0x8] sm:$0xff] %v231_v15 }
  0x18   : > { %236 = vst [vmem:[%s208_s26 + $0x10] sm:$0xff] %v232_v16 }
  0x19   : > { %237 = vst [vmem:[%s208_s26 + $0x18] sm:$0xff] %v233_v17 }
  0x1a PF: > { %s13_s14 = sadd.s32 1, %s386_s14   ;;  %s451_s12 = smov %s382_s13 }
  0x1b   : > { %p10_p5 = scmp.ge.s32.totalorder %s13_s14, 6   ;;  %s452_s13 = smov %s454_s15 }
  0x1d   :  { %12 = sbr.rel (!%p10_p5) target bundleno = 2 (0x2), region = 62 }

// kernel: generator_forward.11
= control target key start
LH: loop header
LB: loop body
LE: loop exit
PB: predicated region body
PF: predicated region fallthrough
CT: control target
= control target key end

     0   :  { %s808_s15 = smov 0   ;;  %s810_s16 = smov 0   ;;  %s896_s0 = inlined_call_operand.vmem [shape: bf16[4,32,256], index: 0, kind: input, shape index: {}]   ;;  %s897_s1 = inlined_call_operand.vmem [shape: bf16[4,256,128], index: 1, kind: input, shape index: {}]   ;;  %s898_s2 = inlined_call_operand.vmem [shape: f32[4,32,128], index: 2, kind: output, shape index: {0}]   ;;  %s899_s3 = inlined_call_operand.vmem [shape: f32[1,128], index: 3, kind: output, shape index: {1}]   ;;  %s900_s4 = inlined_call_operand.vmem [shape: f32[1,128], index: 4, kind: output, shape index: {2}]  }
   0x1   :  { %s812_s17 = smov 0  }
   0x2 LB: > { %s27_s18 = sadd.s32 1, %s776_s16  ;;  %p603_p0 = scmp.ge.s32.totalorder %s780_s17, 1  ;;  %s780_s17 = sphi %s812_s17, %s15_s17   ;;  %s776_s16 = sphi %s810_s16, %s902_s16   ;;  %s772_s15 = sphi %s808_s15, %s901_s15  }
   0x3   : > { %p29_p1 = scmp.ge.s32.totalorder %s27_s18, 4  ;;  %p189_p2 = scmp.lt.s32.totalorder %s780_s17, 5 }
   0x5   : > { %s904_s18 = smov (%p29_p1, %s27_s18), 0  ;;  %p190_p3 = pnand %p603_p0, %p189_p2 }
   0x6   : > { %p230_p4 = scmp.lt.s32.totalorder (!%p190_p3), %s772_s15, 3  ;;  %p255_p5 = scmp.eq.s32.totalorder (!%p190_p3), %s772_s15, 0 }
   0x7   : > { %193 = sbr.rel (%p190_p3) target bundleno = 211 (0xd3), region = 28 }
   0xc   : > { %s906_s15 = smov (!%p230_p4, %s772_s15), 3  ;;  %260 = sbr.rel (!%p255_p5) target bundleno = 17 (0x11), region = 32  ;;  %v782_v0 = vmov (%p255_p5), 0.0  }
   0xd   : > { %s693_s19 = sshll.u32 %s906_s15, 5  ;;  %s694_s20 = sshll.u32 %s906_s15, 7  ;;  %261 = vst [vmem:[%s899_s3] sm:$0x1] (%p255_p5), %v782_v0 }
   0xe   : > { %s829_s23 = scalar_lea.vmem %s896_s0, %s693_s19  ;;  %s834_s26 = scalar_lea.vmem %s897_s1, %s694_s20  ;;  %262 = vst [vmem:[%s900_s4] sm:$0x1] (%p255_p5), %v782_v0 }
   0xf   : > { %s839_s29 = scalar_lea.vmem %s898_s2, %s693_s19 }
  0x11 PF: > { %v708_v1 = vld [vmem:[%s834_s26 + $0x38] sm:$0xff]  ;;  %v707_v3 = vld [vmem:[%s834_s26 + $0x30] sm:$0xff]  ;;  %v706_v5 = vld [vmem:[%s834_s26 + $0x28] sm:$0xff] }
  0x12   : > { %v716_v2 = vld [vmem:[%s834_s26 + $0x78] sm:$0xff]  ;;  %415 = vmatpush.bf16.msra.mxu0 %v708_v1  ;;  %717 = vmatpush.bf16.msra.mxu2 %v708_v1  ;;  %v715_v4 = vld [vmem:[%s834_s26 + $0x70] sm:$0xff]  ;;  %v714_v6 = vld [vmem:[%s834_s26 + $0x68] sm:$0xff] }
  0x13   : > { %434 = vmatpush.bf16.msra.mxu1 %v716_v2  ;;  %725 = vmatpush.bf16.msra.mxu3 %v716_v2  ;;  %v705_v7 = vld [vmem:[%s834_s26 + $0x20] sm:$0xff]  ;;  %v704_v9 = vld [vmem:[%s834_s26 + $0x18] sm:$0xff]  ;;  %v703_v11 = vld [vmem:[%s834_s26 + $0x10] sm:$0xff] }
  0x14   : > { %v713_v8 = vld [vmem:[%s834_s26 + $0x60] sm:$0xff]  ;;  %v712_v10 = vld [vmem:[%s834_s26 + $0x58] sm:$0xff]  ;;  %v711_v12 = vld [vmem:[%s834_s26 + $0x50] sm:$0xff] }
  0x15   : > { %v702_v13 = vld [vmem:[%s834_s26 + $0x8] sm:$0xff]  ;;  %v701_v15 = vld [vmem:[%s834_s26] sm:$0xff]  ;;  %v621_v19 = vld [vmem:[%s829_s23 + $0x10] sm:$0xf] }
  0x16   : > { %416 = vmatpush.bf16.msra.mxu0 %v707_v3  ;;  %718 = vmatpush.bf16.msra.mxu2 %v707_v3  ;;  %v710_v14 = vld [vmem:[%s834_s26 + $0x48] sm:$0xff]  ;;  %v709_v16 = vld [vmem:[%s834_s26 + $0x40] sm:$0xff]  ;;  %v700_v20 = vld [vmem:[%s829_s23 + $0x14] sm:$0xf0] }
  0x17   : > { %435 = vmatpush.bf16.msra.mxu1 %v715_v4  ;;  %726 = vmatpush.bf16.msra.mxu3 %v715_v4  ;;  %v613_v17 = vld [vmem:[%s829_s23] sm:$0xf]  ;;  %v698_v18 = vld [vmem:[%s829_s23 + $0x4] sm:$0xf0]  ;;  %v697_v21 = vld [vmem:[%s829_s23 + $0x4] sm:$0xf]  ;;  %v622_v26 = vor.u32 %v700_v20, %v621_v19 }
  0x18   : > { %v615_v22 = vld [vmem:[%s829_s23 + $0x8] sm:$0xf0]  ;;  %v699_v23 = vld [vmem:[%s829_s23 + $0x14] sm:$0xf]  ;;  %v623_v24 = vld [vmem:[%s829_s23 + $0x18] sm:$0xf0]  ;;  %v614_v25 = vor.u32 %v698_v18, %v613_v17 }
  0x19   : > { %v618_v27 = vor.u32 %v697_v21, %v615_v22  ;;  %v626_v28 = vor.u32 %v699_v23, %v623_v24  ;;  %v457_v60 = vld [vmem:[%s899_s3] sm:$0x1] }
  0x1a   : > { %417 = vmatpush.bf16.msra.mxu0 %v706_v5  ;;  %719 = vmatpush.bf16.msra.mxu2 %v706_v5  ;;  %v469_v63 = vld [vmem:[%s900_s4] sm:$0x1] }
  0x1b   : > { %436 = vmatpush.bf16.msra.mxu1 %v714_v6  ;;  %727 = vmatpush.bf16.msra.mxu3 %v714_v6 }
  0x1e   : > { %418 = vmatpush.bf16.msra.mxu0 %v705_v7  ;;  %720 = vmatpush.bf16.msra.mxu2 %v705_v7 }
  0x1f   : > { %437 = vmatpush.bf16.msra.mxu1 %v713_v8  ;;  %728 = vmatpush.bf16.msra.mxu3 %v713_v8 }
  0x22   : > { %419 = vmatpush.bf16.msra.mxu0 %v704_v9  ;;  %721 = vmatpush.bf16.msra.mxu2 %v704_v9 }
  0x23   : > { %438 = vmatpush.bf16.msra.mxu1 %v712_v10  ;;  %729 = vmatpush.bf16.msra.mxu3 %v712_v10 }
  0x26   : > { %420 = vmatpush.bf16.msra.mxu0 %v703_v11  ;;  %722 = vmatpush.bf16.msra.mxu2 %v703_v11 }
  0x27   : > { %439 = vmatpush.bf16.msra.mxu1 %v711_v12  ;;  %730 = vmatpush.bf16.msra.mxu3 %v711_v12 }
  0x2a   : > { %421 = vmatpush.bf16.msra.mxu0 %v702_v13  ;;  %723 = vmatpush.bf16.msra.mxu2 %v702_v13 }
  0x2b   : > { %440 = vmatpush.bf16.msra.mxu1 %v710_v14  ;;  %731 = vmatpush.bf16.msra.mxu3 %v710_v14 }
  0x2e   : > { %422 = vmatpush.bf16.msra.mxu0 %v701_v15  ;;  %724 = vmatpush.bf16.msra.mxu2 %v701_v15 }
  0x2f   : > { %441 = vmatpush.bf16.msra.mxu1 %v709_v16  ;;  %732 = vmatpush.bf16.msra.mxu3 %v709_v16 }
  0x31   : > { %423 = vmatmul.bf16.vlgmr.msra.gmra.mxu0 %v614_v25  ;;  %428 = vmatmul.bf16.vlgmr.msra.gmra.mxu2 %v622_v26 }
  0x32   : > { %442 = vmatmul.bf16.vlgmr.msra.gmra.mxu1 %v618_v27  ;;  %447 = vmatmul.bf16.vlgmr.msra.gmra.mxu3 %v626_v28 }
  0xae   : > { %v424_v29 = vpop.f32.mrf.mxu0 }
  0xaf   : > { %v443_v30 = vpop.f32.mrf.mxu1 }
  0xb0   : > { %v444_v31 = vadd.f32 %v443_v30, %v424_v29 }
  0xb2   : > { %453 = vst [vmem:[%s839_s29] sm:$0xff] %v444_v31  ;;  %v470_v38 = vmul.f32 %v444_v31, %v444_v31 }
  0xb4   : > { %v429_v32 = vpop.f32.mrf.mxu2 }
  0xb5   : > { %v448_v33 = vpop.f32.mrf.mxu3 }
  0xb6   : > { %v449_v34 = vadd.f32 %v448_v33, %v429_v32  ;;  %v426_v35 = vpop.f32.mrf.mxu0 }
  0xb7   : > { %v445_v36 = vpop.f32.mrf.mxu1 }
  0xb8   : > { %455 = vst [vmem:[%s839_s29 + $0x10] sm:$0xff] %v449_v34  ;;  %v446_v37 = vadd.f32 %v445_v36, %v426_v35  ;;  %v472_v44 = vmul.f32 %v449_v34, %v449_v34 }
  0xba   : > { %454 = vst [vmem:[%s839_s29 + $0x8] sm:$0xff] %v446_v37  ;;  %v458_v39 = vadd.f32 %v446_v37, %v444_v31  ;;  %v471_v40 = vmul.f32 %v446_v37, %v446_v37 }
  0xbc   : > { %v474_v41 = vadd.f32 %v471_v40, %v470_v38  ;;  %v431_v42 = vpop.f32.mrf.mxu2  ;;  %v459_v46 = vadd.f32 %v458_v39, %v449_v34 }
  0xbd   : > { %v450_v43 = vpop.f32.mrf.mxu3 }
  0xbe   : > { %v451_v45 = vadd.f32 %v450_v43, %v431_v42  ;;  %v475_v49 = vadd.f32 %v474_v41, %v472_v44 }
  0xc0   : > { %456 = vst [vmem:[%s839_s29 + $0x18] sm:$0xff] %v451_v45  ;;  %v460_v47 = vadd.f32 %v459_v46, %v451_v45  ;;  %v473_v48 = vmul.f32 %v451_v45, %v451_v45 }
  0xc2   : > { %v461_v50 = vrot.slane %v460_v47, 4  ;;  %v476_v51 = vadd.f32 %v475_v49, %v473_v48 }
  0xc4   : > { %v462_v52 = vadd.f32 %v461_v50, %v460_v47  ;;  %v477_v53 = vrot.slane %v476_v51, 4 }
  0xc6   : > { %v463_v54 = vrot.slane %v462_v52, 2  ;;  %v478_v55 = vadd.f32 %v477_v53, %v476_v51 }
  0xc8   : > { %v464_v56 = vadd.f32 %v463_v54, %v462_v52  ;;  %v479_v57 = vrot.slane %v478_v55, 2 }
  0xca   : > { %v465_v58 = vrot.slane %v464_v56, 1  ;;  %v480_v59 = vadd.f32 %v479_v57, %v478_v55 }
  0xcc   : > { %v466_v61 = vadd.f32 %v465_v58, %v464_v56  ;;  %v481_v62 = vrot.slane %v480_v59, 1 }
  0xce   : > { %v467_v0 = vadd.f32 %v466_v61, %v457_v60  ;;  %v482_v1 = vadd.f32 %v481_v62, %v480_v59 }
  0xd0   : > { %468 = vst [vmem:[%s899_s3] sm:$0x1] %v467_v0  ;;  %v483_v2 = vadd.f32 %v482_v1, %v469_v63 }
  0xd2   : > { %484 = vst [vmem:[%s900_s4] sm:$0x1] %v483_v2 }
  0xd3 PF: > { %s15_s17 = sadd.s32 1, %s780_s17   ;;  %s901_s15 = smov %s776_s16 }
  0xd4   : > { %p12_p6 = scmp.ge.s32.totalorder %s15_s17, 6   ;;  %s902_s16 = smov %s904_s18 }
  0xd6   :  { %14 = sbr.rel (!%p12_p6) target bundleno = 2 (0x2), region = 81 }

// kernel: generator_forward.14
= control target key start
LH: loop header
LB: loop body
LE: loop exit
PB: predicated region body
PF: predicated region fallthrough
CT: control target
= control target key end

     0   :  { %s468_s12 = smov 0   ;;  %s470_s13 = smov 0   ;;  %s561_s0 = inlined_call_operand.vmem [shape: f32[4,128,128], index: 0, kind: input, shape index: {}]   ;;  %s562_s1 = inlined_call_operand.vmem [shape: f32[1,128], index: 1, kind: input, shape index: {}]   ;;  %s563_s2 = inlined_call_operand.vmem [shape: f32[1,128], index: 2, kind: input, shape index: {}]   ;;  %s564_s3 = inlined_call_operand.vmem [shape: f32[4,128,128], index: 3, kind: output, shape index: {}]  }
   0x1   :  { %s472_s14 = smov 0  }
   0x2 LB: > { %s25_s15 = sadd.s32 1, %s442_s13  ;;  %p389_p0 = scmp.ge.s32.totalorder %s446_s14, 1  ;;  %s446_s14 = sphi %s472_s14, %s13_s14   ;;  %s442_s13 = sphi %s470_s13, %s566_s13   ;;  %s438_s12 = sphi %s468_s12, %s565_s12  }
   0x3   : > { %p27_p1 = scmp.ge.s32.totalorder %s25_s15, 4  ;;  %p158_p2 = scmp.lt.s32.totalorder %s446_s14, 5 }
   0x5   : > { %s568_s15 = smov (%p27_p1, %s25_s15), 0  ;;  %p159_p3 = pnand %p389_p0, %p158_p2 }
   0x6   : > { %p191_p4 = scmp.lt.s32.totalorder (!%p159_p3), %s438_s12, 3 }
   0x7   : > { %162 = sbr.rel (%p159_p3) target bundleno = 38 (0x26), region = 32 }
   0xc   : > { %s570_s12 = smov (!%p191_p4, %s438_s12), 3  ;;  %v422_v0 = vld [vmem:[%s562_s1] ss:$0 sm:$0xff] }
   0xd   : > { %s396_s18 = sshll.u32 %s570_s12, 7  ;;  %v497_v1 = vld [vmem:[%s563_s2] ss:$0 sm:$0xff] }
   0xe   : > { %s492_s21 = scalar_lea.vmem %s561_s0, %s396_s18  ;;  %s513_s26 = scalar_lea.vmem %s564_s3, %s396_s18 }
   0xf   : > { %v210_v2 = vld [vmem:[%s492_s21] sm:$0xff]  ;;  %v211_v3 = vld [vmem:[%s492_s21 + $0x8] sm:$0xff]  ;;  %v212_v4 = vld [vmem:[%s492_s21 + $0x10] sm:$0xff] }
  0x10   : > { %v230_v5 = vmul.f32 %v422_v0, %v210_v2  ;;  %v231_v6 = vmul.f32 %v422_v0, %v211_v3  ;;  %v232_v7 = vmul.f32 %v422_v0, %v212_v4  ;;  %v213_v8 = vld [vmem:[%s492_s21 + $0x18] sm:$0xff]  ;;  %v214_v9 = vld [vmem:[%s492_s21 + $0x20] sm:$0xff]  ;;  %v215_v10 = vld [vmem:[%s492_s21 + $0x28] sm:$0xff] }
  0x11   : > { %v233_v11 = vmul.f32 %v422_v0, %v213_v8  ;;  %v234_v12 = vmul.f32 %v422_v0, %v214_v9  ;;  %v235_v13 = vmul.f32 %v422_v0, %v215_v10  ;;  %v216_v14 = vld [vmem:[%s492_s21 + $0x30] sm:$0xff]  ;;  %v217_v15 = vld [vmem:[%s492_s21 + $0x38] sm:$0xff]  ;;  %v218_v24 = vld [vmem:[%s492_s21 + $0x40] sm:$0xff] }
  0x12   : > { %v250_v16 = vadd.f32 %v497_v1, %v230_v5  ;;  %v251_v17 = vadd.f32 %v497_v1, %v231_v6  ;;  %v252_v18 = vadd.f32 %v497_v1, %v232_v7  ;;  %v236_v19 = vmul.f32 %v422_v0, %v216_v14  ;;  %v219_v25 = vld [vmem:[%s492_s21 + $0x48] sm:$0xff]  ;;  %v220_v26 = vld [vmem:[%s492_s21 + $0x50] sm:$0xff]  ;;  %v221_v31 = vld [vmem:[%s492_s21 + $0x58] sm:$0xff] }
  0x13   : > { %v253_v20 = vadd.f32 %v497_v1, %v233_v11  ;;  %v254_v21 = vadd.f32 %v497_v1, %v234_v12  ;;  %v255_v22 = vadd.f32 %v497_v1, %v235_v13  ;;  %v237_v23 = vmul.f32 %v422_v0, %v217_v15  ;;  %v222_v32 = vld [vmem:[%s492_s21 + $0x60] sm:$0xff]  ;;  %v223_v33 = vld [vmem:[%s492_s21 + $0x68] sm:$0xff]  ;;  %v224_v37 = vld [vmem:[%s492_s21 + $0x70] sm:$0xff] }
  0x14   : > { %v266_v27 = vmax.f32 %v250_v16, 0.0  ;;  %v267_v28 = vmax.f32 %v251_v17, 0.0  ;;  %v268_v29 = vmax.f32 %v252_v18, 0.0  ;;  %v256_v30 = vadd.f32 %v497_v1, %v236_v19  ;;  %v225_v42 = vld [vmem:[%s492_s21 + $0x78] sm:$0xff] }
  0x15   : > { %v269_v34 = vmax.f32 %v253_v20, 0.0  ;;  %v270_v35 = vmax.f32 %v254_v21, 0.0  ;;  %v257_v36 = vadd.f32 %v497_v1, %v237_v23  ;;  %v271_v38 = vmax.f32 %v255_v22, 0.0 }
  0x16   : > { %282 = vst [vmem:[%s513_s26] sm:$0xff] %v266_v27  ;;  %v238_v39 = vmul.f32 %v422_v0, %v218_v24  ;;  %v239_v40 = vmul.f32 %v422_v0, %v219_v25  ;;  %v240_v41 = vmul.f32 %v422_v0, %v220_v26  ;;  %v272_v43 = vmax.f32 %v256_v30, 0.0 }
  0x17   : > { %283 = vst [vmem:[%s513_s26 + $0x8] sm:$0xff] %v267_v28  ;;  %v241_v44 = vmul.f32 %v422_v0, %v221_v31  ;;  %v242_v45 = vmul.f32 %v422_v0, %v222_v32  ;;  %v243_v46 = vmul.f32 %v422_v0, %v223_v33  ;;  %v244_v50 = vmul.f32 %v422_v0, %v224_v37 }
  0x18   : > { %284 = vst [vmem:[%s513_s26 + $0x10] sm:$0xff] %v268_v29  ;;  %v258_v47 = vadd.f32 %v497_v1, %v238_v39  ;;  %v259_v48 = vadd.f32 %v497_v1, %v239_v40  ;;  %v260_v49 = vadd.f32 %v497_v1, %v240_v41  ;;  %v273_v51 = vmax.f32 %v257_v36, 0.0 }
  0x19   : > { %285 = vst [vmem:[%s513_s26 + $0x18] sm:$0xff] %v269_v34  ;;  %v261_v52 = vadd.f32 %v497_v1, %v241_v44  ;;  %v245_v53 = vmul.f32 %v422_v0, %v225_v42  ;;  %v262_v55 = vadd.f32 %v497_v1, %v242_v45  ;;  %v263_v57 = vadd.f32 %v497_v1, %v243_v46 }
  0x1a   : > { %286 = vst [vmem:[%s513_s26 + $0x20] sm:$0xff] %v270_v35  ;;  %v274_v54 = vmax.f32 %v258_v47, 0.0  ;;  %v275_v56 = vmax.f32 %v259_v48, 0.0  ;;  %v276_v58 = vmax.f32 %v260_v49, 0.0  ;;  %v264_v59 = vadd.f32 %v497_v1, %v244_v50 }
  0x1b   : > { %287 = vst [vmem:[%s513_s26 + $0x28] sm:$0xff] %v271_v38  ;;  %v277_v60 = vmax.f32 %v261_v52, 0.0  ;;  %v265_v61 = vadd.f32 %v497_v1, %v245_v53  ;;  %v278_v62 = vmax.f32 %v262_v55, 0.0  ;;  %v279_v63 = vmax.f32 %v263_v57, 0.0 }
  0x1c   : > { %288 = vst [vmem:[%s513_s26 + $0x30] sm:$0xff] %v272_v43  ;;  %v280_v0 = vmax.f32 %v264_v59, 0.0 }
  0x1d   : > { %289 = vst [vmem:[%s513_s26 + $0x38] sm:$0xff] %v273_v51  ;;  %v281_v2 = vmax.f32 %v265_v61, 0.0 }
  0x1e   : > { %290 = vst [vmem:[%s513_s26 + $0x40] sm:$0xff] %v274_v54 }
  0x1f   : > { %291 = vst [vmem:[%s513_s26 + $0x48] sm:$0xff] %v275_v56 }
  0x20   : > { %292 = vst [vmem:[%s513_s26 + $0x50] sm:$0xff] %v276_v58 }
  0x21   : > { %293 = vst [vmem:[%s513_s26 + $0x58] sm:$0xff] %v277_v60 }
  0x22   : > { %294 = vst [vmem:[%s513_s26 + $0x60] sm:$0xff] %v278_v62 }
  0x23   : > { %295 = vst [vmem:[%s513_s26 + $0x68] sm:$0xff] %v279_v63 }
  0x24   : > { %296 = vst [vmem:[%s513_s26 + $0x70] sm:$0xff] %v280_v0 }
  0x25   : > { %297 = vst [vmem:[%s513_s26 + $0x78] sm:$0xff] %v281_v2 }
  0x26 PF: > { %s13_s14 = sadd.s32 1, %s446_s14   ;;  %s565_s12 = smov %s442_s13 }
  0x27   : > { %p10_p5 = scmp.ge.s32.totalorder %s13_s14, 6   ;;  %s566_s13 = smov %s568_s15 }
  0x29   :  { %12 = sbr.rel (!%p10_p5) target bundleno = 2 (0x2), region = 62 }

// kernel: generator_forward.13
= control target key start
LH: loop header
LB: loop body
LE: loop exit
PB: predicated region body
PF: predicated region fallthrough
CT: control target
= control target key end

     0   :  { %s825_s15 = smov 0   ;;  %s827_s16 = smov 0   ;;  %s917_s0 = inlined_call_operand.vmem [shape: bf16[4,128,128], index: 0, kind: input, shape index: {}]   ;;  %s918_s1 = inlined_call_operand.vmem [shape: bf16[4,128,128], index: 1, kind: input, shape index: {}]   ;;  %s919_s2 = inlined_call_operand.vmem [shape: f32[4,128,128], index: 2, kind: output, shape index: {0}]   ;;  %s920_s3 = inlined_call_operand.vmem [shape: f32[1,128], index: 3, kind: output, shape index: {1}]   ;;  %s921_s4 = inlined_call_operand.vmem [shape: f32[1,128], index: 4, kind: output, shape index: {2}]  }
   0x1   :  { %s829_s17 = smov 0  }
   0x2 LB: > { %s27_s18 = sadd.s32 1, %s793_s16  ;;  %p632_p0 = scmp.ge.s32.totalorder %s797_s17, 1  ;;  %s797_s17 = sphi %s829_s17, %s15_s17   ;;  %s793_s16 = sphi %s827_s16, %s923_s16   ;;  %s789_s15 = sphi %s825_s15, %s922_s15  }
   0x3   : > { %p29_p1 = scmp.ge.s32.totalorder %s27_s18, 4  ;;  %p188_p2 = scmp.lt.s32.totalorder %s797_s17, 5 }
   0x5   : > { %s925_s18 = smov (%p29_p1, %s27_s18), 0  ;;  %p189_p3 = pnand %p632_p0, %p188_p2 }
   0x6   : > { %p228_p4 = scmp.lt.s32.totalorder (!%p189_p3), %s789_s15, 3  ;;  %p252_p5 = scmp.eq.s32.totalorder (!%p189_p3), %s789_s15, 0 }
   0x7   : > { %192 = sbr.rel (%p189_p3) target bundleno = 242 (0xf2), region = 28 }
   0xc   : > { %s927_s15 = smov (!%p228_p4, %s789_s15), 3  ;;  %257 = sbr.rel (!%p252_p5) target bundleno = 17 (0x11), region = 32  ;;  %v799_v0 = vmov (%p252_p5), 0.0  }
   0xd   : > { %s706_s19 = sshll.u32 %s927_s15, 6  ;;  %s708_s20 = sshll.u32 %s927_s15, 7  ;;  %258 = vst [vmem:[%s920_s3] sm:$0x1] (%p252_p5), %v799_v0 }
   0xe   : > { %s846_s23 = scalar_lea.vmem %s917_s0, %s706_s19  ;;  %s851_s26 = scalar_lea.vmem %s918_s1, %s706_s19  ;;  %259 = vst [vmem:[%s921_s4] sm:$0x1] (%p252_p5), %v799_v0 }
   0xf   : > { %s856_s29 = scalar_lea.vmem %s919_s2, %s708_s20 }
  0x11 PF: > { %v725_v1 = vld [vmem:[%s851_s26 + $0x38] sm:$0xff]  ;;  %v724_v2 = vld [vmem:[%s851_s26 + $0x30] sm:$0xff]  ;;  %v723_v3 = vld [vmem:[%s851_s26 + $0x28] sm:$0xff] }
  0x12   : > { %388 = vmatpush.bf16.msra.mxu0 %v725_v1  ;;  %726 = vmatpush.bf16.msra.mxu1 %v725_v1  ;;  %v722_v4 = vld [vmem:[%s851_s26 + $0x20] sm:$0xff]  ;;  %v721_v5 = vld [vmem:[%s851_s26 + $0x18] sm:$0xff]  ;;  %v720_v6 = vld [vmem:[%s851_s26 + $0x10] sm:$0xff] }
  0x13   : > { %727 = vmatpush.bf16.msra.mxu2 %v725_v1  ;;  %728 = vmatpush.bf16.msra.mxu3 %v725_v1  ;;  %v719_v7 = vld [vmem:[%s851_s26 + $0x8] sm:$0xff]  ;;  %v718_v8 = vld [vmem:[%s851_s26] sm:$0xff]  ;;  %v712_v10 = vld [vmem:[%s846_s23 + $0x10] sm:$0xff] }
  0x14   : > { %v710_v9 = vld [vmem:[%s846_s23] sm:$0xff]  ;;  %v716_v12 = vld [vmem:[%s846_s23 + $0x30] sm:$0xff]  ;;  %v711_v13 = vld [vmem:[%s846_s23 + $0x8] sm:$0xff] }
  0x15   : > { %v714_v11 = vld [vmem:[%s846_s23 + $0x20] sm:$0xff]  ;;  %v713_v14 = vld [vmem:[%s846_s23 + $0x18] sm:$0xff]  ;;  %v715_v15 = vld [vmem:[%s846_s23 + $0x28] sm:$0xff] }
  0x16   : > { %389 = vmatpush.bf16.msra.mxu0 %v724_v2  ;;  %729 = vmatpush.bf16.msra.mxu1 %v724_v2  ;;  %v717_v16 = vld [vmem:[%s846_s23 + $0x38] sm:$0xff] }
  0x17   : > { %730 = vmatpush.bf16.msra.mxu2 %v724_v2  ;;  %731 = vmatpush.bf16.msra.mxu3 %v724_v2 }
  0x1a   : > { %390 = vmatpush.bf16.msra.mxu0 %v723_v3  ;;  %732 = vmatpush.bf16.msra.mxu1 %v723_v3 }
  0x1b   : > { %733 = vmatpush.bf16.msra.mxu2 %v723_v3  ;;  %734 = vmatpush.bf16.msra.mxu3 %v723_v3 }
  0x1e   : > { %391 = vmatpush.bf16.msra.mxu0 %v722_v4  ;;  %735 = vmatpush.bf16.msra.mxu1 %v722_v4 }
  0x1f   : > { %736 = vmatpush.bf16.msra.mxu2 %v722_v4  ;;  %737 = vmatpush.bf16.msra.mxu3 %v722_v4 }
  0x22   : > { %392 = vmatpush.bf16.msra.mxu0 %v721_v5  ;;  %738 = vmatpush.bf16.msra.mxu1 %v721_v5 }
  0x23   : > { %739 = vmatpush.bf16.msra.mxu2 %v721_v5  ;;  %740 = vmatpush.bf16.msra.mxu3 %v721_v5 }
  0x26   : > { %393 = vmatpush.bf16.msra.mxu0 %v720_v6  ;;  %741 = vmatpush.bf16.msra.mxu1 %v720_v6 }
  0x27   : > { %742 = vmatpush.bf16.msra.mxu2 %v720_v6  ;;  %743 = vmatpush.bf16.msra.mxu3 %v720_v6 }
  0x2a   : > { %394 = vmatpush.bf16.msra.mxu0 %v719_v7  ;;  %744 = vmatpush.bf16.msra.mxu1 %v719_v7 }
  0x2b   : > { %745 = vmatpush.bf16.msra.mxu2 %v719_v7  ;;  %746 = vmatpush.bf16.msra.mxu3 %v719_v7 }
  0x2e   : > { %395 = vmatpush.bf16.msra.mxu0 %v718_v8  ;;  %747 = vmatpush.bf16.msra.mxu1 %v718_v8 }
  0x2f   : > { %748 = vmatpush.bf16.msra.mxu2 %v718_v8  ;;  %749 = vmatpush.bf16.msra.mxu3 %v718_v8 }
  0x31   : > { %396 = vmatmul.bf16.vlgmr.msra.gmra.mxu0 %v710_v9  ;;  %406 = vmatmul.bf16.vlgmr.msra.gmra.mxu1 %v712_v10 }
  0x32   : > { %416 = vmatmul.bf16.vlgmr.msra.gmra.mxu2 %v714_v11  ;;  %426 = vmatmul.bf16.vlgmr.msra.gmra.mxu3 %v716_v12 }
  0x41   : > { %401 = vmatmul.bf16.gmra.mxu0 %v711_v13  ;;  %411 = vmatmul.bf16.gmra.mxu1 %v713_v14 }
  0x42   : > { %421 = vmatmul.bf16.gmra.mxu2 %v715_v15  ;;  %431 = vmatmul.bf16.gmra.mxu3 %v717_v16 }
  0xae   : > { %v397_v17 = vpop.f32.mrf.mxu0  ;;  %v407_v18 = vpop.f32.mrf.mxu1 }
  0xaf   : > { %437 = vst [vmem:[%s856_s29] sm:$0xff] %v397_v17  ;;  %v478_v28 = vmul.f32 %v397_v17, %v397_v17  ;;  %v482_v40 = vmul.f32 %v407_v18, %v407_v18 }
  0xb0   : > { %441 = vst [vmem:[%s856_s29 + $0x20] sm:$0xff] %v407_v18 }
  0xb5   : > { %v417_v19 = vpop.f32.mrf.mxu2  ;;  %v427_v20 = vpop.f32.mrf.mxu3 }
  0xb6   : > { %v399_v21 = vpop.f32.mrf.mxu0  ;;  %v409_v22 = vpop.f32.mrf.mxu1  ;;  %445 = vst [vmem:[%s856_s29 + $0x40] sm:$0xff] %v417_v19  ;;  %v486_v54 = vmul.f32 %v417_v19, %v417_v19  ;;  %v490_v2 = vmul.f32 %v427_v20, %v427_v20 }
  0xb7   : > { %438 = vst [vmem:[%s856_s29 + $0x8] sm:$0xff] %v399_v21  ;;  %v479_v27 = vmul.f32 %v399_v21, %v399_v21  ;;  %v454_v29 = vadd.f32 %v399_v21, %v397_v17  ;;  %v483_v43 = vmul.f32 %v409_v22, %v409_v22 }
  0xb8   : > { %442 = vst [vmem:[%s856_s29 + $0x28] sm:$0xff] %v409_v22 }
  0xb9   : > { %449 = vst [vmem:[%s856_s29 + $0x60] sm:$0xff] %v427_v20  ;;  %v494_v31 = vadd.f32 %v479_v27, %v478_v28  ;;  %v477_v27 = vld [vmem:[%s921_s4] sm:$0x1] }
  0xbd   : > { %v419_v23 = vpop.f32.mrf.mxu2  ;;  %v429_v24 = vpop.f32.mrf.mxu3 }
  0xbe   : > { %v402_v25 = vpop.f32.mrf.mxu0  ;;  %v412_v26 = vpop.f32.mrf.mxu1  ;;  %446 = vst [vmem:[%s856_s29 + $0x48] sm:$0xff] %v419_v23  ;;  %v487_v57 = vmul.f32 %v419_v23, %v419_v23  ;;  %v491_v5 = vmul.f32 %v429_v24, %v429_v24 }
  0xbf   : > { %439 = vst [vmem:[%s856_s29 + $0x10] sm:$0xff] %v402_v25  ;;  %v480_v30 = vmul.f32 %v402_v25, %v402_v25  ;;  %v455_v32 = vadd.f32 %v454_v29, %v402_v25  ;;  %v484_v46 = vmul.f32 %v412_v26, %v412_v26 }
  0xc0   : > { %443 = vst [vmem:[%s856_s29 + $0x30] sm:$0xff] %v412_v26 }
  0xc1   : > { %450 = vst [vmem:[%s856_s29 + $0x68] sm:$0xff] %v429_v24  ;;  %v495_v37 = vadd.f32 %v494_v31, %v480_v30 }
  0xc5   : > { %v422_v33 = vpop.f32.mrf.mxu2  ;;  %v432_v34 = vpop.f32.mrf.mxu3 }
  0xc6   : > { %v404_v35 = vpop.f32.mrf.mxu0  ;;  %v414_v36 = vpop.f32.mrf.mxu1  ;;  %447 = vst [vmem:[%s856_s29 + $0x50] sm:$0xff] %v422_v33  ;;  %v488_v61 = vmul.f32 %v422_v33, %v422_v33  ;;  %v492_v9 = vmul.f32 %v432_v34, %v432_v34 }
  0xc7   : > { %440 = vst [vmem:[%s856_s29 + $0x18] sm:$0xff] %v404_v35  ;;  %v456_v38 = vadd.f32 %v455_v32, %v404_v35  ;;  %v481_v39 = vmul.f32 %v404_v35, %v404_v35  ;;  %v485_v52 = vmul.f32 %v414_v36, %v414_v36 }
  0xc8   : > { %444 = vst [vmem:[%s856_s29 + $0x38] sm:$0xff] %v414_v36 }
  0xc9   : > { %v457_v41 = vadd.f32 %v456_v38, %v407_v18  ;;  %v496_v42 = vadd.f32 %v495_v37, %v481_v39  ;;  %451 = vst [vmem:[%s856_s29 + $0x70] sm:$0xff] %v432_v34 }
  0xcb   : > { %v497_v44 = vadd.f32 %v496_v42, %v482_v40  ;;  %v458_v45 = vadd.f32 %v457_v41, %v409_v22 }
  0xcd   : > { %v459_v47 = vadd.f32 %v458_v45, %v412_v26  ;;  %v498_v48 = vadd.f32 %v497_v44, %v483_v43  ;;  %v424_v49 = vpop.f32.mrf.mxu2  ;;  %v434_v50 = vpop.f32.mrf.mxu3 }
  0xce   : > { %448 = vst [vmem:[%s856_s29 + $0x58] sm:$0xff] %v424_v49  ;;  %v489_v1 = vmul.f32 %v424_v49, %v424_v49  ;;  %v493_v13 = vmul.f32 %v434_v50, %v434_v50 }
  0xcf   : > { %v460_v51 = vadd.f32 %v459_v47, %v414_v36  ;;  %v499_v53 = vadd.f32 %v498_v48, %v484_v46  ;;  %452 = vst [vmem:[%s856_s29 + $0x78] sm:$0xff] %v434_v50 }
  0xd1   : > { %v461_v55 = vadd.f32 %v460_v51, %v417_v19  ;;  %v500_v56 = vadd.f32 %v499_v53, %v485_v52 }
  0xd3   : > { %v501_v58 = vadd.f32 %v500_v56, %v486_v54  ;;  %v462_v59 = vadd.f32 %v461_v55, %v419_v23 }
  0xd5   : > { %v463_v60 = vadd.f32 %v462_v59, %v422_v33  ;;  %v502_v62 = vadd.f32 %v501_v58, %v487_v57 }
  0xd7   : > { %v503_v63 = vadd.f32 %v502_v62, %v488_v61  ;;  %v464_v0 = vadd.f32 %v463_v60, %v424_v49 }
  0xd9   : > { %v465_v3 = vadd.f32 %v464_v0, %v427_v20  ;;  %v504_v4 = vadd.f32 %v503_v63, %v489_v1 }
  0xdb   : > { %v505_v6 = vadd.f32 %v504_v4, %v490_v2  ;;  %v466_v7 = vadd.f32 %v465_v3, %v429_v24  ;;  %v453_v24 = vld [vmem:[%s920_s3] sm:$0x1] }
  0xdd   : > { %v467_v8 = vadd.f32 %v466_v7, %v432_v34  ;;  %v506_v10 = vadd.f32 %v505_v6, %v491_v5 }
  0xdf   : > { %v507_v11 = vadd.f32 %v506_v10, %v492_v9  ;;  %v468_v12 = vadd.f32 %v467_v8, %v434_v50 }
  0xe1   : > { %v469_v14 = vrot.slane %v468_v12, 4  ;;  %v508_v15 = vadd.f32 %v507_v11, %v493_v13 }
  0xe3   : > { %v470_v16 = vadd.f32 %v469_v14, %v468_v12  ;;  %v509_v17 = vrot.slane %v508_v15, 4 }
  0xe5   : > { %v471_v18 = vrot.slane %v470_v16, 2  ;;  %v510_v19 = vadd.f32 %v509_v17, %v508_v15 }
  0xe7   : > { %v472_v21 = vadd.f32 %v471_v18, %v470_v16  ;;  %v511_v22 = vrot.slane %v510_v19, 2 }
  0xe9   : > { %v473_v23 = vrot.slane %v472_v21, 1  ;;  %v512_v20 = vadd.f32 %v511_v22, %v510_v19 }
  0xeb   : > { %v474_v25 = vadd.f32 %v473_v23, %v472_v21  ;;  %v513_v26 = vrot.slane %v512_v20, 1 }
  0xed   : > { %v475_v28 = vadd.f32 %v474_v25, %v453_v24  ;;  %v514_v29 = vadd.f32 %v513_v26, %v512_v20 }
  0xef   : > { %476 = vst [vmem:[%s920_s3] sm:$0x1] %v475_v28  ;;  %v515_v30 = vadd.f32 %v514_v29, %v477_v27 }
  0xf1   : > { %516 = vst [vmem:[%s921_s4] sm:$0x1] %v515_v30 }
  0xf2 PF: > { %s15_s17 = sadd.s32 1, %s797_s17   ;;  %s922_s15 = smov %s793_s16 }
  0xf3   : > { %p12_p6 = scmp.ge.s32.totalorder %s15_s17, 6   ;;  %s923_s16 = smov %s925_s18 }
  0xf5   :  { %14 = sbr.rel (!%p12_p6) target bundleno = 2 (0x2), region = 81 }

// kernel: generator_forward.16
= control target key start
LH: loop header
LB: loop body
LE: loop exit
PB: predicated region body
PF: predicated region fallthrough
CT: control target
= control target key end

     0   :  { %s708_s12 = smov 0   ;;  %s710_s13 = smov 0   ;;  %s1014_s0 = inlined_call_operand.vmem [shape: f32[4,512,128], index: 0, kind: input, shape index: {}]   ;;  %s1015_s1 = inlined_call_operand.vmem [shape: f32[1,128], index: 1, kind: input, shape index: {}]   ;;  %s1016_s2 = inlined_call_operand.vmem [shape: f32[1,128], index: 2, kind: input, shape index: {}]   ;;  %s1017_s3 = inlined_call_operand.vmem [shape: f32[4,512,128], index: 3, kind: output, shape index: {}]  }
   0x1   :  { %s712_s14 = smov 0  }
   0x2 LB: > { %s25_s15 = sadd.s32 1, %s682_s13  ;;  %p629_p0 = scmp.ge.s32.totalorder %s686_s14, 1  ;;  %s686_s14 = sphi %s712_s14, %s13_s14   ;;  %s682_s13 = sphi %s710_s13, %s1019_s13   ;;  %s678_s12 = sphi %s708_s12, %s1018_s12  }
   0x3   : > { %p27_p1 = scmp.ge.s32.totalorder %s25_s15, 4  ;;  %p158_p2 = scmp.lt.s32.totalorder %s686_s14, 5 }
   0x5   : > { %s1021_s15 = smov (%p27_p1, %s25_s15), 0  ;;  %p159_p3 = pnand %p629_p0, %p158_p2 }
   0x6   : > { %p191_p4 = scmp.lt.s32.totalorder (!%p159_p3), %s678_s12, 3 }
   0x7   : > { %162 = sbr.rel (%p159_p3) target bundleno = 86 (0x56), region = 32 }
   0xc   : > { %s1023_s12 = smov (!%p191_p4, %s678_s12), 3  ;;  %v729_v0 = vld [vmem:[%s1015_s1] ss:$0 sm:$0xff] }
   0xd   : > { %s636_s18 = sshll.u32 %s1023_s12, 9  ;;  %v739_v1 = vld [vmem:[%s1016_s2] ss:$0 sm:$0xff] }
   0xe   : > { %s734_s21 = scalar_lea.vmem %s1014_s0, %s636_s18  ;;  %s762_s26 = scalar_lea.vmem %s1017_s3, %s636_s18 }
   0xf   : > { %v210_v2 = vld [vmem:[%s734_s21] sm:$0xff]  ;;  %v211_v3 = vld [vmem:[%s734_s21 + $0x8] sm:$0xff]  ;;  %v212_v4 = vld [vmem:[%s734_s21 + $0x10] sm:$0xff] }
  0x10   : > { %v278_v5 = vmul.f32 %v729_v0, %v210_v2  ;;  %v279_v6 = vmul.f32 %v729_v0, %v211_v3  ;;  %v280_v7 = vmul.f32 %v729_v0, %v212_v4  ;;  %v213_v8 = vld [vmem:[%s734_s21 + $0x18] sm:$0xff]  ;;  %v214_v9 = vld [vmem:[%s734_s21 + $0x20] sm:$0xff]  ;;  %v215_v10 = vld [vmem:[%s734_s21 + $0x28] sm:$0xff] }
  0x11   : > { %v281_v11 = vmul.f32 %v729_v0, %v213_v8  ;;  %v282_v12 = vmul.f32 %v729_v0, %v214_v9  ;;  %v283_v13 = vmul.f32 %v729_v0, %v215_v10  ;;  %v216_v14 = vld [vmem:[%s734_s21 + $0x30] sm:$0xff]  ;;  %v217_v15 = vld [vmem:[%s734_s21 + $0x38] sm:$0xff]  ;;  %v218_v24 = vld [vmem:[%s734_s21 + $0x40] sm:$0xff] }
  0x12   : > { %v346_v16 = vadd.f32 %v739_v1, %v278_v5  ;;  %v347_v17 = vadd.f32 %v739_v1, %v279_v6  ;;  %v348_v18 = vadd.f32 %v739_v1, %v280_v7  ;;  %v284_v19 = vmul.f32 %v729_v0, %v216_v14  ;;  %v219_v25 = vld [vmem:[%s734_s21 + $0x48] sm:$0xff]  ;;  %v220_v26 = vld [vmem:[%s734_s21 + $0x50] sm:$0xff]  ;;  %v221_v31 = vld [vmem:[%s734_s21 + $0x58] sm:$0xff] }
  0x13   : > { %v349_v20 = vadd.f32 %v739_v1, %v281_v11  ;;  %v350_v21 = vadd.f32 %v739_v1, %v282_v12  ;;  %v351_v22 = vadd.f32 %v739_v1, %v283_v13  ;;  %v285_v23 = vmul.f32 %v729_v0, %v217_v15  ;;  %v222_v32 = vld [vmem:[%s734_s21 + $0x60] sm:$0xff]  ;;  %v223_v33 = vld [vmem:[%s734_s21 + $0x68] sm:$0xff]  ;;  %v224_v37 = vld [vmem:[%s734_s21 + $0x70] sm:$0xff] }
  0x14   : > { %v410_v27 = vmax.f32 %v346_v16, 0.0  ;;  %v411_v28 = vmax.f32 %v347_v17, 0.0  ;;  %v412_v29 = vmax.f32 %v348_v18, 0.0  ;;  %v352_v30 = vadd.f32 %v739_v1, %v284_v19  ;;  %v225_v42 = vld [vmem:[%s734_s21 + $0x78] sm:$0xff]  ;;  %v226_v54 = vld [vmem:[%s734_s21 + $0x80] sm:$0xff]  ;;  %v227_v55 = vld [vmem:[%s734_s21 + $0x88] sm:$0xff] }
  0x15   : > { %v413_v34 = vmax.f32 %v349_v20, 0.0  ;;  %v414_v35 = vmax.f32 %v350_v21, 0.0  ;;  %v353_v36 = vadd.f32 %v739_v1, %v285_v23  ;;  %v415_v38 = vmax.f32 %v351_v22, 0.0  ;;  %v228_v56 = vld [vmem:[%s734_s21 + $0x90] sm:$0xff]  ;;  %v229_v59 = vld [vmem:[%s734_s21 + $0x98] sm:$0xff]  ;;  %v230_v63 = vld [vmem:[%s734_s21 + $0xa0] sm:$0xff] }
  0x16   : > { %474 = vst [vmem:[%s762_s26] sm:$0xff] %v410_v27  ;;  %v286_v39 = vmul.f32 %v729_v0, %v218_v24  ;;  %v287_v40 = vmul.f32 %v729_v0, %v219_v25  ;;  %v288_v41 = vmul.f32 %v729_v0, %v220_v26  ;;  %v416_v43 = vmax.f32 %v352_v30, 0.0  ;;  %v231_v6 = vld [vmem:[%s734_s21 + $0xa8] sm:$0xff]  ;;  %v232_v10 = vld [vmem:[%s734_s21 + $0xb0] sm:$0xff]  ;;  %v233_v14 = vld [vmem:[%s734_s21 + $0xb8] sm:$0xff] }
  0x17   : > { %475 = vst [vmem:[%s762_s26 + $0x8] sm:$0xff] %v411_v28  ;;  %v289_v44 = vmul.f32 %v729_v0, %v221_v31  ;;  %v290_v45 = vmul.f32 %v729_v0, %v222_v32  ;;  %v291_v46 = vmul.f32 %v729_v0, %v223_v33  ;;  %v292_v50 = vmul.f32 %v729_v0, %v224_v37  ;;  %v234_v18 = vld [vmem:[%s734_s21 + $0xc0] sm:$0xff]  ;;  %v235_v22 = vld [vmem:[%s734_s21 + $0xc8] sm:$0xff]  ;;  %v236_v26 = vld [vmem:[%s734_s21 + $0xd0] sm:$0xff] }
  0x18   : > { %476 = vst [vmem:[%s762_s26 + $0x10] sm:$0xff] %v412_v29  ;;  %v354_v47 = vadd.f32 %v739_v1, %v286_v39  ;;  %v355_v48 = vadd.f32 %v739_v1, %v287_v40  ;;  %v356_v49 = vadd.f32 %v739_v1, %v288_v41  ;;  %v417_v51 = vmax.f32 %v353_v36, 0.0  ;;  %v237_v30 = vld [vmem:[%s734_s21 + $0xd8] sm:$0xff] }
  0x19   : > { %477 = vst [vmem:[%s762_s26 + $0x18] sm:$0xff] %v413_v34  ;;  %v357_v52 = vadd.f32 %v739_v1, %v289_v44  ;;  %v293_v53 = vmul.f32 %v729_v0, %v225_v42  ;;  %v358_v58 = vadd.f32 %v739_v1, %v290_v45  ;;  %v359_v62 = vadd.f32 %v739_v1, %v291_v46  ;;  %v238_v34 = vld [vmem:[%s734_s21 + $0xe0] sm:$0xff]  ;;  %v240_v42 = vld [vmem:[%s734_s21 + $0xf0] sm:$0xff]  ;;  %v241_v46 = vld [vmem:[%s734_s21 + $0xf8] sm:$0xff] }
  0x1a   : > { %478 = vst [vmem:[%s762_s26 + $0x20] sm:$0xff] %v414_v35  ;;  %v418_v57 = vmax.f32 %v354_v47, 0.0  ;;  %v419_v60 = vmax.f32 %v355_v48, 0.0  ;;  %v420_v61 = vmax.f32 %v356_v49, 0.0  ;;  %v360_v2 = vadd.f32 %v739_v1, %v292_v50  ;;  %v242_v50 = vld [vmem:[%s734_s21 + $0x100] sm:$0xff] }
  0x1b   : > { %479 = vst [vmem:[%s762_s26 + $0x28] sm:$0xff] %v415_v38  ;;  %v294_v3 = vmul.f32 %v729_v0, %v226_v54  ;;  %v295_v4 = vmul.f32 %v729_v0, %v227_v55  ;;  %v296_v5 = vmul.f32 %v729_v0, %v228_v56  ;;  %v421_v7 = vmax.f32 %v357_v52, 0.0  ;;  %v239_v38 = vld [vmem:[%s734_s21 + $0xe8] sm:$0xff] }
  0x1c   : > { %480 = vst [vmem:[%s762_s26 + $0x30] sm:$0xff] %v416_v43  ;;  %v361_v8 = vadd.f32 %v739_v1, %v293_v53  ;;  %v297_v9 = vmul.f32 %v729_v0, %v229_v59  ;;  %v422_v11 = vmax.f32 %v358_v58, 0.0  ;;  %v298_v13 = vmul.f32 %v729_v0, %v230_v63  ;;  %v243_v54 = vld [vmem:[%s734_s21 + $0x108] sm:$0xff]  ;;  %v244_v58 = vld [vmem:[%s734_s21 + $0x110] sm:$0xff] }
  0x1d   : > { %481 = vst [vmem:[%s762_s26 + $0x38] sm:$0xff] %v417_v51  ;;  %v362_v12 = vadd.f32 %v739_v1, %v294_v3  ;;  %v423_v15 = vmax.f32 %v359_v62, 0.0  ;;  %v363_v16 = vadd.f32 %v739_v1, %v295_v4  ;;  %v299_v17 = vmul.f32 %v729_v0, %v231_v6  ;;  %v245_v62 = vld [vmem:[%s734_s21 + $0x118] sm:$0xff]  ;;  %v246_v4 = vld [vmem:[%s734_s21 + $0x120] sm:$0xff] }
  0x1e   : > { %482 = vst [vmem:[%s762_s26 + $0x40] sm:$0xff] %v418_v57  ;;  %v424_v19 = vmax.f32 %v360_v2, 0.0  ;;  %v364_v20 = vadd.f32 %v739_v1, %v296_v5  ;;  %v300_v21 = vmul.f32 %v729_v0, %v232_v10  ;;  %v425_v23 = vmax.f32 %v361_v8, 0.0  ;;  %v247_v8 = vld [vmem:[%s734_s21 + $0x128] sm:$0xff] }
  0x1f   : > { %483 = vst [vmem:[%s762_s26 + $0x48] sm:$0xff] %v419_v60  ;;  %v365_v24 = vadd.f32 %v739_v1, %v297_v9  ;;  %v301_v25 = vmul.f32 %v729_v0, %v233_v14  ;;  %v426_v27 = vmax.f32 %v362_v12, 0.0  ;;  %v366_v28 = vadd.f32 %v739_v1, %v298_v13  ;;  %v248_v12 = vld [vmem:[%s734_s21 + $0x130] sm:$0xff] }
  0x20   : > { %484 = vst [vmem:[%s762_s26 + $0x50] sm:$0xff] %v420_v61  ;;  %v302_v29 = vmul.f32 %v729_v0, %v234_v18  ;;  %v427_v31 = vmax.f32 %v363_v16, 0.0  ;;  %v367_v32 = vadd.f32 %v739_v1, %v299_v17  ;;  %v303_v33 = vmul.f32 %v729_v0, %v235_v22  ;;  %v249_v16 = vld [vmem:[%s734_s21 + $0x138] sm:$0xff] }
  0x21   : > { %485 = vst [vmem:[%s762_s26 + $0x58] sm:$0xff] %v421_v7  ;;  %v428_v35 = vmax.f32 %v364_v20, 0.0  ;;  %v368_v36 = vadd.f32 %v739_v1, %v300_v21  ;;  %v304_v37 = vmul.f32 %v729_v0, %v236_v26  ;;  %v429_v39 = vmax.f32 %v365_v24, 0.0  ;;  %v250_v20 = vld [vmem:[%s734_s21 + $0x140] sm:$0xff]  ;;  %v251_v24 = vld [vmem:[%s734_s21 + $0x148] sm:$0xff] }
  0x22   : > { %486 = vst [vmem:[%s762_s26 + $0x60] sm:$0xff] %v422_v11  ;;  %v369_v40 = vadd.f32 %v739_v1, %v301_v25  ;;  %v305_v41 = vmul.f32 %v729_v0, %v237_v30  ;;  %v430_v43 = vmax.f32 %v366_v28, 0.0  ;;  %v370_v44 = vadd.f32 %v739_v1, %v302_v29  ;;  %v252_v28 = vld [vmem:[%s734_s21 + $0x150] sm:$0xff] }
  0x23   : > { %487 = vst [vmem:[%s762_s26 + $0x68] sm:$0xff] %v423_v15  ;;  %v306_v45 = vmul.f32 %v729_v0, %v238_v34  ;;  %v431_v47 = vmax.f32 %v367_v32, 0.0  ;;  %v371_v48 = vadd.f32 %v739_v1, %v303_v33  ;;  %v307_v49 = vmul.f32 %v729_v0, %v239_v38  ;;  %v253_v32 = vld [vmem:[%s734_s21 + $0x158] sm:$0xff] }
  0x24   : > { %488 = vst [vmem:[%s762_s26 + $0x70] sm:$0xff] %v424_v19  ;;  %v432_v51 = vmax.f32 %v368_v36, 0.0  ;;  %v372_v52 = vadd.f32 %v739_v1, %v304_v37  ;;  %v308_v53 = vmul.f32 %v729_v0, %v240_v42  ;;  %v433_v55 = vmax.f32 %v369_v40, 0.0  ;;  %v254_v36 = vld [vmem:[%s734_s21 + $0x160] sm:$0xff]  ;;  %v255_v40 = vld [vmem:[%s734_s21 + $0x168] sm:$0xff] }
  0x25   : > { %489 = vst [vmem:[%s762_s26 + $0x78] sm:$0xff] %v425_v23  ;;  %v373_v56 = vadd.f32 %v739_v1, %v305_v41  ;;  %v309_v57 = vmul.f32 %v729_v0, %v241_v46  ;;  %v434_v59 = vmax.f32 %v370_v44, 0.0  ;;  %v374_v60 = vadd.f32 %v739_v1, %v306_v45  ;;  %v256_v44 = vld [vmem:[%s734_s21 + $0x170] sm:$0xff] }
  0x26   : > { %490 = vst [vmem:[%s762_s26 + $0x80] sm:$0xff] %v426_v27  ;;  %v310_v61 = vmul.f32 %v729_v0, %v242_v50  ;;  %v435_v63 = vmax.f32 %v371_v48, 0.0  ;;  %v375_v2 = vadd.f32 %v739_v1, %v307_v49  ;;  %v311_v3 = vmul.f32 %v729_v0, %v243_v54  ;;  %v257_v48 = vld [vmem:[%s734_s21 + $0x178] sm:$0xff] }
  0x27   : > { %491 = vst [vmem:[%s762_s26 + $0x88] sm:$0xff] %v427_v31  ;;  %v436_v5 = vmax.f32 %v372_v52, 0.0  ;;  %v376_v6 = vadd.f32 %v739_v1, %v308_v53  ;;  %v312_v7 = vmul.f32 %v729_v0, %v244_v58  ;;  %v437_v9 = vmax.f32 %v373_v56, 0.0  ;;  %v258_v52 = vld [vmem:[%s734_s21 + $0x180] sm:$0xff]  ;;  %v259_v56 = vld [vmem:[%s734_s21 + $0x188] sm:$0xff] }
  0x28   : > { %492 = vst [vmem:[%s762_s26 + $0x90] sm:$0xff] %v428_v35  ;;  %v377_v10 = vadd.f32 %v739_v1, %v309_v57  ;;  %v313_v11 = vmul.f32 %v729_v0, %v245_v62  ;;  %v438_v13 = vmax.f32 %v374_v60, 0.0  ;;  %v378_v14 = vadd.f32 %v739_v1, %v310_v61  ;;  %v260_v60 = vld [vmem:[%s734_s21 + $0x190] sm:$0xff] }
  0x29   : > { %493 = vst [vmem:[%s762_s26 + $0x98] sm:$0xff] %v429_v39  ;;  %v314_v15 = vmul.f32 %v729_v0, %v246_v4  ;;  %v439_v17 = vmax.f32 %v375_v2, 0.0  ;;  %v379_v18 = vadd.f32 %v739_v1, %v311_v3  ;;  %v315_v19 = vmul.f32 %v729_v0, %v247_v8  ;;  %v261_v2 = vld [vmem:[%s734_s21 + $0x198] sm:$0xff] }
  0x2a   : > { %494 = vst [vmem:[%s762_s26 + $0xa0] sm:$0xff] %v430_v43  ;;  %v440_v21 = vmax.f32 %v376_v6, 0.0  ;;  %v380_v22 = vadd.f32 %v739_v1, %v312_v7  ;;  %v316_v23 = vmul.f32 %v729_v0, %v248_v12  ;;  %v441_v25 = vmax.f32 %v377_v10, 0.0  ;;  %v273_v3 = vld [vmem:[%s734_s21 + $0x1f8] sm:$0xff]  ;;  %v262_v7 = vld [vmem:[%s734_s21 + $0x1a0] sm:$0xff] }
  0x2b   : > { %495 = vst [vmem:[%s762_s26 + $0xa8] sm:$0xff] %v431_v47  ;;  %v381_v26 = vadd.f32 %v739_v1, %v313_v11  ;;  %v317_v27 = vmul.f32 %v729_v0, %v249_v16  ;;  %v442_v29 = vmax.f32 %v378_v14, 0.0  ;;  %v382_v30 = vadd.f32 %v739_v1, %v314_v15  ;;  %v263_v11 = vld [vmem:[%s734_s21 + $0x1a8] sm:$0xff]  ;;  %v264_v15 = vld [vmem:[%s734_s21 + $0x1b0] sm:$0xff] }
  0x2c   : > { %496 = vst [vmem:[%s762_s26 + $0xb0] sm:$0xff] %v432_v51  ;;  %v318_v31 = vmul.f32 %v729_v0, %v250_v20  ;;  %v443_v33 = vmax.f32 %v379_v18, 0.0  ;;  %v383_v34 = vadd.f32 %v739_v1, %v315_v19  ;;  %v319_v35 = vmul.f32 %v729_v0, %v251_v24  ;;  %v265_v20 = vld [vmem:[%s734_s21 + $0x1b8] sm:$0xff]  ;;  %v266_v24 = vld [vmem:[%s734_s21 + $0x1c0] sm:$0xff] }
  0x2d   : > { %497 = vst [vmem:[%s762_s26 + $0xb8] sm:$0xff] %v433_v55  ;;  %v444_v37 = vmax.f32 %v380_v22, 0.0  ;;  %v384_v38 = vadd.f32 %v739_v1, %v316_v23  ;;  %v320_v39 = vmul.f32 %v729_v0, %v252_v28  ;;  %v445_v41 = vmax.f32 %v381_v26, 0.0 }
  0x2e   : > { %498 = vst [vmem:[%s762_s26 + $0xc0] sm:$0xff] %v434_v59  ;;  %v385_v42 = vadd.f32 %v739_v1, %v317_v27  ;;  %v321_v43 = vmul.f32 %v729_v0, %v253_v32  ;;  %v446_v45 = vmax.f32 %v382_v30, 0.0  ;;  %v386_v46 = vadd.f32 %v739_v1, %v318_v31 }
  0x2f   : > { %499 = vst [vmem:[%s762_s26 + $0xc8] sm:$0xff] %v435_v63  ;;  %v322_v47 = vmul.f32 %v729_v0, %v254_v36  ;;  %v447_v49 = vmax.f32 %v383_v34, 0.0  ;;  %v387_v50 = vadd.f32 %v739_v1, %v319_v35  ;;  %v323_v51 = vmul.f32 %v729_v0, %v255_v40 }
  0x30   : > { %500 = vst [vmem:[%s762_s26 + $0xd0] sm:$0xff] %v436_v5  ;;  %v448_v53 = vmax.f32 %v384_v38, 0.0  ;;  %v388_v54 = vadd.f32 %v739_v1, %v320_v39  ;;  %v324_v55 = vmul.f32 %v729_v0, %v256_v44  ;;  %v449_v57 = vmax.f32 %v385_v42, 0.0 }
  0x31   : > { %501 = vst [vmem:[%s762_s26 + $0xd8] sm:$0xff] %v437_v9  ;;  %v389_v58 = vadd.f32 %v739_v1, %v321_v43  ;;  %v325_v59 = vmul.f32 %v729_v0, %v257_v48  ;;  %v450_v61 = vmax.f32 %v386_v46, 0.0  ;;  %v390_v62 = vadd.f32 %v739_v1, %v322_v47 }
  0x32   : > { %502 = vst [vmem:[%s762_s26 + $0xe0] sm:$0xff] %v438_v13  ;;  %v326_v63 = vmul.f32 %v729_v0, %v258_v52  ;;  %v451_v4 = vmax.f32 %v387_v50, 0.0  ;;  %v391_v5 = vadd.f32 %v739_v1, %v323_v51  ;;  %v327_v6 = vmul.f32 %v729_v0, %v259_v56 }
  0x33   : > { %503 = vst [vmem:[%s762_s26 + $0xe8] sm:$0xff] %v439_v17  ;;  %v452_v8 = vmax.f32 %v388_v54, 0.0  ;;  %v392_v9 = vadd.f32 %v739_v1, %v324_v55  ;;  %v328_v10 = vmul.f32 %v729_v0, %v260_v60  ;;  %v453_v12 = vmax.f32 %v389_v58, 0.0 }
  0x34   : > { %504 = vst [vmem:[%s762_s26 + $0xf0] sm:$0xff] %v440_v21  ;;  %v393_v13 = vadd.f32 %v739_v1, %v325_v59  ;;  %v329_v14 = vmul.f32 %v729_v0, %v261_v2  ;;  %v341_v16 = vmul.f32 %v729_v0, %v273_v3  ;;  %v454_v17 = vmax.f32 %v390_v62, 0.0 }
  0x35   : > { %505 = vst [vmem:[%s762_s26 + $0xf8] sm:$0xff] %v441_v25  ;;  %v394_v18 = vadd.f32 %v739_v1, %v326_v63  ;;  %v330_v19 = vmul.f32 %v729_v0, %v262_v7  ;;  %v455_v21 = vmax.f32 %v391_v5, 0.0  ;;  %v395_v22 = vadd.f32 %v739_v1, %v327_v6 }
  0x36   : > { %506 = vst [vmem:[%s762_s26 + $0x100] sm:$0xff] %v442_v29  ;;  %v331_v23 = vmul.f32 %v729_v0, %v263_v11  ;;  %v952_v25 = vadd.f32 %v739_v1, %v341_v16  ;;  %v456_v26 = vmax.f32 %v392_v9, 0.0  ;;  %v396_v27 = vadd.f32 %v739_v1, %v328_v10  ;;  %v267_v29 = vld [vmem:[%s734_s21 + $0x1c8] sm:$0xff] }
  0x37   : > { %507 = vst [vmem:[%s762_s26 + $0x108] sm:$0xff] %v443_v33  ;;  %v332_v28 = vmul.f32 %v729_v0, %v264_v15  ;;  %v457_v30 = vmax.f32 %v393_v13, 0.0  ;;  %v397_v31 = vadd.f32 %v739_v1, %v329_v14  ;;  %v333_v32 = vmul.f32 %v729_v0, %v265_v20  ;;  %v268_v33 = vld [vmem:[%s734_s21 + $0x1d0] sm:$0xff] }
  0x38   : > { %508 = vst [vmem:[%s762_s26 + $0x110] sm:$0xff] %v444_v37  ;;  %v458_v34 = vmax.f32 %v394_v18, 0.0  ;;  %v398_v35 = vadd.f32 %v739_v1, %v330_v19  ;;  %v334_v36 = vmul.f32 %v729_v0, %v266_v24  ;;  %v269_v37 = vld [vmem:[%s734_s21 + $0x1d8] sm:$0xff]  ;;  %v459_v38 = vmax.f32 %v395_v22, 0.0 }
  0x39   : > { %509 = vst [vmem:[%s762_s26 + $0x118] sm:$0xff] %v445_v41  ;;  %v399_v39 = vadd.f32 %v739_v1, %v331_v23  ;;  %v335_v40 = vmul.f32 %v729_v0, %v267_v29  ;;  %v270_v41 = vld [vmem:[%s734_s21 + $0x1e0] sm:$0xff]  ;;  %v460_v42 = vmax.f32 %v396_v27, 0.0  ;;  %v400_v43 = vadd.f32 %v739_v1, %v332_v28 }
  0x3a   : > { %510 = vst [vmem:[%s762_s26 + $0x120] sm:$0xff] %v446_v45  ;;  %v336_v44 = vmul.f32 %v729_v0, %v268_v33  ;;  %v271_v45 = vld [vmem:[%s734_s21 + $0x1e8] sm:$0xff]  ;;  %v461_v46 = vmax.f32 %v397_v31, 0.0  ;;  %v401_v47 = vadd.f32 %v739_v1, %v333_v32  ;;  %v337_v48 = vmul.f32 %v729_v0, %v269_v37 }
  0x3b   : > { %511 = vst [vmem:[%s762_s26 + $0x128] sm:$0xff] %v447_v49  ;;  %v272_v49 = vld [vmem:[%s734_s21 + $0x1f0] sm:$0xff]  ;;  %v462_v50 = vmax.f32 %v398_v35, 0.0  ;;  %v402_v51 = vadd.f32 %v739_v1, %v334_v36  ;;  %v338_v52 = vmul.f32 %v729_v0, %v270_v41  ;;  %v403_v54 = vadd.f32 %v739_v1, %v335_v40 }
  0x3c   : > { %512 = vst [vmem:[%s762_s26 + $0x130] sm:$0xff] %v448_v53  ;;  %v463_v53 = vmax.f32 %v399_v39, 0.0  ;;  %v339_v55 = vmul.f32 %v729_v0, %v271_v45  ;;  %v464_v56 = vmax.f32 %v400_v43, 0.0  ;;  %v340_v58 = vmul.f32 %v729_v0, %v272_v49 }
  0x3d   : > { %513 = vst [vmem:[%s762_s26 + $0x138] sm:$0xff] %v449_v57  ;;  %v404_v57 = vadd.f32 %v739_v1, %v336_v44  ;;  %v465_v59 = vmax.f32 %v401_v47, 0.0  ;;  %v405_v60 = vadd.f32 %v739_v1, %v337_v48  ;;  %v406_v62 = vadd.f32 %v739_v1, %v338_v52 }
  0x3e   : > { %514 = vst [vmem:[%s762_s26 + $0x140] sm:$0xff] %v450_v61  ;;  %v466_v61 = vmax.f32 %v402_v51, 0.0  ;;  %v467_v63 = vmax.f32 %v403_v54, 0.0  ;;  %v407_v2 = vadd.f32 %v739_v1, %v339_v55  ;;  %v408_v3 = vadd.f32 %v739_v1, %v340_v58 }
  0x3f   : > { %515 = vst [vmem:[%s762_s26 + $0x148] sm:$0xff] %v451_v4  ;;  %v468_v0 = vmax.f32 %v404_v57, 0.0  ;;  %v469_v4 = vmax.f32 %v405_v60, 0.0  ;;  %v470_v5 = vmax.f32 %v406_v62, 0.0 }
  0x40   : > { %516 = vst [vmem:[%s762_s26 + $0x150] sm:$0xff] %v452_v8  ;;  %v471_v6 = vmax.f32 %v407_v2, 0.0  ;;  %v472_v7 = vmax.f32 %v408_v3, 0.0  ;;  %v473_v8 = vmax.f32 %v952_v25, 0.0 }
  0x41   : > { %517 = vst [vmem:[%s762_s26 + $0x158] sm:$0xff] %v453_v12 }
  0x42   : > { %518 = vst [vmem:[%s762_s26 + $0x160] sm:$0xff] %v454_v17 }
  0x43   : > { %519 = vst [vmem:[%s762_s26 + $0x168] sm:$0xff] %v455_v21 }
  0x44   : > { %520 = vst [vmem:[%s762_s26 + $0x170] sm:$0xff] %v456_v26 }
  0x45   : > { %521 = vst [vmem:[%s762_s26 + $0x178] sm:$0xff] %v457_v30 }
  0x46   : > { %522 = vst [vmem:[%s762_s26 + $0x180] sm:$0xff] %v458_v34 }
  0x47   : > { %523 = vst [vmem:[%s762_s26 + $0x188] sm:$0xff] %v459_v38 }
  0x48   : > { %524 = vst [vmem:[%s762_s26 + $0x190] sm:$0xff] %v460_v42 }
  0x49   : > { %525 = vst [vmem:[%s762_s26 + $0x198] sm:$0xff] %v461_v46 }
  0x4a   : > { %526 = vst [vmem:[%s762_s26 + $0x1a0] sm:$0xff] %v462_v50 }
  0x4b   : > { %527 = vst [vmem:[%s762_s26 + $0x1a8] sm:$0xff] %v463_v53 }
  0x4c   : > { %528 = vst [vmem:[%s762_s26 + $0x1b0] sm:$0xff] %v464_v56 }
  0x4d   : > { %529 = vst [vmem:[%s762_s26 + $0x1b8] sm:$0xff] %v465_v59 }
  0x4e   : > { %530 = vst [vmem:[%s762_s26 + $0x1c0] sm:$0xff] %v466_v61 }
  0x4f   : > { %531 = vst [vmem:[%s762_s26 + $0x1c8] sm:$0xff] %v467_v63 }
  0x50   : > { %532 = vst [vmem:[%s762_s26 + $0x1d0] sm:$0xff] %v468_v0 }
  0x51   : > { %533 = vst [vmem:[%s762_s26 + $0x1d8] sm:$0xff] %v469_v4 }
  0x52   : > { %534 = vst [vmem:[%s762_s26 + $0x1e0] sm:$0xff] %v470_v5 }
  0x53   : > { %535 = vst [vmem:[%s762_s26 + $0x1e8] sm:$0xff] %v471_v6 }
  0x54   : > { %536 = vst [vmem:[%s762_s26 + $0x1f0] sm:$0xff] %v472_v7 }
  0x55   : > { %537 = vst [vmem:[%s762_s26 + $0x1f8] sm:$0xff] %v473_v8 }
  0x56 PF: > { %s13_s14 = sadd.s32 1, %s686_s14   ;;  %s1018_s12 = smov %s682_s13 }
  0x57   : > { %p10_p5 = scmp.ge.s32.totalorder %s13_s14, 6   ;;  %s1019_s13 = smov %s1021_s15 }
  0x59   :  { %12 = sbr.rel (!%p10_p5) target bundleno = 2 (0x2), region = 62 }

// kernel: generator_forward.15
= control target key start
LH: loop header
LB: loop body
LE: loop exit
PB: predicated region body
PF: predicated region fallthrough
CT: control target
= control target key end

     0   :  { %s1449_s15 = smov 0   ;;  %s1451_s16 = smov 0   ;;  %s1901_s0 = inlined_call_operand.vmem [shape: bf16[4,512,128], index: 0, kind: input, shape index: {}]   ;;  %s1902_s1 = inlined_call_operand.vmem [shape: bf16[4,128,128], index: 1, kind: input, shape index: {}]   ;;  %s1903_s2 = inlined_call_operand.vmem [shape: f32[4,512,128], index: 2, kind: output, shape index: {0}]   ;;  %s1904_s3 = inlined_call_operand.vmem [shape: f32[1,128], index: 3, kind: output, shape index: {1}]   ;;  %s1905_s4 = inlined_call_operand.vmem [shape: f32[1,128], index: 4, kind: output, shape index: {2}]  }
   0x1   :  { %s1453_s17 = smov 0  }
   0x2 LB: > { %s27_s18 = sadd.s32 1, %s1417_s16  ;;  %p1136_p0 = scmp.ge.s32.totalorder %s1421_s17, 1  ;;  %s1421_s17 = sphi %s1453_s17, %s15_s17   ;;  %s1417_s16 = sphi %s1451_s16, %s1907_s16   ;;  %s1413_s15 = sphi %s1449_s15, %s1906_s15  }
   0x3   : > { %p29_p1 = scmp.ge.s32.totalorder %s27_s18, 4  ;;  %p188_p2 = scmp.lt.s32.totalorder %s1421_s17, 5 }
   0x5   : > { %s1909_s18 = smov (%p29_p1, %s27_s18), 0  ;;  %p189_p3 = pnand %p1136_p0, %p188_p2 }
   0x6   : > { %p228_p4 = scmp.lt.s32.totalorder (!%p189_p3), %s1413_s15, 3  ;;  %p252_p5 = scmp.eq.s32.totalorder (!%p189_p3), %s1413_s15, 0 }
   0x7   : > { %192 = sbr.rel (%p189_p3) target bundleno = 410 (0x19a), region = 28 }
   0xc   : > { %s1911_s15 = smov (!%p228_p4, %s1413_s15), 3  ;;  %257 = sbr.rel (!%p252_p5) target bundleno = 17 (0x11), region = 32  ;;  %v1423_v0 = vmov (%p252_p5), 0.0  }
   0xd   : > { %s1306_s19 = sshll.u32 %s1911_s15, 8  ;;  %s1307_s20 = sshll.u32 %s1911_s15, 6  ;;  %258 = vst [vmem:[%s1904_s3] sm:$0x1] (%p252_p5), %v1423_v0 }
   0xe   : > { %s1470_s23 = scalar_lea.vmem %s1901_s0, %s1306_s19  ;;  %s1475_s26 = scalar_lea.vmem %s1902_s1, %s1307_s20  ;;  %259 = vst [vmem:[%s1905_s4] sm:$0x1] (%p252_p5), %v1423_v0 }
   0xf   : > { %s1308_s27 = sshll.u32 %s1911_s15, 9 }
  0x10   : > { %s1480_s30 = scalar_lea.vmem %s1903_s2, %s1308_s27 }
  0x11 PF: > { %v1349_v1 = vld [vmem:[%s1475_s26 + $0x38] sm:$0xff]  ;;  %v1348_v2 = vld [vmem:[%s1475_s26 + $0x30] sm:$0xff]  ;;  %v1347_v3 = vld [vmem:[%s1475_s26 + $0x28] sm:$0xff] }
  0x12   : > { %580 = vmatpush.bf16.msra.mxu0 %v1349_v1  ;;  %1350 = vmatpush.bf16.msra.mxu1 %v1349_v1  ;;  %v1346_v4 = vld [vmem:[%s1475_s26 + $0x20] sm:$0xff]  ;;  %v1345_v5 = vld [vmem:[%s1475_s26 + $0x18] sm:$0xff]  ;;  %v1344_v6 = vld [vmem:[%s1475_s26 + $0x10] sm:$0xff] }
  0x13   : > { %1351 = vmatpush.bf16.msra.mxu2 %v1349_v1  ;;  %1352 = vmatpush.bf16.msra.mxu3 %v1349_v1  ;;  %v1343_v7 = vld [vmem:[%s1475_s26 + $0x8] sm:$0xff]  ;;  %v1342_v8 = vld [vmem:[%s1475_s26] sm:$0xff]  ;;  %v1312_v14 = vld [vmem:[%s1470_s23 + $0x10] sm:$0xff] }
  0x14   : > { %v1310_v9 = vld [vmem:[%s1470_s23] sm:$0xff]  ;;  %v1311_v11 = vld [vmem:[%s1470_s23 + $0x8] sm:$0xff]  ;;  %v1320_v15 = vld [vmem:[%s1470_s23 + $0x50] sm:$0xff] }
  0x15   : > { %v1318_v10 = vld [vmem:[%s1470_s23 + $0x40] sm:$0xff]  ;;  %v1319_v12 = vld [vmem:[%s1470_s23 + $0x48] sm:$0xff]  ;;  %v1313_v17 = vld [vmem:[%s1470_s23 + $0x18] sm:$0xff] }
  0x16   : > { %581 = vmatpush.bf16.msra.mxu0 %v1348_v2  ;;  %1353 = vmatpush.bf16.msra.mxu1 %v1348_v2  ;;  %v1326_v13 = vld [vmem:[%s1470_s23 + $0x80] sm:$0xff]  ;;  %v1327_v16 = vld [vmem:[%s1470_s23 + $0x88] sm:$0xff]  ;;  %v1321_v18 = vld [vmem:[%s1470_s23 + $0x58] sm:$0xff] }
  0x17   : > { %1354 = vmatpush.bf16.msra.mxu2 %v1348_v2  ;;  %1355 = vmatpush.bf16.msra.mxu3 %v1348_v2  ;;  %v1328_v19 = vld [vmem:[%s1470_s23 + $0x90] sm:$0xff]  ;;  %v1334_v20 = vld [vmem:[%s1470_s23 + $0xc0] sm:$0xff]  ;;  %v1329_v23 = vld [vmem:[%s1470_s23 + $0x98] sm:$0xff] }
  0x18   : > { %v1314_v21 = vld [vmem:[%s1470_s23 + $0x20] sm:$0xff]  ;;  %v1335_v24 = vld [vmem:[%s1470_s23 + $0xc8] sm:$0xff]  ;;  %v1336_v28 = vld [vmem:[%s1470_s23 + $0xd0] sm:$0xff] }
  0x19   : > { %v1322_v22 = vld [vmem:[%s1470_s23 + $0x60] sm:$0xff]  ;;  %v1315_v25 = vld [vmem:[%s1470_s23 + $0x28] sm:$0xff]  ;;  %v1316_v29 = vld [vmem:[%s1470_s23 + $0x30] sm:$0xff] }
  0x1a   : > { %582 = vmatpush.bf16.msra.mxu0 %v1347_v3  ;;  %1356 = vmatpush.bf16.msra.mxu1 %v1347_v3  ;;  %v1323_v26 = vld [vmem:[%s1470_s23 + $0x68] sm:$0xff]  ;;  %v1330_v27 = vld [vmem:[%s1470_s23 + $0xa0] sm:$0xff]  ;;  %v1324_v30 = vld [vmem:[%s1470_s23 + $0x70] sm:$0xff] }
  0x1b   : > { %1357 = vmatpush.bf16.msra.mxu2 %v1347_v3  ;;  %1358 = vmatpush.bf16.msra.mxu3 %v1347_v3  ;;  %v1331_v31 = vld [vmem:[%s1470_s23 + $0xa8] sm:$0xff]  ;;  %v1337_v32 = vld [vmem:[%s1470_s23 + $0xd8] sm:$0xff]  ;;  %v1332_v35 = vld [vmem:[%s1470_s23 + $0xb0] sm:$0xff] }
  0x1c   : > { %v1317_v33 = vld [vmem:[%s1470_s23 + $0x38] sm:$0xff]  ;;  %v1338_v36 = vld [vmem:[%s1470_s23 + $0xe0] sm:$0xff]  ;;  %v1339_v40 = vld [vmem:[%s1470_s23 + $0xe8] sm:$0xff] }
  0x1d   : > { %v1325_v34 = vld [vmem:[%s1470_s23 + $0x78] sm:$0xff]  ;;  %v1340_v52 = vld [vmem:[%s1470_s23 + $0xf0] sm:$0xff] }
  0x1e   : > { %583 = vmatpush.bf16.msra.mxu0 %v1346_v4  ;;  %1359 = vmatpush.bf16.msra.mxu1 %v1346_v4  ;;  %v1333_v39 = vld [vmem:[%s1470_s23 + $0xb8] sm:$0xff] }
  0x1f   : > { %1360 = vmatpush.bf16.msra.mxu2 %v1346_v4  ;;  %1361 = vmatpush.bf16.msra.mxu3 %v1346_v4  ;;  %v1341_v1 = vld [vmem:[%s1470_s23 + $0xf8] sm:$0xff] }
  0x22   : > { %584 = vmatpush.bf16.msra.mxu0 %v1345_v5  ;;  %1362 = vmatpush.bf16.msra.mxu1 %v1345_v5 }
  0x23   : > { %1363 = vmatpush.bf16.msra.mxu2 %v1345_v5  ;;  %1364 = vmatpush.bf16.msra.mxu3 %v1345_v5 }
  0x26   : > { %585 = vmatpush.bf16.msra.mxu0 %v1344_v6  ;;  %1365 = vmatpush.bf16.msra.mxu1 %v1344_v6 }
  0x27   : > { %1366 = vmatpush.bf16.msra.mxu2 %v1344_v6  ;;  %1367 = vmatpush.bf16.msra.mxu3 %v1344_v6 }
  0x2a   : > { %586 = vmatpush.bf16.msra.mxu0 %v1343_v7  ;;  %1368 = vmatpush.bf16.msra.mxu1 %v1343_v7 }
  0x2b   : > { %1369 = vmatpush.bf16.msra.mxu2 %v1343_v7  ;;  %1370 = vmatpush.bf16.msra.mxu3 %v1343_v7 }
  0x2e   : > { %587 = vmatpush.bf16.msra.mxu0 %v1342_v8  ;;  %1371 = vmatpush.bf16.msra.mxu1 %v1342_v8 }
  0x2f   : > { %1372 = vmatpush.bf16.msra.mxu2 %v1342_v8  ;;  %1373 = vmatpush.bf16.msra.mxu3 %v1342_v8 }
  0x31   : > { %588 = vmatmul.bf16.vlgmr.msra.gmra.mxu0 %v1310_v9  ;;  %628 = vmatmul.bf16.vlgmr.msra.gmra.mxu1 %v1318_v10 }
  0x32   : > { %668 = vmatmul.bf16.vlgmr.msra.gmra.mxu2 %v1326_v13  ;;  %708 = vmatmul.bf16.vlgmr.msra.gmra.mxu3 %v1334_v20 }
  0x41   : > { %593 = vmatmul.bf16.gmra.mxu0 %v1311_v11  ;;  %633 = vmatmul.bf16.gmra.mxu1 %v1319_v12 }
  0x42   : > { %673 = vmatmul.bf16.gmra.mxu2 %v1327_v16  ;;  %713 = vmatmul.bf16.gmra.mxu3 %v1335_v24 }
  0x51   : > { %598 = vmatmul.bf16.gmra.mxu0 %v1312_v14  ;;  %638 = vmatmul.bf16.gmra.mxu1 %v1320_v15 }
  0x52   : > { %678 = vmatmul.bf16.gmra.mxu2 %v1328_v19  ;;  %718 = vmatmul.bf16.gmra.mxu3 %v1336_v28 }
  0x61   : > { %603 = vmatmul.bf16.gmra.mxu0 %v1313_v17  ;;  %643 = vmatmul.bf16.gmra.mxu1 %v1321_v18 }
  0x62   : > { %683 = vmatmul.bf16.gmra.mxu2 %v1329_v23  ;;  %723 = vmatmul.bf16.gmra.mxu3 %v1337_v32 }
  0x71   : > { %608 = vmatmul.bf16.gmra.mxu0 %v1314_v21  ;;  %648 = vmatmul.bf16.gmra.mxu1 %v1322_v22 }
  0x72   : > { %688 = vmatmul.bf16.gmra.mxu2 %v1330_v27  ;;  %728 = vmatmul.bf16.gmra.mxu3 %v1338_v36 }
  0x81   : > { %613 = vmatmul.bf16.gmra.mxu0 %v1315_v25  ;;  %653 = vmatmul.bf16.gmra.mxu1 %v1323_v26 }
  0x82   : > { %693 = vmatmul.bf16.gmra.mxu2 %v1331_v31  ;;  %733 = vmatmul.bf16.gmra.mxu3 %v1339_v40 }
  0x91   : > { %618 = vmatmul.bf16.gmra.mxu0 %v1316_v29  ;;  %658 = vmatmul.bf16.gmra.mxu1 %v1324_v30 }
  0x92   : > { %698 = vmatmul.bf16.gmra.mxu2 %v1332_v35  ;;  %738 = vmatmul.bf16.gmra.mxu3 %v1340_v52 }
  0xa1   : > { %623 = vmatmul.bf16.gmra.mxu0 %v1317_v33  ;;  %663 = vmatmul.bf16.gmra.mxu1 %v1325_v34 }
  0xa2   : > { %703 = vmatmul.bf16.gmra.mxu2 %v1333_v39  ;;  %743 = vmatmul.bf16.gmra.mxu3 %v1341_v1 }
  0xae   : > { %v589_v37 = vpop.f32.mrf.mxu0  ;;  %v1524_v38 = vpop.f32.mrf.mxu1 }
  0xaf   : > { %749 = vst [vmem:[%s1480_s30] sm:$0xff] %v589_v37  ;;  %v886_v43 = vmul.f32 %v589_v37, %v589_v37 }
  0xb0   : > { %765 = vst [vmem:[%s1480_s30 + $0x80] sm:$0xff] %v1524_v38 }
  0xb5   : > { %v1545_v57 = vpop.f32.mrf.mxu2  ;;  %v1588_v11 = vpop.f32.mrf.mxu3 }
  0xb6   : > { %v591_v41 = vpop.f32.mrf.mxu0  ;;  %v1531_v42 = vpop.f32.mrf.mxu1  ;;  %781 = vst [vmem:[%s1480_s30 + $0x100] sm:$0xff] %v1545_v57 }
  0xb7   : > { %750 = vst [vmem:[%s1480_s30 + $0x8] sm:$0xff] %v591_v41  ;;  %v814_v44 = vadd.f32 %v591_v41, %v589_v37  ;;  %v887_v45 = vmul.f32 %v591_v41, %v591_v41 }
  0xb8   : > { %766 = vst [vmem:[%s1480_s30 + $0x88] sm:$0xff] %v1531_v42 }
  0xb9   : > { %v950_v46 = vadd.f32 %v887_v45, %v886_v43  ;;  %797 = vst [vmem:[%s1480_s30 + $0x180] sm:$0xff] %v1588_v11 }
  0xbd   : > { %v1556_v63 = vpop.f32.mrf.mxu2  ;;  %v1601_v15 = vpop.f32.mrf.mxu3 }
  0xbe   : > { %v594_v47 = vpop.f32.mrf.mxu0  ;;  %v1536_v48 = vpop.f32.mrf.mxu1  ;;  %782 = vst [vmem:[%s1480_s30 + $0x108] sm:$0xff] %v1556_v63 }
  0xbf   : > { %751 = vst [vmem:[%s1480_s30 + $0x10] sm:$0xff] %v594_v47  ;;  %v815_v49 = vadd.f32 %v814_v44, %v594_v47  ;;  %v888_v50 = vmul.f32 %v594_v47, %v594_v47 }
  0xc0   : > { %767 = vst [vmem:[%s1480_s30 + $0x90] sm:$0xff] %v1536_v48 }
  0xc1   : > { %v951_v51 = vadd.f32 %v950_v46, %v888_v50  ;;  %798 = vst [vmem:[%s1480_s30 + $0x188] sm:$0xff] %v1601_v15 }
  0xc5   : > { %v1568_v4 = vpop.f32.mrf.mxu2  ;;  %v1614_v19 = vpop.f32.mrf.mxu3 }
  0xc6   : > { %v596_v53 = vpop.f32.mrf.mxu0  ;;  %v1542_v54 = vpop.f32.mrf.mxu1  ;;  %783 = vst [vmem:[%s1480_s30 + $0x110] sm:$0xff] %v1568_v4 }
  0xc7   : > { %752 = vst [vmem:[%s1480_s30 + $0x18] sm:$0xff] %v596_v53  ;;  %v816_v55 = vadd.f32 %v815_v49, %v596_v53  ;;  %v889_v56 = vmul.f32 %v596_v53, %v596_v53 }
  0xc8   : > { %768 = vst [vmem:[%s1480_s30 + $0x98] sm:$0xff] %v1542_v54 }
  0xc9   : > { %v952_v58 = vadd.f32 %v951_v51, %v889_v56  ;;  %799 = vst [vmem:[%s1480_s30 + $0x190] sm:$0xff] %v1614_v19 }
  0xcd   : > { %v1577_v7 = vpop.f32.mrf.mxu2  ;;  %v1627_v23 = vpop.f32.mrf.mxu3 }
  0xce   : > { %v599_v59 = vpop.f32.mrf.mxu0  ;;  %v1551_v60 = vpop.f32.mrf.mxu1  ;;  %784 = vst [vmem:[%s1480_s30 + $0x118] sm:$0xff] %v1577_v7 }
  0xcf   : > { %753 = vst [vmem:[%s1480_s30 + $0x20] sm:$0xff] %v599_v59  ;;  %v1554_v61 = vadd.f32 %v816_v55, %v599_v59  ;;  %v890_v62 = vmul.f32 %v599_v59, %v599_v59 }
  0xd0   : > { %769 = vst [vmem:[%s1480_s30 + $0xa0] sm:$0xff] %v1551_v60 }
  0xd1   : > { %v1560_v0 = vadd.f32 %v952_v58, %v890_v62  ;;  %800 = vst [vmem:[%s1480_s30 + $0x198] sm:$0xff] %v1627_v23 }
  0xd5   : > { %v1586_v10 = vpop.f32.mrf.mxu2  ;;  %v1640_v27 = vpop.f32.mrf.mxu3 }
  0xd6   : > { %v601_v2 = vpop.f32.mrf.mxu0  ;;  %v1565_v3 = vpop.f32.mrf.mxu1  ;;  %785 = vst [vmem:[%s1480_s30 + $0x120] sm:$0xff] %v1586_v10 }
  0xd7   : > { %754 = vst [vmem:[%s1480_s30 + $0x28] sm:$0xff] %v601_v2  ;;  %v891_v32 = vmul.f32 %v601_v2, %v601_v2  ;;  %v818_v33 = vadd.f32 %v1554_v61, %v601_v2 }
  0xd8   : > { %770 = vst [vmem:[%s1480_s30 + $0xa8] sm:$0xff] %v1565_v3 }
  0xd9   : > { %801 = vst [vmem:[%s1480_s30 + $0x1a0] sm:$0xff] %v1640_v27  ;;  %v954_v35 = vadd.f32 %v1560_v0, %v891_v32 }
  0xdd   : > { %v1599_v14 = vpop.f32.mrf.mxu2  ;;  %v1653_v31 = vpop.f32.mrf.mxu3 }
  0xde   : > { %v604_v5 = vpop.f32.mrf.mxu0  ;;  %v1574_v6 = vpop.f32.mrf.mxu1  ;;  %786 = vst [vmem:[%s1480_s30 + $0x128] sm:$0xff] %v1599_v14 }
  0xdf   : > { %755 = vst [vmem:[%s1480_s30 + $0x30] sm:$0xff] %v604_v5  ;;  %v892_v34 = vmul.f32 %v604_v5, %v604_v5  ;;  %v819_v36 = vadd.f32 %v818_v33, %v604_v5 }
  0xe0   : > { %771 = vst [vmem:[%s1480_s30 + $0xb0] sm:$0xff] %v1574_v6 }
  0xe1   : > { %802 = vst [vmem:[%s1480_s30 + $0x1a8] sm:$0xff] %v1653_v31  ;;  %v955_v41 = vadd.f32 %v954_v35, %v892_v34 }
  0xe5   : > { %v1612_v18 = vpop.f32.mrf.mxu2  ;;  %v1668_v46 = vpop.f32.mrf.mxu3 }
  0xe6   : > { %v606_v8 = vpop.f32.mrf.mxu0  ;;  %v1583_v9 = vpop.f32.mrf.mxu1  ;;  %787 = vst [vmem:[%s1480_s30 + $0x130] sm:$0xff] %v1612_v18 }
  0xe7   : > { %756 = vst [vmem:[%s1480_s30 + $0x38] sm:$0xff] %v606_v8  ;;  %v893_v37 = vmul.f32 %v606_v8, %v606_v8  ;;  %v820_v43 = vadd.f32 %v819_v36, %v606_v8 }
  0xe8   : > { %772 = vst [vmem:[%s1480_s30 + $0xb8] sm:$0xff] %v1583_v9 }
  0xe9   : > { %v956_v47 = vadd.f32 %v955_v41, %v893_v37  ;;  %803 = vst [vmem:[%s1480_s30 + $0x1b0] sm:$0xff] %v1668_v46 }
  0xed   : > { %v1625_v22 = vpop.f32.mrf.mxu2  ;;  %v1681_v5 = vpop.f32.mrf.mxu3 }
  0xee   : > { %v609_v12 = vpop.f32.mrf.mxu0  ;;  %v1596_v13 = vpop.f32.mrf.mxu1  ;;  %788 = vst [vmem:[%s1480_s30 + $0x138] sm:$0xff] %v1625_v22 }
  0xef   : > { %757 = vst [vmem:[%s1480_s30 + $0x40] sm:$0xff] %v609_v12  ;;  %v894_v44 = vmul.f32 %v609_v12, %v609_v12  ;;  %v821_v49 = vadd.f32 %v820_v43, %v609_v12 }
  0xf0   : > { %773 = vst [vmem:[%s1480_s30 + $0xc0] sm:$0xff] %v1596_v13 }
  0xf1   : > { %v957_v51 = vadd.f32 %v956_v47, %v894_v44  ;;  %804 = vst [vmem:[%s1480_s30 + $0x1b8] sm:$0xff] %v1681_v5 }
  0xf5   : > { %v1638_v26 = vpop.f32.mrf.mxu2  ;;  %v1694_v44 = vpop.f32.mrf.mxu3 }
  0xf6   : > { %v611_v16 = vpop.f32.mrf.mxu0  ;;  %v1609_v17 = vpop.f32.mrf.mxu1  ;;  %789 = vst [vmem:[%s1480_s30 + $0x140] sm:$0xff] %v1638_v26 }
  0xf7   : > { %758 = vst [vmem:[%s1480_s30 + $0x48] sm:$0xff] %v611_v16  ;;  %v895_v50 = vmul.f32 %v611_v16, %v611_v16  ;;  %v822_v52 = vadd.f32 %v821_v49, %v611_v16 }
  0xf8   : > { %774 = vst [vmem:[%s1480_s30 + $0xc8] sm:$0xff] %v1609_v17 }
  0xf9   : > { %v958_v55 = vadd.f32 %v957_v51, %v895_v50  ;;  %805 = vst [vmem:[%s1480_s30 + $0x1c0] sm:$0xff] %v1694_v44  ;;  %v903_v50 = vmul.f32 %v1531_v42, %v1531_v42 }
  0xfd   : > { %v1651_v30 = vpop.f32.mrf.mxu2 }
  0xfe   : > { %v614_v20 = vpop.f32.mrf.mxu0  ;;  %v1622_v21 = vpop.f32.mrf.mxu1  ;;  %790 = vst [vmem:[%s1480_s30 + $0x148] sm:$0xff] %v1651_v30 }
  0xff   : > { %759 = vst [vmem:[%s1480_s30 + $0x50] sm:$0xff] %v614_v20  ;;  %v896_v53 = vmul.f32 %v614_v20, %v614_v20  ;;  %v823_v56 = vadd.f32 %v822_v52, %v614_v20 }
 0x100   : > { %775 = vst [vmem:[%s1480_s30 + $0xd0] sm:$0xff] %v1622_v21 }
 0x101   : > { %v959_v62 = vadd.f32 %v958_v55, %v896_v53  ;;  %v904_v53 = vmul.f32 %v1536_v48, %v1536_v48 }
 0x105   : > { %v1666_v45 = vpop.f32.mrf.mxu2 }
 0x106   : > { %v616_v24 = vpop.f32.mrf.mxu0  ;;  %v1635_v25 = vpop.f32.mrf.mxu1  ;;  %791 = vst [vmem:[%s1480_s30 + $0x150] sm:$0xff] %v1666_v45 }
 0x107   : > { %760 = vst [vmem:[%s1480_s30 + $0x58] sm:$0xff] %v616_v24  ;;  %v897_v58 = vmul.f32 %v616_v24, %v616_v24  ;;  %v824_v0 = vadd.f32 %v823_v56, %v616_v24 }
 0x108   : > { %776 = vst [vmem:[%s1480_s30 + $0xd8] sm:$0xff] %v1635_v25 }
 0x109   : > { %v960_v8 = vadd.f32 %v959_v62, %v897_v58 }
 0x10d   : > { %v1679_v2 = vpop.f32.mrf.mxu2 }
 0x10e   : > { %v619_v28 = vpop.f32.mrf.mxu0  ;;  %v1648_v29 = vpop.f32.mrf.mxu1  ;;  %792 = vst [vmem:[%s1480_s30 + $0x158] sm:$0xff] %v1679_v2 }
 0x10f   : > { %761 = vst [vmem:[%s1480_s30 + $0x60] sm:$0xff] %v619_v28  ;;  %v898_v1 = vmul.f32 %v619_v28, %v619_v28  ;;  %v825_v12 = vadd.f32 %v824_v0, %v619_v28  ;;  %v1716_v0 = vpop.f32.mrf.mxu3 }
 0x110   : > { %777 = vst [vmem:[%s1480_s30 + $0xe0] sm:$0xff] %v1648_v29 }
 0x111   : > { %v961_v20 = vadd.f32 %v960_v8, %v898_v1  ;;  %806 = vst [vmem:[%s1480_s30 + $0x1c8] sm:$0xff] %v1716_v0 }
 0x115   : > { %v1692_v43 = vpop.f32.mrf.mxu2 }
 0x116   : > { %v621_v39 = vpop.f32.mrf.mxu0  ;;  %v1663_v40 = vpop.f32.mrf.mxu1  ;;  %793 = vst [vmem:[%s1480_s30 + $0x160] sm:$0xff] %v1692_v43 }
 0x117   : > { %762 = vst [vmem:[%s1480_s30 + $0x68] sm:$0xff] %v621_v39  ;;  %v899_v16 = vmul.f32 %v621_v39, %v621_v39  ;;  %v826_v32 = vadd.f32 %v825_v12, %v621_v39  ;;  %v902_v39 = vmul.f32 %v1524_v38, %v1524_v38 }
 0x118   : > { %778 = vst [vmem:[%s1480_s30 + $0xe8] sm:$0xff] %v1663_v40 }
 0x119   : > { %v962_v33 = vadd.f32 %v961_v20, %v899_v16  ;;  %v908_v16 = vmul.f32 %v1574_v6, %v1574_v6 }
 0x11d   : > { %v1714_v62 = vpop.f32.mrf.mxu2 }
 0x11e   : > { %v624_v59 = vpop.f32.mrf.mxu0  ;;  %v1676_v61 = vpop.f32.mrf.mxu1  ;;  %794 = vst [vmem:[%s1480_s30 + $0x168] sm:$0xff] %v1714_v62 }
 0x11f   : > { %763 = vst [vmem:[%s1480_s30 + $0x70] sm:$0xff] %v624_v59  ;;  %v900_v24 = vmul.f32 %v624_v59, %v624_v59  ;;  %v827_v34 = vadd.f32 %v826_v32, %v624_v59 }
 0x120   : > { %779 = vst [vmem:[%s1480_s30 + $0xf0] sm:$0xff] %v1676_v61 }
 0x121   : > { %v963_v37 = vadd.f32 %v962_v33, %v900_v24  ;;  %v909_v24 = vmul.f32 %v1583_v9, %v1583_v9 }
 0x126   : > { %v626_v35 = vpop.f32.mrf.mxu0  ;;  %v1689_v36 = vpop.f32.mrf.mxu1 }
 0x127   : > { %764 = vst [vmem:[%s1480_s30 + $0x78] sm:$0xff] %v626_v35  ;;  %v828_v41 = vadd.f32 %v827_v34, %v626_v35  ;;  %v901_v28 = vmul.f32 %v626_v35, %v626_v35  ;;  %v1734_v34 = vpop.f32.mrf.mxu2  ;;  %v1736_v35 = vpop.f32.mrf.mxu3 }
 0x128   : > { %780 = vst [vmem:[%s1480_s30 + $0xf8] sm:$0xff] %v1689_v36 }
 0x129   : > { %v829_v47 = vadd.f32 %v828_v41, %v1524_v38  ;;  %v964_v49 = vadd.f32 %v963_v37, %v901_v28  ;;  %v905_v38 = vmul.f32 %v1542_v54, %v1542_v54  ;;  %795 = vst [vmem:[%s1480_s30 + $0x170] sm:$0xff] %v1734_v34 }
 0x12a   : > { %807 = vst [vmem:[%s1480_s30 + $0x1d0] sm:$0xff] %v1736_v35 }
 0x12b   : > { %v830_v51 = vadd.f32 %v829_v47, %v1531_v42  ;;  %v965_v52 = vadd.f32 %v964_v49, %v902_v39  ;;  %v906_v42 = vmul.f32 %v1551_v60, %v1551_v60  ;;  %v912_v39 = vmul.f32 %v1622_v21, %v1622_v21 }
 0x12d   : > { %v831_v55 = vadd.f32 %v830_v51, %v1536_v48  ;;  %v966_v56 = vadd.f32 %v965_v52, %v903_v50  ;;  %v913_v50 = vmul.f32 %v1635_v25, %v1635_v25 }
 0x12f   : > { %v832_v58 = vadd.f32 %v831_v55, %v1542_v54  ;;  %v967_v59 = vadd.f32 %v966_v56, %v904_v53  ;;  %v907_v54 = vmul.f32 %v1565_v3, %v1565_v3  ;;  %v1754_v52 = vpop.f32.mrf.mxu2  ;;  %v1756_v53 = vpop.f32.mrf.mxu3  ;;  %v914_v55 = vmul.f32 %v1648_v29, %v1648_v29 }
 0x130   : > { %796 = vst [vmem:[%s1480_s30 + $0x178] sm:$0xff] %v1754_v52 }
 0x131   : > { %v833_v1 = vadd.f32 %v832_v58, %v1551_v60  ;;  %v968_v48 = vadd.f32 %v967_v59, %v905_v38  ;;  %808 = vst [vmem:[%s1480_s30 + $0x1d8] sm:$0xff] %v1756_v53 }
 0x133   : > { %v834_v8 = vadd.f32 %v833_v1, %v1565_v3  ;;  %v969_v12 = vadd.f32 %v968_v48, %v906_v42  ;;  %v910_v3 = vmul.f32 %v1596_v13, %v1596_v13  ;;  %v916_v42 = vmul.f32 %v1676_v61, %v1676_v61 }
 0x135   : > { %v970_v20 = vadd.f32 %v969_v12, %v907_v54  ;;  %v835_v32 = vadd.f32 %v834_v8, %v1574_v6  ;;  %v911_v6 = vmul.f32 %v1609_v17, %v1609_v17 }
 0x137   : > { %v836_v60 = vadd.f32 %v835_v32, %v1583_v9  ;;  %v971_v33 = vadd.f32 %v970_v20, %v908_v16  ;;  %v1774_v54 = vpop.f32.mrf.mxu3 }
 0x138   : > { %809 = vst [vmem:[%s1480_s30 + $0x1e0] sm:$0xff] %v1774_v54 }
 0x139   : > { %v837_v37 = vadd.f32 %v836_v60, %v1596_v13  ;;  %v972_v41 = vadd.f32 %v971_v33, %v909_v24  ;;  %v921_v60 = vmul.f32 %v1577_v7, %v1577_v7 }
 0x13b   : > { %v838_v9 = vadd.f32 %v837_v37, %v1609_v17  ;;  %v973_v28 = vadd.f32 %v972_v41, %v910_v3 }
 0x13d   : > { %v839_v47 = vadd.f32 %v838_v9, %v1622_v21  ;;  %v974_v49 = vadd.f32 %v973_v28, %v911_v6 }
 0x13f   : > { %v840_v13 = vadd.f32 %v839_v47, %v1635_v25  ;;  %v975_v51 = vadd.f32 %v974_v49, %v912_v39  ;;  %v915_v25 = vmul.f32 %v1663_v40, %v1663_v40  ;;  %v925_v47 = vmul.f32 %v1625_v22, %v1625_v22 }
 0x141   : > { %v841_v17 = vadd.f32 %v840_v13, %v1648_v29  ;;  %v976_v21 = vadd.f32 %v975_v51, %v913_v50  ;;  %v917_v29 = vmul.f32 %v1689_v36, %v1689_v36 }
 0x143   : > { %v977_v56 = vadd.f32 %v976_v21, %v914_v55  ;;  %v842_v38 = vadd.f32 %v841_v17, %v1663_v40  ;;  %v918_v40 = vmul.f32 %v1545_v57, %v1545_v57 }
 0x145   : > { %v978_v58 = vadd.f32 %v977_v56, %v915_v25  ;;  %v843_v59 = vadd.f32 %v842_v38, %v1676_v61  ;;  %v919_v61 = vmul.f32 %v1556_v63, %v1556_v63  ;;  %v929_v25 = vmul.f32 %v1679_v2, %v1679_v2 }
 0x147   : > { %v979_v1 = vadd.f32 %v978_v58, %v916_v42  ;;  %v844_v48 = vadd.f32 %v843_v59, %v1689_v36  ;;  %v920_v36 = vmul.f32 %v1568_v4, %v1568_v4 }
 0x149   : > { %v845_v8 = vadd.f32 %v844_v48, %v1545_v57  ;;  %v980_v12 = vadd.f32 %v979_v1, %v917_v29  ;;  %v1790_v57 = vpop.f32.mrf.mxu3 }
 0x14a   : > { %810 = vst [vmem:[%s1480_s30 + $0x1e8] sm:$0xff] %v1790_v57 }
 0x14b   : > { %v846_v16 = vadd.f32 %v845_v8, %v1556_v63  ;;  %v981_v20 = vadd.f32 %v980_v12, %v918_v40  ;;  %v922_v63 = vmul.f32 %v1586_v10, %v1586_v10 }
 0x14d   : > { %v847_v32 = vadd.f32 %v846_v16, %v1568_v4  ;;  %v982_v24 = vadd.f32 %v981_v20, %v919_v61  ;;  %v923_v4 = vmul.f32 %v1599_v14, %v1599_v14  ;;  %v933_v61 = vmul.f32 %v1754_v52, %v1754_v52 }
 0x14f   : > { %v848_v33 = vadd.f32 %v847_v32, %v1577_v7  ;;  %v983_v3 = vadd.f32 %v982_v24, %v920_v36  ;;  %v924_v7 = vmul.f32 %v1612_v18, %v1612_v18 }
 0x151   : > { %v849_v37 = vadd.f32 %v848_v33, %v1586_v10  ;;  %v984_v41 = vadd.f32 %v983_v3, %v921_v60  ;;  %v1806_v10 = vpop.f32.mrf.mxu3 }
 0x152   : > { %811 = vst [vmem:[%s1480_s30 + $0x1f0] sm:$0xff] %v1806_v10 }
 0x153   : > { %v850_v6 = vadd.f32 %v849_v37, %v1599_v14  ;;  %v985_v9 = vadd.f32 %v984_v41, %v922_v63  ;;  %v926_v14 = vmul.f32 %v1638_v26, %v1638_v26 }
 0x155   : > { %v986_v28 = vadd.f32 %v985_v9, %v923_v4  ;;  %v851_v39 = vadd.f32 %v850_v6, %v1612_v18  ;;  %v927_v18 = vmul.f32 %v1651_v30, %v1651_v30 }
 0x157   : > { %v852_v49 = vadd.f32 %v851_v39, %v1625_v22  ;;  %v987_v50 = vadd.f32 %v986_v28, %v924_v7  ;;  %v928_v22 = vmul.f32 %v1666_v45, %v1666_v45 }
 0x159   : > { %v853_v13 = vadd.f32 %v852_v49, %v1638_v26  ;;  %v988_v51 = vadd.f32 %v987_v50, %v925_v47  ;;  %v746_v26 = vpop.f32.mrf.mxu3 }
 0x15a   : > { %812 = vst [vmem:[%s1480_s30 + $0x1f8] sm:$0xff] %v746_v26 }
 0x15b   : > { %v854_v17 = vadd.f32 %v853_v13, %v1651_v30  ;;  %v989_v55 = vadd.f32 %v988_v51, %v926_v14  ;;  %v930_v30 = vmul.f32 %v1692_v43, %v1692_v43  ;;  %v945_v51 = vmul.f32 %v1756_v53, %v1756_v53 }
 0x15d   : > { %v855_v21 = vadd.f32 %v854_v17, %v1666_v45  ;;  %v990_v56 = vadd.f32 %v989_v55, %v927_v18  ;;  %v931_v45 = vmul.f32 %v1714_v62, %v1714_v62  ;;  %v946_v55 = vmul.f32 %v1774_v54, %v1774_v54 }
 0x15f   : > { %v856_v38 = vadd.f32 %v855_v21, %v1679_v2  ;;  %v991_v58 = vadd.f32 %v990_v56, %v928_v22  ;;  %v932_v2 = vmul.f32 %v1734_v34, %v1734_v34  ;;  %v947_v21 = vmul.f32 %v1790_v57, %v1790_v57 }
 0x161   : > { %v992_v59 = vadd.f32 %v991_v58, %v929_v25  ;;  %v857_v42 = vadd.f32 %v856_v38, %v1692_v43  ;;  %v934_v43 = vmul.f32 %v1588_v11, %v1588_v11  ;;  %v948_v38 = vmul.f32 %v1806_v10, %v1806_v10 }
 0x162   : > { %v949_v58 = vmul.f32 %v746_v26, %v746_v26 }
 0x163   : > { %v993_v1 = vadd.f32 %v992_v59, %v930_v30  ;;  %v858_v48 = vadd.f32 %v857_v42, %v1714_v62  ;;  %v935_v62 = vmul.f32 %v1601_v15, %v1601_v15 }
 0x165   : > { %v994_v29 = vadd.f32 %v993_v1, %v931_v45  ;;  %v859_v40 = vadd.f32 %v858_v48, %v1734_v34  ;;  %v936_v34 = vmul.f32 %v1614_v19, %v1614_v19 }
 0x167   : > { %v995_v8 = vadd.f32 %v994_v29, %v932_v2  ;;  %v860_v12 = vadd.f32 %v859_v40, %v1754_v52  ;;  %v937_v52 = vmul.f32 %v1627_v23, %v1627_v23 }
 0x169   : > { %v861_v16 = vadd.f32 %v860_v12, %v1588_v11  ;;  %v996_v20 = vadd.f32 %v995_v8, %v933_v61  ;;  %v938_v11 = vmul.f32 %v1640_v27, %v1640_v27 }
 0x16b   : > { %v862_v36 = vadd.f32 %v861_v16, %v1601_v15  ;;  %v997_v32 = vadd.f32 %v996_v20, %v934_v43  ;;  %v939_v15 = vmul.f32 %v1653_v31, %v1653_v31 }
 0x16d   : > { %v863_v24 = vadd.f32 %v862_v36, %v1614_v19  ;;  %v998_v60 = vadd.f32 %v997_v32, %v935_v62  ;;  %v940_v19 = vmul.f32 %v1668_v46, %v1668_v46 }
 0x16f   : > { %v864_v33 = vadd.f32 %v863_v24, %v1627_v23  ;;  %v999_v3 = vadd.f32 %v998_v60, %v936_v34  ;;  %v941_v23 = vmul.f32 %v1681_v5, %v1681_v5 }
 0x171   : > { %v865_v63 = vadd.f32 %v864_v33, %v1640_v27  ;;  %v1000_v37 = vadd.f32 %v999_v3, %v937_v52  ;;  %v942_v27 = vmul.f32 %v1694_v44, %v1694_v44 }
 0x173   : > { %v866_v41 = vadd.f32 %v865_v63, %v1653_v31  ;;  %v1001_v4 = vadd.f32 %v1000_v37, %v938_v11  ;;  %v943_v31 = vmul.f32 %v1716_v0, %v1716_v0 }
 0x175   : > { %v1002_v6 = vadd.f32 %v1001_v4, %v939_v15  ;;  %v867_v9 = vadd.f32 %v866_v41, %v1668_v46  ;;  %v944_v46 = vmul.f32 %v1736_v35, %v1736_v35 }
 0x177   : > { %v868_v7 = vadd.f32 %v867_v9, %v1681_v5  ;;  %v1003_v28 = vadd.f32 %v1002_v6, %v940_v19 }
 0x179   : > { %v869_v39 = vadd.f32 %v868_v7, %v1694_v44  ;;  %v1004_v47 = vadd.f32 %v1003_v28, %v941_v23 }
 0x17b   : > { %v870_v49 = vadd.f32 %v869_v39, %v1716_v0  ;;  %v1005_v50 = vadd.f32 %v1004_v47, %v942_v27 }
 0x17d   : > { %v871_v14 = vadd.f32 %v870_v49, %v1736_v35  ;;  %v1006_v13 = vadd.f32 %v1005_v50, %v943_v31 }
 0x17f   : > { %v872_v5 = vadd.f32 %v871_v14, %v1756_v53  ;;  %v1007_v18 = vadd.f32 %v1006_v13, %v944_v46 }
 0x181   : > { %v1008_v44 = vadd.f32 %v1007_v18, %v945_v51  ;;  %v873_v17 = vadd.f32 %v872_v5, %v1774_v54 }
 0x183   : > { %v1009_v0 = vadd.f32 %v1008_v44, %v946_v55  ;;  %v874_v22 = vadd.f32 %v873_v17, %v1790_v57  ;;  %v813_v57 = vld [vmem:[%s1904_s3] sm:$0x1] }
 0x185   : > { %v1010_v35 = vadd.f32 %v1009_v0, %v947_v21  ;;  %v875_v56 = vadd.f32 %v874_v22, %v1806_v10  ;;  %v885_v10 = vld [vmem:[%s1905_s4] sm:$0x1] }
 0x187   : > { %v1011_v53 = vadd.f32 %v1010_v35, %v948_v38  ;;  %v876_v25 = vadd.f32 %v875_v56, %v746_v26 }
 0x189   : > { %v877_v59 = vrot.slane %v876_v25, 4  ;;  %v1012_v42 = vadd.f32 %v1011_v53, %v949_v58 }
 0x18b   : > { %v878_v30 = vadd.f32 %v877_v59, %v876_v25  ;;  %v1013_v1 = vrot.slane %v1012_v42, 4 }
 0x18d   : > { %v879_v54 = vrot.slane %v878_v30, 2  ;;  %v1014_v48 = vadd.f32 %v1013_v1, %v1012_v42 }
 0x18f   : > { %v880_v45 = vadd.f32 %v879_v54, %v878_v30  ;;  %v1015_v29 = vrot.slane %v1014_v48, 2 }
 0x191   : > { %v881_v40 = vrot.slane %v880_v45, 1  ;;  %v1016_v2 = vadd.f32 %v1015_v29, %v1014_v48 }
 0x193   : > { %v882_v8 = vadd.f32 %v881_v40, %v880_v45  ;;  %v1017_v12 = vrot.slane %v1016_v2, 1 }
 0x195   : > { %v883_v26 = vadd.f32 %v882_v8, %v813_v57  ;;  %v1018_v61 = vadd.f32 %v1017_v12, %v1016_v2 }
 0x197   : > { %884 = vst [vmem:[%s1904_s3] sm:$0x1] %v883_v26  ;;  %v1019_v43 = vadd.f32 %v1018_v61, %v885_v10 }
 0x199   : > { %1020 = vst [vmem:[%s1905_s4] sm:$0x1] %v1019_v43 }
 0x19a PF: > { %s15_s17 = sadd.s32 1, %s1421_s17   ;;  %s1906_s15 = smov %s1417_s16 }
 0x19b   : > { %p12_p6 = scmp.ge.s32.totalorder %s15_s17, 6   ;;  %s1907_s16 = smov %s1909_s18 }
 0x19d   :  { %14 = sbr.rel (!%p12_p6) target bundleno = 2 (0x2), region = 81 }

// kernel: generator_forward.17
= control target key start
LH: loop header
LB: loop body
LE: loop exit
PB: predicated region body
PF: predicated region fallthrough
CT: control target
= control target key end

     0   :  { %s1385_s9 = smov 0   ;;  %s1387_s10 = smov 0   ;;  %s1560_s0 = inlined_call_operand.vmem [shape: bf16[4,2048,128], index: 0, kind: input, shape index: {}]   ;;  %s1561_s1 = inlined_call_operand.vmem [shape: bf16[4,128,128], index: 1, kind: input, shape index: {}]   ;;  %s1562_s2 = inlined_call_operand.vmem [shape: f32[4,2048,128], index: 2, kind: output, shape index: {}]  }
   0x1   :  { %s1389_s11 = smov 0   ;;  %s1391_s12 = smov 0  }
   0x2   :  { %s1393_s13 = smov 0  }
   0x3 LB: > { %s21_s14 = sadd.s32 1, %s1360_s11  ;;  %s24_s15 = sadd.s32 1, %s1364_s12  ;;  %s1368_s13 = sphi %s1393_s13, %s12_s13   ;;  %s1364_s12 = sphi %s1391_s12, %s1566_s12   ;;  %s1360_s11 = sphi %s1389_s11, %s1565_s11   ;;  %s1356_s10 = sphi %s1387_s10, %s1564_s10   ;;  %s1352_s9 = sphi %s1385_s9, %s1563_s9  }
   0x4   : > { %p22_p0 = scmp.ge.s32.totalorder %s21_s14, 4  ;;  %p926_p1 = scmp.ge.s32.totalorder %s1368_s13, 1 }
   0x5   : > { %p143_p2 = scmp.lt.s32.totalorder %s1368_s13, 17 }
   0x6   : > { %s1568_s14 = smov (%p22_p0, %s21_s14), 0  ;;  %s1570_s15 = smov (!%p22_p0, %s24_s15), %s1364_s12 }
   0x7   : > { %p144_p3 = pnand %p926_p1, %p143_p2  ;;  %p26_p4 = scmp.ge.s32.totalorder %s1570_s15, 4 }
   0x8   : > { %p179_p5 = scmp.lt.s32.totalorder (!%p144_p3), %s1356_s10, 3  ;;  %s927_s20 = sshll.u32 (!%p144_p3), %s1352_s9, 6 }
   0x9   : > { %s1572_s15 = smov (%p26_p4, %s1570_s15), 0  ;;  %147 = sbr.rel (%p144_p3) target bundleno = 311 (0x137), region = 28 }
   0xa   : > { %p181_p6 = scmp.lt.s32.totalorder (!%p144_p3), %s927_s20, 255 }
   0xe   : > { %s1574_s10 = smov (!%p179_p5, %s1356_s10), 3  ;;  %s1576_s20 = smov (!%p181_p6, %s927_s20), 255 }
   0xf   : > { %s1097_s16 = sshll.u32 %s1574_s10, 6  ;;  %s928_s21 = sshll.u32 %s1574_s10, 8 }
  0x10   : > { %s1423_s19 = scalar_lea.vmem %s1561_s1, %s1097_s16  ;;  %s1433_s22 = sadd.s32 %s928_s21, %s1576_s20 }
  0x11   : > { %v1137_v0 = vld [vmem:[%s1423_s19 + $0x38] sm:$0xff]  ;;  %v1136_v1 = vld [vmem:[%s1423_s19 + $0x30] sm:$0xff]  ;;  %v1135_v2 = vld [vmem:[%s1423_s19 + $0x28] sm:$0xff]  ;;  %s929_s23 = sshll.u32 %s1433_s22, 2  ;;  %s934_s27 = sshll.u32 %s1433_s22, 3 }
  0x12   : > { %523 = vmatpush.bf16.msra.mxu0 %v1137_v0  ;;  %1138 = vmatpush.bf16.msra.mxu1 %v1137_v0  ;;  %v1134_v3 = vld [vmem:[%s1423_s19 + $0x20] sm:$0xff]  ;;  %v1133_v4 = vld [vmem:[%s1423_s19 + $0x18] sm:$0xff]  ;;  %v1132_v5 = vld [vmem:[%s1423_s19 + $0x10] sm:$0xff]  ;;  %s1440_s26 = scalar_lea.vmem %s1560_s0, %s929_s23  ;;  %s1479_s30 = scalar_lea.vmem %s1562_s2, %s934_s27 }
  0x13   : > { %1139 = vmatpush.bf16.msra.mxu2 %v1137_v0  ;;  %1140 = vmatpush.bf16.msra.mxu3 %v1137_v0  ;;  %v1131_v6 = vld [vmem:[%s1423_s19 + $0x8] sm:$0xff]  ;;  %v1130_v7 = vld [vmem:[%s1423_s19] sm:$0xff]  ;;  %v1100_v16 = vld [vmem:[%s1440_s26 + $0x10] sm:$0xff] }
  0x14   : > { %v1098_v8 = vld [vmem:[%s1440_s26] sm:$0xff]  ;;  %v1099_v12 = vld [vmem:[%s1440_s26 + $0x8] sm:$0xff]  ;;  %v1108_v17 = vld [vmem:[%s1440_s26 + $0x50] sm:$0xff] }
  0x15   : > { %v1106_v9 = vld [vmem:[%s1440_s26 + $0x40] sm:$0xff]  ;;  %v1107_v13 = vld [vmem:[%s1440_s26 + $0x48] sm:$0xff]  ;;  %v1116_v18 = vld [vmem:[%s1440_s26 + $0x90] sm:$0xff] }
  0x16   : > { %524 = vmatpush.bf16.msra.mxu0 %v1136_v1  ;;  %1141 = vmatpush.bf16.msra.mxu1 %v1136_v1  ;;  %v1114_v10 = vld [vmem:[%s1440_s26 + $0x80] sm:$0xff]  ;;  %v1115_v14 = vld [vmem:[%s1440_s26 + $0x88] sm:$0xff]  ;;  %v1124_v19 = vld [vmem:[%s1440_s26 + $0xd0] sm:$0xff] }
  0x17   : > { %1142 = vmatpush.bf16.msra.mxu2 %v1136_v1  ;;  %1143 = vmatpush.bf16.msra.mxu3 %v1136_v1  ;;  %v1122_v11 = vld [vmem:[%s1440_s26 + $0xc0] sm:$0xff]  ;;  %v1123_v15 = vld [vmem:[%s1440_s26 + $0xc8] sm:$0xff]  ;;  %v1101_v20 = vld [vmem:[%s1440_s26 + $0x18] sm:$0xff] }
  0x18   : > { %v1109_v21 = vld [vmem:[%s1440_s26 + $0x58] sm:$0xff]  ;;  %v1102_v24 = vld [vmem:[%s1440_s26 + $0x20] sm:$0xff]  ;;  %v1103_v28 = vld [vmem:[%s1440_s26 + $0x28] sm:$0xff] }
  0x19   : > { %v1117_v22 = vld [vmem:[%s1440_s26 + $0x98] sm:$0xff]  ;;  %v1110_v25 = vld [vmem:[%s1440_s26 + $0x60] sm:$0xff]  ;;  %v1111_v29 = vld [vmem:[%s1440_s26 + $0x68] sm:$0xff] }
  0x1a   : > { %525 = vmatpush.bf16.msra.mxu0 %v1135_v2  ;;  %1144 = vmatpush.bf16.msra.mxu1 %v1135_v2  ;;  %v1125_v23 = vld [vmem:[%s1440_s26 + $0xd8] sm:$0xff]  ;;  %v1118_v26 = vld [vmem:[%s1440_s26 + $0xa0] sm:$0xff]  ;;  %v1119_v30 = vld [vmem:[%s1440_s26 + $0xa8] sm:$0xff] }
  0x1b   : > { %1145 = vmatpush.bf16.msra.mxu2 %v1135_v2  ;;  %1146 = vmatpush.bf16.msra.mxu3 %v1135_v2  ;;  %v1126_v27 = vld [vmem:[%s1440_s26 + $0xe0] sm:$0xff]  ;;  %v1127_v31 = vld [vmem:[%s1440_s26 + $0xe8] sm:$0xff]  ;;  %v1104_v32 = vld [vmem:[%s1440_s26 + $0x30] sm:$0xff] }
  0x1c   : > { %v1112_v33 = vld [vmem:[%s1440_s26 + $0x70] sm:$0xff]  ;;  %v1105_v36 = vld [vmem:[%s1440_s26 + $0x38] sm:$0xff] }
  0x1d   : > { %v1120_v34 = vld [vmem:[%s1440_s26 + $0xb0] sm:$0xff]  ;;  %v1113_v37 = vld [vmem:[%s1440_s26 + $0x78] sm:$0xff] }
  0x1e   : > { %526 = vmatpush.bf16.msra.mxu0 %v1134_v3  ;;  %1147 = vmatpush.bf16.msra.mxu1 %v1134_v3  ;;  %v1128_v35 = vld [vmem:[%s1440_s26 + $0xf0] sm:$0xff]  ;;  %v1121_v38 = vld [vmem:[%s1440_s26 + $0xb8] sm:$0xff] }
  0x1f   : > { %1148 = vmatpush.bf16.msra.mxu2 %v1134_v3  ;;  %1149 = vmatpush.bf16.msra.mxu3 %v1134_v3  ;;  %v1129_v39 = vld [vmem:[%s1440_s26 + $0xf8] sm:$0xff] }
  0x22   : > { %527 = vmatpush.bf16.msra.mxu0 %v1133_v4  ;;  %1150 = vmatpush.bf16.msra.mxu1 %v1133_v4 }
  0x23   : > { %1151 = vmatpush.bf16.msra.mxu2 %v1133_v4  ;;  %1152 = vmatpush.bf16.msra.mxu3 %v1133_v4 }
  0x26   : > { %528 = vmatpush.bf16.msra.mxu0 %v1132_v5  ;;  %1153 = vmatpush.bf16.msra.mxu1 %v1132_v5 }
  0x27   : > { %1154 = vmatpush.bf16.msra.mxu2 %v1132_v5  ;;  %1155 = vmatpush.bf16.msra.mxu3 %v1132_v5 }
  0x2a   : > { %529 = vmatpush.bf16.msra.mxu0 %v1131_v6  ;;  %1156 = vmatpush.bf16.msra.mxu1 %v1131_v6 }
  0x2b   : > { %1157 = vmatpush.bf16.msra.mxu2 %v1131_v6  ;;  %1158 = vmatpush.bf16.msra.mxu3 %v1131_v6 }
  0x2e   : > { %530 = vmatpush.bf16.msra.mxu0 %v1130_v7  ;;  %1159 = vmatpush.bf16.msra.mxu1 %v1130_v7 }
  0x2f   : > { %1160 = vmatpush.bf16.msra.mxu2 %v1130_v7  ;;  %1161 = vmatpush.bf16.msra.mxu3 %v1130_v7 }
  0x31   : > { %531 = vmatmul.bf16.vlgmr.msra.gmra.mxu0 %v1098_v8  ;;  %571 = vmatmul.bf16.vlgmr.msra.gmra.mxu1 %v1106_v9 }
  0x32   : > { %611 = vmatmul.bf16.vlgmr.msra.gmra.mxu2 %v1114_v10  ;;  %651 = vmatmul.bf16.vlgmr.msra.gmra.mxu3 %v1122_v11 }
  0x41   : > { %536 = vmatmul.bf16.gmra.mxu0 %v1099_v12  ;;  %576 = vmatmul.bf16.gmra.mxu1 %v1107_v13 }
  0x42   : > { %616 = vmatmul.bf16.gmra.mxu2 %v1115_v14  ;;  %656 = vmatmul.bf16.gmra.mxu3 %v1123_v15 }
  0x51   : > { %541 = vmatmul.bf16.gmra.mxu0 %v1100_v16  ;;  %581 = vmatmul.bf16.gmra.mxu1 %v1108_v17 }
  0x52   : > { %621 = vmatmul.bf16.gmra.mxu2 %v1116_v18  ;;  %661 = vmatmul.bf16.gmra.mxu3 %v1124_v19 }
  0x61   : > { %546 = vmatmul.bf16.gmra.mxu0 %v1101_v20  ;;  %586 = vmatmul.bf16.gmra.mxu1 %v1109_v21 }
  0x62   : > { %626 = vmatmul.bf16.gmra.mxu2 %v1117_v22  ;;  %666 = vmatmul.bf16.gmra.mxu3 %v1125_v23 }
  0x71   : > { %551 = vmatmul.bf16.gmra.mxu0 %v1102_v24  ;;  %591 = vmatmul.bf16.gmra.mxu1 %v1110_v25 }
  0x72   : > { %631 = vmatmul.bf16.gmra.mxu2 %v1118_v26  ;;  %671 = vmatmul.bf16.gmra.mxu3 %v1126_v27 }
  0x81   : > { %556 = vmatmul.bf16.gmra.mxu0 %v1103_v28  ;;  %596 = vmatmul.bf16.gmra.mxu1 %v1111_v29 }
  0x82   : > { %636 = vmatmul.bf16.gmra.mxu2 %v1119_v30  ;;  %676 = vmatmul.bf16.gmra.mxu3 %v1127_v31 }
  0x91   : > { %561 = vmatmul.bf16.gmra.mxu0 %v1104_v32  ;;  %601 = vmatmul.bf16.gmra.mxu1 %v1112_v33 }
  0x92   : > { %641 = vmatmul.bf16.gmra.mxu2 %v1120_v34  ;;  %681 = vmatmul.bf16.gmra.mxu3 %v1128_v35 }
  0xa1   : > { %566 = vmatmul.bf16.gmra.mxu0 %v1105_v36  ;;  %606 = vmatmul.bf16.gmra.mxu1 %v1113_v37 }
  0xa2   : > { %646 = vmatmul.bf16.gmra.mxu2 %v1121_v38  ;;  %686 = vmatmul.bf16.gmra.mxu3 %v1129_v39 }
  0xae   : > { %v532_v40 = vpop.f32.mrf.mxu0  ;;  %v572_v41 = vpop.f32.mrf.mxu1 }
  0xaf   : > { %1202 = vtanh.f32 %v532_v40 }
  0xb0   : > { %1204 = vtanh.f32 %v572_v41 }
  0xb5   : > { %v1203_v42 = vpop.eup %1202  ;;  %v612_v43 = vpop.f32.mrf.mxu2 }
  0xb6   : > { %v652_v44 = vpop.f32.mrf.mxu3  ;;  %v1205_v45 = vpop.eup %1204  ;;  %756 = vst [vmem:[%s1479_s30] sm:$0xff] %v1203_v42  ;;  %1206 = vtanh.f32 %v612_v43 }
  0xb7   : > { %v534_v46 = vpop.f32.mrf.mxu0  ;;  %v574_v47 = vpop.f32.mrf.mxu1  ;;  %772 = vst [vmem:[%s1479_s30 + $0x80] sm:$0xff] %v1205_v45  ;;  %1208 = vtanh.f32 %v652_v44 }
  0xb8   : > { %1210 = vtanh.f32 %v534_v46 }
  0xb9   : > { %1212 = vtanh.f32 %v574_v47 }
  0xbc   : > { %v1207_v48 = vpop.eup %1206 }
  0xbd   : > { %v1209_v49 = vpop.eup %1208  ;;  %788 = vst [vmem:[%s1479_s30 + $0x100] sm:$0xff] %v1207_v48  ;;  %v614_v50 = vpop.f32.mrf.mxu2 }
  0xbe   : > { %v654_v51 = vpop.f32.mrf.mxu3  ;;  %v1211_v52 = vpop.eup %1210  ;;  %804 = vst [vmem:[%s1479_s30 + $0x180] sm:$0xff] %v1209_v49  ;;  %1214 = vtanh.f32 %v614_v50 }
  0xbf   : > { %v537_v53 = vpop.f32.mrf.mxu0  ;;  %v577_v54 = vpop.f32.mrf.mxu1  ;;  %757 = vst [vmem:[%s1479_s30 + $0x8] sm:$0xff] %v1211_v52  ;;  %1216 = vtanh.f32 %v654_v51 }
  0xc0   : > { %v1213_v55 = vpop.eup %1212  ;;  %1218 = vtanh.f32 %v537_v53 }
  0xc1   : > { %773 = vst [vmem:[%s1479_s30 + $0x88] sm:$0xff] %v1213_v55  ;;  %1220 = vtanh.f32 %v577_v54 }
  0xc4   : > { %v1215_v56 = vpop.eup %1214 }
  0xc5   : > { %v1217_v57 = vpop.eup %1216  ;;  %789 = vst [vmem:[%s1479_s30 + $0x108] sm:$0xff] %v1215_v56  ;;  %v617_v58 = vpop.f32.mrf.mxu2 }
  0xc6   : > { %v657_v59 = vpop.f32.mrf.mxu3  ;;  %v1219_v60 = vpop.eup %1218  ;;  %805 = vst [vmem:[%s1479_s30 + $0x188] sm:$0xff] %v1217_v57  ;;  %1222 = vtanh.f32 %v617_v58 }
  0xc7   : > { %v539_v61 = vpop.f32.mrf.mxu0  ;;  %v579_v62 = vpop.f32.mrf.mxu1  ;;  %758 = vst [vmem:[%s1479_s30 + $0x10] sm:$0xff] %v1219_v60  ;;  %1224 = vtanh.f32 %v657_v59 }
  0xc8   : > { %v1221_v63 = vpop.eup %1220  ;;  %1226 = vtanh.f32 %v539_v61 }
  0xc9   : > { %774 = vst [vmem:[%s1479_s30 + $0x90] sm:$0xff] %v1221_v63  ;;  %1228 = vtanh.f32 %v579_v62 }
  0xcc   : > { %v1223_v0 = vpop.eup %1222 }
  0xcd   : > { %v1225_v1 = vpop.eup %1224  ;;  %790 = vst [vmem:[%s1479_s30 + $0x110] sm:$0xff] %v1223_v0  ;;  %v619_v2 = vpop.f32.mrf.mxu2 }
  0xce   : > { %v659_v3 = vpop.f32.mrf.mxu3  ;;  %v1227_v4 = vpop.eup %1226  ;;  %806 = vst [vmem:[%s1479_s30 + $0x190] sm:$0xff] %v1225_v1  ;;  %1230 = vtanh.f32 %v619_v2 }
  0xcf   : > { %v542_v5 = vpop.f32.mrf.mxu0  ;;  %v582_v6 = vpop.f32.mrf.mxu1  ;;  %759 = vst [vmem:[%s1479_s30 + $0x18] sm:$0xff] %v1227_v4  ;;  %1232 = vtanh.f32 %v659_v3 }
  0xd0   : > { %v1229_v7 = vpop.eup %1228  ;;  %1234 = vtanh.f32 %v542_v5 }
  0xd1   : > { %775 = vst [vmem:[%s1479_s30 + $0x98] sm:$0xff] %v1229_v7  ;;  %1236 = vtanh.f32 %v582_v6 }
  0xd4   : > { %v1231_v8 = vpop.eup %1230 }
  0xd5   : > { %v1233_v9 = vpop.eup %1232  ;;  %791 = vst [vmem:[%s1479_s30 + $0x118] sm:$0xff] %v1231_v8  ;;  %v622_v10 = vpop.f32.mrf.mxu2 }
  0xd6   : > { %v662_v11 = vpop.f32.mrf.mxu3  ;;  %v1235_v12 = vpop.eup %1234  ;;  %807 = vst [vmem:[%s1479_s30 + $0x198] sm:$0xff] %v1233_v9  ;;  %1238 = vtanh.f32 %v622_v10 }
  0xd7   : > { %v544_v13 = vpop.f32.mrf.mxu0  ;;  %v584_v14 = vpop.f32.mrf.mxu1  ;;  %760 = vst [vmem:[%s1479_s30 + $0x20] sm:$0xff] %v1235_v12  ;;  %1240 = vtanh.f32 %v662_v11 }
  0xd8   : > { %v1237_v15 = vpop.eup %1236  ;;  %1242 = vtanh.f32 %v544_v13 }
  0xd9   : > { %776 = vst [vmem:[%s1479_s30 + $0xa0] sm:$0xff] %v1237_v15  ;;  %1244 = vtanh.f32 %v584_v14 }
  0xdc   : > { %v1239_v16 = vpop.eup %1238 }
  0xdd   : > { %v1241_v17 = vpop.eup %1240  ;;  %792 = vst [vmem:[%s1479_s30 + $0x120] sm:$0xff] %v1239_v16  ;;  %v624_v18 = vpop.f32.mrf.mxu2 }
  0xde   : > { %v664_v19 = vpop.f32.mrf.mxu3  ;;  %v1243_v20 = vpop.eup %1242  ;;  %808 = vst [vmem:[%s1479_s30 + $0x1a0] sm:$0xff] %v1241_v17  ;;  %1246 = vtanh.f32 %v624_v18 }
  0xdf   : > { %v547_v21 = vpop.f32.mrf.mxu0  ;;  %v587_v22 = vpop.f32.mrf.mxu1  ;;  %761 = vst [vmem:[%s1479_s30 + $0x28] sm:$0xff] %v1243_v20  ;;  %1248 = vtanh.f32 %v664_v19 }
  0xe0   : > { %v1245_v23 = vpop.eup %1244  ;;  %1250 = vtanh.f32 %v547_v21 }
  0xe1   : > { %777 = vst [vmem:[%s1479_s30 + $0xa8] sm:$0xff] %v1245_v23  ;;  %1252 = vtanh.f32 %v587_v22 }
  0xe4   : > { %v1247_v24 = vpop.eup %1246 }
  0xe5   : > { %v1249_v25 = vpop.eup %1248  ;;  %793 = vst [vmem:[%s1479_s30 + $0x128] sm:$0xff] %v1247_v24  ;;  %v627_v26 = vpop.f32.mrf.mxu2 }
  0xe6   : > { %v667_v27 = vpop.f32.mrf.mxu3  ;;  %v1251_v28 = vpop.eup %1250  ;;  %809 = vst [vmem:[%s1479_s30 + $0x1a8] sm:$0xff] %v1249_v25  ;;  %1254 = vtanh.f32 %v627_v26 }
  0xe7   : > { %v549_v29 = vpop.f32.mrf.mxu0  ;;  %v589_v30 = vpop.f32.mrf.mxu1  ;;  %762 = vst [vmem:[%s1479_s30 + $0x30] sm:$0xff] %v1251_v28  ;;  %1256 = vtanh.f32 %v667_v27 }
  0xe8   : > { %v1253_v31 = vpop.eup %1252  ;;  %1258 = vtanh.f32 %v549_v29 }
  0xe9   : > { %778 = vst [vmem:[%s1479_s30 + $0xb0] sm:$0xff] %v1253_v31  ;;  %1260 = vtanh.f32 %v589_v30 }
  0xec   : > { %v1255_v32 = vpop.eup %1254 }
  0xed   : > { %v1257_v33 = vpop.eup %1256  ;;  %794 = vst [vmem:[%s1479_s30 + $0x130] sm:$0xff] %v1255_v32  ;;  %v629_v34 = vpop.f32.mrf.mxu2 }
  0xee   : > { %v669_v35 = vpop.f32.mrf.mxu3  ;;  %v1259_v36 = vpop.eup %1258  ;;  %810 = vst [vmem:[%s1479_s30 + $0x1b0] sm:$0xff] %v1257_v33  ;;  %1262 = vtanh.f32 %v629_v34 }
  0xef   : > { %v552_v37 = vpop.f32.mrf.mxu0  ;;  %v592_v38 = vpop.f32.mrf.mxu1  ;;  %763 = vst [vmem:[%s1479_s30 + $0x38] sm:$0xff] %v1259_v36  ;;  %1264 = vtanh.f32 %v669_v35 }
  0xf0   : > { %v1261_v39 = vpop.eup %1260  ;;  %1266 = vtanh.f32 %v552_v37 }
  0xf1   : > { %779 = vst [vmem:[%s1479_s30 + $0xb8] sm:$0xff] %v1261_v39  ;;  %1268 = vtanh.f32 %v592_v38 }
  0xf4   : > { %v1263_v40 = vpop.eup %1262 }
  0xf5   : > { %v1265_v41 = vpop.eup %1264  ;;  %795 = vst [vmem:[%s1479_s30 + $0x138] sm:$0xff] %v1263_v40  ;;  %v632_v42 = vpop.f32.mrf.mxu2 }
  0xf6   : > { %v672_v43 = vpop.f32.mrf.mxu3  ;;  %v1267_v44 = vpop.eup %1266  ;;  %811 = vst [vmem:[%s1479_s30 + $0x1b8] sm:$0xff] %v1265_v41  ;;  %1270 = vtanh.f32 %v632_v42 }
  0xf7   : > { %v554_v45 = vpop.f32.mrf.mxu0  ;;  %v594_v46 = vpop.f32.mrf.mxu1  ;;  %764 = vst [vmem:[%s1479_s30 + $0x40] sm:$0xff] %v1267_v44  ;;  %1272 = vtanh.f32 %v672_v43 }
  0xf8   : > { %v1269_v47 = vpop.eup %1268  ;;  %1274 = vtanh.f32 %v554_v45 }
  0xf9   : > { %780 = vst [vmem:[%s1479_s30 + $0xc0] sm:$0xff] %v1269_v47  ;;  %1276 = vtanh.f32 %v594_v46 }
  0xfc   : > { %v1271_v48 = vpop.eup %1270 }
  0xfd   : > { %v1273_v49 = vpop.eup %1272  ;;  %796 = vst [vmem:[%s1479_s30 + $0x140] sm:$0xff] %v1271_v48  ;;  %v634_v50 = vpop.f32.mrf.mxu2 }
  0xfe   : > { %v674_v51 = vpop.f32.mrf.mxu3  ;;  %v1275_v52 = vpop.eup %1274  ;;  %812 = vst [vmem:[%s1479_s30 + $0x1c0] sm:$0xff] %v1273_v49  ;;  %1278 = vtanh.f32 %v634_v50 }
  0xff   : > { %v557_v53 = vpop.f32.mrf.mxu0  ;;  %v597_v54 = vpop.f32.mrf.mxu1  ;;  %765 = vst [vmem:[%s1479_s30 + $0x48] sm:$0xff] %v1275_v52  ;;  %1280 = vtanh.f32 %v674_v51 }
 0x100   : > { %v1277_v55 = vpop.eup %1276  ;;  %1282 = vtanh.f32 %v557_v53 }
 0x101   : > { %781 = vst [vmem:[%s1479_s30 + $0xc8] sm:$0xff] %v1277_v55  ;;  %1284 = vtanh.f32 %v597_v54 }
 0x104   : > { %v1279_v56 = vpop.eup %1278 }
 0x105   : > { %v1281_v57 = vpop.eup %1280  ;;  %797 = vst [vmem:[%s1479_s30 + $0x148] sm:$0xff] %v1279_v56  ;;  %v637_v58 = vpop.f32.mrf.mxu2 }
 0x106   : > { %v677_v59 = vpop.f32.mrf.mxu3  ;;  %v1283_v60 = vpop.eup %1282  ;;  %813 = vst [vmem:[%s1479_s30 + $0x1c8] sm:$0xff] %v1281_v57  ;;  %1286 = vtanh.f32 %v637_v58 }
 0x107   : > { %v559_v61 = vpop.f32.mrf.mxu0  ;;  %v599_v62 = vpop.f32.mrf.mxu1  ;;  %766 = vst [vmem:[%s1479_s30 + $0x50] sm:$0xff] %v1283_v60  ;;  %1288 = vtanh.f32 %v677_v59 }
 0x108   : > { %v1285_v63 = vpop.eup %1284  ;;  %1290 = vtanh.f32 %v559_v61 }
 0x109   : > { %782 = vst [vmem:[%s1479_s30 + $0xd0] sm:$0xff] %v1285_v63  ;;  %1292 = vtanh.f32 %v599_v62 }
 0x10c   : > { %v1287_v0 = vpop.eup %1286 }
 0x10d   : > { %v1289_v1 = vpop.eup %1288  ;;  %798 = vst [vmem:[%s1479_s30 + $0x150] sm:$0xff] %v1287_v0  ;;  %v639_v2 = vpop.f32.mrf.mxu2 }
 0x10e   : > { %v679_v3 = vpop.f32.mrf.mxu3  ;;  %v1291_v4 = vpop.eup %1290  ;;  %814 = vst [vmem:[%s1479_s30 + $0x1d0] sm:$0xff] %v1289_v1  ;;  %1294 = vtanh.f32 %v639_v2 }
 0x10f   : > { %v562_v5 = vpop.f32.mrf.mxu0  ;;  %v602_v6 = vpop.f32.mrf.mxu1  ;;  %767 = vst [vmem:[%s1479_s30 + $0x58] sm:$0xff] %v1291_v4  ;;  %1296 = vtanh.f32 %v679_v3 }
 0x110   : > { %v1293_v7 = vpop.eup %1292  ;;  %1298 = vtanh.f32 %v562_v5 }
 0x111   : > { %783 = vst [vmem:[%s1479_s30 + $0xd8] sm:$0xff] %v1293_v7  ;;  %1300 = vtanh.f32 %v602_v6 }
 0x114   : > { %v1295_v8 = vpop.eup %1294 }
 0x115   : > { %v1297_v9 = vpop.eup %1296  ;;  %799 = vst [vmem:[%s1479_s30 + $0x158] sm:$0xff] %v1295_v8  ;;  %v642_v10 = vpop.f32.mrf.mxu2 }
 0x116   : > { %v682_v11 = vpop.f32.mrf.mxu3  ;;  %v1299_v12 = vpop.eup %1298  ;;  %815 = vst [vmem:[%s1479_s30 + $0x1d8] sm:$0xff] %v1297_v9  ;;  %1302 = vtanh.f32 %v642_v10 }
 0x117   : > { %v564_v13 = vpop.f32.mrf.mxu0  ;;  %v604_v14 = vpop.f32.mrf.mxu1  ;;  %768 = vst [vmem:[%s1479_s30 + $0x60] sm:$0xff] %v1299_v12  ;;  %1304 = vtanh.f32 %v682_v11 }
 0x118   : > { %v1301_v15 = vpop.eup %1300  ;;  %1306 = vtanh.f32 %v564_v13 }
 0x119   : > { %784 = vst [vmem:[%s1479_s30 + $0xe0] sm:$0xff] %v1301_v15  ;;  %1308 = vtanh.f32 %v604_v14 }
 0x11c   : > { %v1303_v16 = vpop.eup %1302 }
 0x11d   : > { %v1305_v17 = vpop.eup %1304  ;;  %800 = vst [vmem:[%s1479_s30 + $0x160] sm:$0xff] %v1303_v16  ;;  %v644_v18 = vpop.f32.mrf.mxu2 }
 0x11e   : > { %v684_v19 = vpop.f32.mrf.mxu3  ;;  %v1307_v20 = vpop.eup %1306  ;;  %816 = vst [vmem:[%s1479_s30 + $0x1e0] sm:$0xff] %v1305_v17  ;;  %1310 = vtanh.f32 %v644_v18 }
 0x11f   : > { %v567_v21 = vpop.f32.mrf.mxu0  ;;  %v607_v22 = vpop.f32.mrf.mxu1  ;;  %769 = vst [vmem:[%s1479_s30 + $0x68] sm:$0xff] %v1307_v20  ;;  %1312 = vtanh.f32 %v684_v19 }
 0x120   : > { %v1309_v23 = vpop.eup %1308  ;;  %1314 = vtanh.f32 %v567_v21 }
 0x121   : > { %785 = vst [vmem:[%s1479_s30 + $0xe8] sm:$0xff] %v1309_v23  ;;  %1316 = vtanh.f32 %v607_v22 }
 0x124   : > { %v1311_v24 = vpop.eup %1310 }
 0x125   : > { %v1313_v25 = vpop.eup %1312  ;;  %801 = vst [vmem:[%s1479_s30 + $0x168] sm:$0xff] %v1311_v24  ;;  %v647_v26 = vpop.f32.mrf.mxu2 }
 0x126   : > { %v687_v27 = vpop.f32.mrf.mxu3  ;;  %v1315_v28 = vpop.eup %1314  ;;  %817 = vst [vmem:[%s1479_s30 + $0x1e8] sm:$0xff] %v1313_v25  ;;  %1318 = vtanh.f32 %v647_v26 }
 0x127   : > { %v569_v29 = vpop.f32.mrf.mxu0  ;;  %v609_v30 = vpop.f32.mrf.mxu1  ;;  %770 = vst [vmem:[%s1479_s30 + $0x70] sm:$0xff] %v1315_v28  ;;  %1320 = vtanh.f32 %v687_v27 }
 0x128   : > { %v1317_v31 = vpop.eup %1316  ;;  %1322 = vtanh.f32 %v569_v29 }
 0x129   : > { %786 = vst [vmem:[%s1479_s30 + $0xf0] sm:$0xff] %v1317_v31  ;;  %1324 = vtanh.f32 %v609_v30 }
 0x12c   : > { %v1319_v32 = vpop.eup %1318 }
 0x12d   : > { %v1321_v33 = vpop.eup %1320  ;;  %802 = vst [vmem:[%s1479_s30 + $0x170] sm:$0xff] %v1319_v32  ;;  %v649_v34 = vpop.f32.mrf.mxu2 }
 0x12e   : > { %v689_v35 = vpop.f32.mrf.mxu3  ;;  %v1323_v36 = vpop.eup %1322  ;;  %818 = vst [vmem:[%s1479_s30 + $0x1f0] sm:$0xff] %v1321_v33  ;;  %1326 = vtanh.f32 %v649_v34 }
 0x12f   : > { %v1325_v37 = vpop.eup %1324  ;;  %771 = vst [vmem:[%s1479_s30 + $0x78] sm:$0xff] %v1323_v36  ;;  %1328 = vtanh.f32 %v689_v35 }
 0x130   : > { %787 = vst [vmem:[%s1479_s30 + $0xf8] sm:$0xff] %v1325_v37 }
 0x134   : > { %v1327_v38 = vpop.eup %1326 }
 0x135   : > { %v1329_v39 = vpop.eup %1328  ;;  %803 = vst [vmem:[%s1479_s30 + $0x178] sm:$0xff] %v1327_v38 }
 0x136   : > { %819 = vst [vmem:[%s1479_s30 + $0x1f8] sm:$0xff] %v1329_v39 }
 0x137 PF: > { %s12_s13 = sadd.s32 1, %s1368_s13   ;;  %s1563_s9 = smov %s1360_s11 }
 0x138   : > { %p9_p7 = scmp.ge.s32.totalorder %s12_s13, 18   ;;  %s1564_s10 = smov %s1364_s12 }
 0x139   : > { %s1565_s11 = smov %s1568_s14  ;;  %s1566_s12 = smov %s1572_s15 }
 0x13a   :  { %11 = sbr.rel (!%p9_p7) target bundleno = 3 (0x3), region = 61 }

</bundles_post_ra>
